<compile_context>
chip_gen: v7x
topology: tpu7x:2x2x1
jax: 0.10.0
libtpu: 0.0.40
codegen_flags: <defaults>
</compile_context>

<pallas_src>
import jax
import jax.numpy as jnp
from jax.experimental import pallas as pl
from jax.experimental.pallas import tpu as pltpu

C = 64            # _Residual_Block hard-codes 64 channels
EPS = 1e-5        # nn.InstanceNorm2d default eps
NEG_SLOPE = 0.2   # nn.LeakyReLU(0.2)


def _conv3x3_packed(pad_ref, w_ref, H, W, Cc):
    """3x3 / stride-1 conv over the zero-padded f32 VMEM halo scratch.

    w_ref is (3, Cc, 3*Cc) bf16 with w_ref[dx][ci, dy*Cc + co] = W_torch[co, ci, dy, dx].
    For each dx we run ONE ((H+2)*W, Cc) @ (Cc, 3*Cc) MXU matmul (dy folded into
    the output/N dim, bf16 operands, f32 accumulation), accumulate over dx, and
    assemble the conv output with 3 dy-row-shifted, 64-lane-sliced adds.
    All slice offsets are static; they are copy-free when W % 8 == 0.
    """
    M = (H + 2) * W
    acc = None
    for dx in range(3):
        xs = pad_ref[:, dx:dx + W, :].astype(jnp.bfloat16).reshape(M, Cc)
        y = jnp.dot(xs, w_ref[dx], preferred_element_type=jnp.float32)
        acc = y if acc is None else acc + y
    # acc[(r, w), dy*Cc + co] = sum_{dx, ci} pad[r, w + dx, ci] * W[co, ci, dy, dx]
    out = (acc[0 * W:0 * W + H * W, 0 * Cc:1 * Cc]
           + acc[1 * W:1 * W + H * W, 1 * Cc:2 * Cc]
           + acc[2 * W:2 * W + H * W, 2 * Cc:3 * Cc])
    return out  # (H*W, Cc) f32


def _instance_norm_affine(v, gamma, beta, inv_hw):
    """Two-pass InstanceNorm (biased var) with the affine folded into one FMA."""
    mean = jnp.sum(v, axis=0, keepdims=True) * inv_hw                 # (1, C)
    centered = v - mean
    var = jnp.sum(centered * centered, axis=0, keepdims=True) * inv_hw
    scale = jax.lax.rsqrt(var + EPS) * gamma                          # (1, C)
    return centered * scale + beta


def _residual_block_kernel(x_ref, w1_ref, w2_ref, aff_ref, out_ref, pad_ref):
    # One grid step per batch sample (InstanceNorm statistics are per-sample).
    H = out_ref.shape[1]
    W = out_ref.shape[2]
    Cc = out_ref.shape[3]
    inv_hw = 1.0 / float(H * W)

    # ---- zero only the 1-px halo border (interior is fully overwritten below).
    # Done every step so it stays correct if a spatial "parallel" axis is added
    # and each TensorCore gets its own scratch instance.
    zrow = jnp.zeros((1, W + 2, Cc), jnp.float32)
    zcol = jnp.zeros((H, 1, Cc), jnp.float32)
    pad_ref[0:1, :, :] = zrow
    pad_ref[H + 1:H + 2, :, :] = zrow
    pad_ref[1:H + 1, 0:1, :] = zcol
    pad_ref[1:H + 1, W + 1:W + 2, :] = zcol

    # ---- conv1: copy x into the halo-padded scratch, packed 3x3 conv on the MXU
    pad_ref[1:H + 1, 1:W + 1, :] = x_ref[0]
    h = _conv3x3_packed(pad_ref, w1_ref, H, W, Cc)

    # ---- InstanceNorm2d(64, affine=True) #1 + LeakyReLU(0.2)
    h = _instance_norm_affine(h, aff_ref[0:1, :], aff_ref[1:2, :], inv_hw)
    h = jnp.where(h >= 0, h, NEG_SLOPE * h)

    # ---- conv2 (reuse the same padded scratch; border is still zero)
    pad_ref[1:H + 1, 1:W + 1, :] = h.reshape(H, W, Cc)
    h2 = _conv3x3_packed(pad_ref, w2_ref, H, W, Cc)

    # ---- InstanceNorm2d #2
    h2 = _instance_norm_affine(h2, aff_ref[2:3, :], aff_ref[3:4, :], inv_hw)

    # ---- residual add with the f32 identity (not the bf16 conv operand)
    out_ref[...] = (h2.reshape(1, H, W, Cc) + x_ref[...]).astype(out_ref.dtype)


def _pack_conv_weight(w):
    """(Cout, Cin, kh, kw) -> (kw, Cin, kh*Cout) bf16; [dx, ci, dy*Cout + co]."""
    cout, cin = w.shape[0], w.shape[1]
    return jnp.transpose(w, (3, 1, 2, 0)).reshape(3, cin, 3 * cout).astype(jnp.bfloat16)


def _vmem_budget_bytes(H, W, Cc):
    """Rough per-step VMEM budget (lane padding to 128 / 256 included)."""
    lane = 128                               # C=64 blocks lane-pad to 128
    blk = H * W * lane * 4                   # one (1,H,W,64) f32 block
    io = 2 * 2 * blk                         # double-buffered input + output
    scratch = (H + 2) * (((W + 2) + 7) // 8 * 8) * lane * 4      # f32 halo scratch
    weights = 2 * 2 * 3 * Cc * 256 * 2       # 2 convs, double-buffered, 192->256 lanes
    live = 3 * (H + 2) * W * 256 * 4 + 4 * blk   # matmul accumulator + f32 temporaries
    return io + scratch + weights + live


def residual_block(x_nchw, w1, w2, g1, b1, g2, b2):
    """x_nchw: (N, 64, H, W) f32; conv weights in PyTorch layout (Cout, Cin, 3, 3)."""
    N, Cin, H, W = x_nchw.shape
    # NOTE: in-kernel row-shift slices / reshapes are copy-free when W % 8 == 0.
    x = jnp.transpose(x_nchw, (0, 2, 3, 1))                       # NHWC

    w1_p = _pack_conv_weight(w1)
    w2_p = _pack_conv_weight(w2)

    # pack all four affine vectors into one small VMEM input: rows = g1,b1,g2,b2
    aff = jnp.stack([g1, b1, g2, b2], axis=0).astype(jnp.float32)  # (4, C)

    vmem_limit = int(min(max(2 * _vmem_budget_bytes(H, W, Cin), 32 * 1024 * 1024),
                         100 * 1024 * 1024))

    out = pl.pallas_call(
        _residual_block_kernel,
        out_shape=jax.ShapeDtypeStruct((N, H, W, Cin), x.dtype),
        grid=(N,),
        in_specs=[
            pl.BlockSpec((1, H, W, Cin), lambda n: (n, 0, 0, 0)),       # x
            pl.BlockSpec((3, Cin, 3 * Cin), lambda n: (0, 0, 0)),       # conv1 weights (packed)
            pl.BlockSpec((3, Cin, 3 * Cin), lambda n: (0, 0, 0)),       # conv2 weights (packed)
            pl.BlockSpec((4, Cin), lambda n: (0, 0)),                   # g1,b1,g2,b2
        ],
        out_specs=pl.BlockSpec((1, H, W, Cin), lambda n: (n, 0, 0, 0)),
        scratch_shapes=[pltpu.VMEM((H + 2, W + 2, Cin), jnp.float32)],
        compiler_params=pltpu.CompilerParams(
            dimension_semantics=("parallel",),
            vmem_limit_bytes=vmem_limit),
    )(x, w1_p, w2_p, aff)

    return jnp.transpose(out, (0, 3, 1, 2))                        # back to NCHW


def _reference(x, w1, w2, g1, b1, g2, b2):
    """Pure-JAX f32 reference mirroring the PyTorch forward (NCHW)."""
    def conv(inp, w):
        return jax.lax.conv_general_dilated(
            inp, w, window_strides=(1, 1), padding=((1, 1), (1, 1)),
            dimension_numbers=("NCHW", "OIHW", "NCHW"))

    def inorm(inp, g, b):
        mean = jnp.mean(inp, axis=(2, 3), keepdims=True)
        var = jnp.mean((inp - mean) ** 2, axis=(2, 3), keepdims=True)
        return ((inp - mean) * jax.lax.rsqrt(var + EPS)
                * g.reshape(1, -1, 1, 1) + b.reshape(1, -1, 1, 1))

    h = conv(x, w1)
    h = inorm(h, g1, b1)
    h = jnp.where(h >= 0, h, NEG_SLOPE * h)
    h = conv(h, w2)
    h = inorm(h, g2, b2)
    return h + x


if __name__ == "__main__":
    key = jax.random.PRNGKey(0)
    kx, kw1, kw2, kg1, kb1, kg2, kb2 = jax.random.split(key, 7)

    N, H, W = 2, 16, 16          # small; C is fixed to 64 by the module
    x = jax.random.normal(kx, (N, C, H, W), jnp.float32)

    # Deterministic synthetic parameters (PyTorch shapes: conv (64,64,3,3), IN affine (64,))
    w1 = 0.05 * jax.random.normal(kw1, (C, C, 3, 3), jnp.float32)
    w2 = 0.05 * jax.random.normal(kw2, (C, C, 3, 3), jnp.float32)
    g1 = 1.0 + 0.1 * jax.random.normal(kg1, (C,), jnp.float32)
    b1 = 0.1 * jax.random.normal(kb1, (C,), jnp.float32)
    g2 = 1.0 + 0.1 * jax.random.normal(kg2, (C,), jnp.float32)
    b2 = 0.1 * jax.random.normal(kb2, (C,), jnp.float32)

    out = jax.block_until_ready(residual_block(x, w1, w2, g1, b1, g2, b2))
    ref = jax.block_until_ready(_reference(x, w1, w2, g1, b1, g2, b2))

    assert out.shape == (N, C, H, W)
    # bf16 MXU operands (f32 accumulation) vs. a pure-f32 reference: tolerance
    # relaxed accordingly (observed error is well below this bound).
    assert jnp.allclose(out, ref, atol=5e-2, rtol=5e-2), float(jnp.max(jnp.abs(out - ref)))
    print("KERNEL_OK")
</pallas_src>

<mosaic_0001>
module attributes {stable_mosaic.version = 11 : i64} {
  func.func @_residual_block_kernel(%arg0: i32, %arg1: memref<1x16x16x64xf32, #tpu.memory_space<vmem>>, %arg2: memref<3x64x192xbf16, #tpu.memory_space<vmem>>, %arg3: memref<3x64x192xbf16, #tpu.memory_space<vmem>>, %arg4: memref<4x64xf32, #tpu.memory_space<vmem>>, %arg5: memref<1x16x16x64xf32, #tpu.memory_space<vmem>>, %arg6: memref<18x18x64xf32, #tpu.memory_space<vmem>>) attributes {dimension_semantics = [#tpu.dimension_semantics<parallel>], iteration_bounds = array<i64: 2>, scalar_prefetch = 0 : i64, scratch_operands = 1 : i64, tpu.core_type = #tpu.core_type<tc>, window_params = [{transform_indices = @transform_0, window_bounds = array<i64: 1, 16, 16, 64>}, {pipeline_mode = #tpu.pipeline_mode<synchronous>, transform_indices = @transform_1, window_bounds = array<i64: 3, 64, 192>}, {pipeline_mode = #tpu.pipeline_mode<synchronous>, transform_indices = @transform_2, window_bounds = array<i64: 3, 64, 192>}, {pipeline_mode = #tpu.pipeline_mode<synchronous>, transform_indices = @transform_3, window_bounds = array<i64: 4, 64>}, {transform_indices = @transform_4, window_bounds = array<i64: 1, 16, 16, 64>}]} {
    %cst = arith.constant 0.000000e+00 : f32
    %0 = vector.broadcast %cst : f32 to vector<1x18x64xf32>
    %cst_0 = arith.constant 0.000000e+00 : f32
    %1 = vector.broadcast %cst_0 : f32 to vector<16x1x64xf32>
    %c0 = arith.constant 0 : index
    %c0_1 = arith.constant 0 : index
    %c0_2 = arith.constant 0 : index
    %2 = vector.load %arg6[%c0, %c0_1, %c0_2] : memref<18x18x64xf32, #tpu.memory_space<vmem>>, vector<1x18x64xf32>
    tpu.vector_store %arg6[%c0, %c0_1, %c0_2], %0 {strides = array<i32>} : memref<18x18x64xf32, #tpu.memory_space<vmem>>, vector<1x18x64xf32>,
    %c17 = arith.constant 17 : index
    %c0_3 = arith.constant 0 : index
    %c0_4 = arith.constant 0 : index
    %3 = vector.load %arg6[%c17, %c0_3, %c0_4] : memref<18x18x64xf32, #tpu.memory_space<vmem>>, vector<1x18x64xf32>
    tpu.vector_store %arg6[%c17, %c0_3, %c0_4], %0 {strides = array<i32>} : memref<18x18x64xf32, #tpu.memory_space<vmem>>, vector<1x18x64xf32>,
    %c1 = arith.constant 1 : index
    %c0_5 = arith.constant 0 : index
    %c0_6 = arith.constant 0 : index
    %4 = vector.load %arg6[%c1, %c0_5, %c0_6] : memref<18x18x64xf32, #tpu.memory_space<vmem>>, vector<16x1x64xf32>
    tpu.vector_store %arg6[%c1, %c0_5, %c0_6], %1 {strides = array<i32>} : memref<18x18x64xf32, #tpu.memory_space<vmem>>, vector<16x1x64xf32>,
    %c1_7 = arith.constant 1 : index
    %c17_8 = arith.constant 17 : index
    %c0_9 = arith.constant 0 : index
    %5 = vector.load %arg6[%c1_7, %c17_8, %c0_9] : memref<18x18x64xf32, #tpu.memory_space<vmem>>, vector<16x1x64xf32>
    tpu.vector_store %arg6[%c1_7, %c17_8, %c0_9], %1 {strides = array<i32>} : memref<18x18x64xf32, #tpu.memory_space<vmem>>, vector<16x1x64xf32>,
    %c0_10 = arith.constant 0 : index
    %c0_11 = arith.constant 0 : index
    %c0_12 = arith.constant 0 : index
    %c0_13 = arith.constant 0 : index
    %6 = vector.load %arg1[%c0_10, %c0_11, %c0_12, %c0_13] : memref<1x16x16x64xf32, #tpu.memory_space<vmem>>, vector<1x16x16x64xf32>
    %7 = vector.shape_cast %6 : vector<1x16x16x64xf32> to vector<16x16x64xf32>
    %c1_14 = arith.constant 1 : index
    %c1_15 = arith.constant 1 : index
    %c0_16 = arith.constant 0 : index
    %8 = vector.load %arg6[%c1_14, %c1_15, %c0_16] : memref<18x18x64xf32, #tpu.memory_space<vmem>>, vector<16x16x64xf32>
    tpu.vector_store %arg6[%c1_14, %c1_15, %c0_16], %7 {strides = array<i32>} : memref<18x18x64xf32, #tpu.memory_space<vmem>>, vector<16x16x64xf32>,
    %c0_17 = arith.constant 0 : index
    %c0_18 = arith.constant 0 : index
    %c0_19 = arith.constant 0 : index
    %9 = vector.load %arg6[%c0_17, %c0_18, %c0_19] : memref<18x18x64xf32, #tpu.memory_space<vmem>>, vector<18x16x64xf32>
    %10 = arith.truncf %9 : vector<18x16x64xf32> to vector<18x16x64xbf16>
    %11 = vector.shape_cast %10 : vector<18x16x64xbf16> to vector<288x64xbf16>
    %c0_20 = arith.constant 0 : index
    %c0_21 = arith.constant 0 : index
    %c0_22 = arith.constant 0 : index
    %12 = vector.load %arg2[%c0_20, %c0_21, %c0_22] : memref<3x64x192xbf16, #tpu.memory_space<vmem>>, vector<1x64x192xbf16>
    %13 = vector.shape_cast %12 : vector<1x64x192xbf16> to vector<64x192xbf16>
    %cst_23 = arith.constant dense<0.000000e+00> : vector<288x192xf32>
    %14 = tpu.matmul %11, %13, %cst_23 {dimension_numbers = #tpu.dot_dimension_numbers<[1], [0], [0], [1], [0, 0, 1, 1], [], []>} : vector<288x64xbf16>, vector<64x192xbf16>, vector<288x192xf32> -> vector<288x192xf32>
    %c0_24 = arith.constant 0 : index
    %c1_25 = arith.constant 1 : index
    %c0_26 = arith.constant 0 : index
    %15 = vector.load %arg6[%c0_24, %c1_25, %c0_26] : memref<18x18x64xf32, #tpu.memory_space<vmem>>, vector<18x16x64xf32>
    %16 = arith.truncf %15 : vector<18x16x64xf32> to vector<18x16x64xbf16>
    %17 = vector.shape_cast %16 : vector<18x16x64xbf16> to vector<288x64xbf16>
    %c1_27 = arith.constant 1 : index
    %c0_28 = arith.constant 0 : index
    %c0_29 = arith.constant 0 : index
    %18 = vector.load %arg2[%c1_27, %c0_28, %c0_29] : memref<3x64x192xbf16, #tpu.memory_space<vmem>>, vector<1x64x192xbf16>
    %19 = vector.shape_cast %18 : vector<1x64x192xbf16> to vector<64x192xbf16>
    %cst_30 = arith.constant dense<0.000000e+00> : vector<288x192xf32>
    %20 = tpu.matmul %17, %19, %cst_30 {dimension_numbers = #tpu.dot_dimension_numbers<[1], [0], [0], [1], [0, 0, 1, 1], [], []>} : vector<288x64xbf16>, vector<64x192xbf16>, vector<288x192xf32> -> vector<288x192xf32>
    %21 = arith.addf %14, %20 : vector<288x192xf32>
    %c0_31 = arith.constant 0 : index
    %c2 = arith.constant 2 : index
    %c0_32 = arith.constant 0 : index
    %22 = vector.load %arg6[%c0_31, %c2, %c0_32] : memref<18x18x64xf32, #tpu.memory_space<vmem>>, vector<18x16x64xf32>
    %23 = arith.truncf %22 : vector<18x16x64xf32> to vector<18x16x64xbf16>
    %24 = vector.shape_cast %23 : vector<18x16x64xbf16> to vector<288x64xbf16>
    %c2_33 = arith.constant 2 : index
    %c0_34 = arith.constant 0 : index
    %c0_35 = arith.constant 0 : index
    %25 = vector.load %arg2[%c2_33, %c0_34, %c0_35] : memref<3x64x192xbf16, #tpu.memory_space<vmem>>, vector<1x64x192xbf16>
    %26 = vector.shape_cast %25 : vector<1x64x192xbf16> to vector<64x192xbf16>
    %cst_36 = arith.constant dense<0.000000e+00> : vector<288x192xf32>
    %27 = tpu.matmul %24, %26, %cst_36 {dimension_numbers = #tpu.dot_dimension_numbers<[1], [0], [0], [1], [0, 0, 1, 1], [], []>} : vector<288x64xbf16>, vector<64x192xbf16>, vector<288x192xf32> -> vector<288x192xf32>
    %28 = arith.addf %21, %27 : vector<288x192xf32>
    %29 = vector.extract_strided_slice %28 {offsets = [0, 0], sizes = [256, 64], strides = [1, 1]} : vector<288x192xf32> to vector<256x64xf32>
    %30 = vector.extract_strided_slice %28 {offsets = [16, 64], sizes = [256, 64], strides = [1, 1]} : vector<288x192xf32> to vector<256x64xf32>
    %31 = arith.addf %29, %30 : vector<256x64xf32>
    %32 = vector.extract_strided_slice %28 {offsets = [32, 128], sizes = [256, 64], strides = [1, 1]} : vector<288x192xf32> to vector<256x64xf32>
    %33 = arith.addf %31, %32 : vector<256x64xf32>
    %c0_37 = arith.constant 0 : index
    %c0_38 = arith.constant 0 : index
    %34 = vector.load %arg4[%c0_37, %c0_38] : memref<4x64xf32, #tpu.memory_space<vmem>>, vector<1x64xf32>
    %c1_39 = arith.constant 1 : index
    %c0_40 = arith.constant 0 : index
    %35 = vector.load %arg4[%c1_39, %c0_40] : memref<4x64xf32, #tpu.memory_space<vmem>>, vector<1x64xf32>
    %cst_41 = arith.constant dense<0.000000e+00> : vector<64xf32>
    %36 = vector.multi_reduction <add>, %33, %cst_41 [0] : vector<256x64xf32> to vector<64xf32>
    %37 = vector.shape_cast %36 : vector<64xf32> to vector<1x64xf32>
    %cst_42 = arith.constant 3.906250e-03 : f32
    %38 = vector.broadcast %cst_42 : f32 to vector<1x64xf32>
    %39 = arith.mulf %37, %38 : vector<1x64xf32>
    %40 = vector.broadcast %39 : vector<1x64xf32> to vector<256x64xf32>
    %41 = arith.subf %33, %40 : vector<256x64xf32>
    %42 = arith.mulf %41, %41 : vector<256x64xf32>
    %cst_43 = arith.constant dense<0.000000e+00> : vector<64xf32>
    %43 = vector.multi_reduction <add>, %42, %cst_43 [0] : vector<256x64xf32> to vector<64xf32>
    %44 = vector.shape_cast %43 : vector<64xf32> to vector<1x64xf32>
    %cst_44 = arith.constant 3.906250e-03 : f32
    %45 = vector.broadcast %cst_44 : f32 to vector<1x64xf32>
    %46 = arith.mulf %44, %45 : vector<1x64xf32>
    %cst_45 = arith.constant 9.99999974E-6 : f32
    %47 = vector.broadcast %cst_45 : f32 to vector<1x64xf32>
    %48 = arith.addf %46, %47 : vector<1x64xf32>
    %49 = math.rsqrt %48 : vector<1x64xf32>
    %50 = arith.mulf %49, %34 : vector<1x64xf32>
    %51 = vector.broadcast %50 : vector<1x64xf32> to vector<256x64xf32>
    %52 = arith.mulf %41, %51 : vector<256x64xf32>
    %53 = vector.broadcast %35 : vector<1x64xf32> to vector<256x64xf32>
    %54 = arith.addf %52, %53 : vector<256x64xf32>
    %cst_46 = arith.constant 0.000000e+00 : f32
    %55 = vector.broadcast %cst_46 : f32 to vector<256x64xf32>
    %56 = arith.cmpf oge, %54, %55 : vector<256x64xf32>
    %cst_47 = arith.constant 2.000000e-01 : f32
    %57 = vector.broadcast %cst_47 : f32 to vector<256x64xf32>
    %58 = arith.mulf %57, %54 : vector<256x64xf32>
    %59 = arith.select %56, %54, %58 : vector<256x64xi1>, vector<256x64xf32>
    %60 = vector.shape_cast %59 : vector<256x64xf32> to vector<16x16x64xf32>
    %c1_48 = arith.constant 1 : index
    %c1_49 = arith.constant 1 : index
    %c0_50 = arith.constant 0 : index
    %61 = vector.load %arg6[%c1_48, %c1_49, %c0_50] : memref<18x18x64xf32, #tpu.memory_space<vmem>>, vector<16x16x64xf32>
    tpu.vector_store %arg6[%c1_48, %c1_49, %c0_50], %60 {strides = array<i32>} : memref<18x18x64xf32, #tpu.memory_space<vmem>>, vector<16x16x64xf32>,
    %c0_51 = arith.constant 0 : index
    %c0_52 = arith.constant 0 : index
    %c0_53 = arith.constant 0 : index
    %62 = vector.load %arg6[%c0_51, %c0_52, %c0_53] : memref<18x18x64xf32, #tpu.memory_space<vmem>>, vector<18x16x64xf32>
    %63 = arith.truncf %62 : vector<18x16x64xf32> to vector<18x16x64xbf16>
    %64 = vector.shape_cast %63 : vector<18x16x64xbf16> to vector<288x64xbf16>
    %c0_54 = arith.constant 0 : index
    %c0_55 = arith.constant 0 : index
    %c0_56 = arith.constant 0 : index
    %65 = vector.load %arg3[%c0_54, %c0_55, %c0_56] : memref<3x64x192xbf16, #tpu.memory_space<vmem>>, vector<1x64x192xbf16>
    %66 = vector.shape_cast %65 : vector<1x64x192xbf16> to vector<64x192xbf16>
    %cst_57 = arith.constant dense<0.000000e+00> : vector<288x192xf32>
    %67 = tpu.matmul %64, %66, %cst_57 {dimension_numbers = #tpu.dot_dimension_numbers<[1], [0], [0], [1], [0, 0, 1, 1], [], []>} : vector<288x64xbf16>, vector<64x192xbf16>, vector<288x192xf32> -> vector<288x192xf32>
    %c0_58 = arith.constant 0 : index
    %c1_59 = arith.constant 1 : index
    %c0_60 = arith.constant 0 : index
    %68 = vector.load %arg6[%c0_58, %c1_59, %c0_60] : memref<18x18x64xf32, #tpu.memory_space<vmem>>, vector<18x16x64xf32>
    %69 = arith.truncf %68 : vector<18x16x64xf32> to vector<18x16x64xbf16>
    %70 = vector.shape_cast %69 : vector<18x16x64xbf16> to vector<288x64xbf16>
    %c1_61 = arith.constant 1 : index
    %c0_62 = arith.constant 0 : index
    %c0_63 = arith.constant 0 : index
    %71 = vector.load %arg3[%c1_61, %c0_62, %c0_63] : memref<3x64x192xbf16, #tpu.memory_space<vmem>>, vector<1x64x192xbf16>
    %72 = vector.shape_cast %71 : vector<1x64x192xbf16> to vector<64x192xbf16>
    %cst_64 = arith.constant dense<0.000000e+00> : vector<288x192xf32>
    %73 = tpu.matmul %70, %72, %cst_64 {dimension_numbers = #tpu.dot_dimension_numbers<[1], [0], [0], [1], [0, 0, 1, 1], [], []>} : vector<288x64xbf16>, vector<64x192xbf16>, vector<288x192xf32> -> vector<288x192xf32>
    %74 = arith.addf %67, %73 : vector<288x192xf32>
    %c0_65 = arith.constant 0 : index
    %c2_66 = arith.constant 2 : index
    %c0_67 = arith.constant 0 : index
    %75 = vector.load %arg6[%c0_65, %c2_66, %c0_67] : memref<18x18x64xf32, #tpu.memory_space<vmem>>, vector<18x16x64xf32>
    %76 = arith.truncf %75 : vector<18x16x64xf32> to vector<18x16x64xbf16>
    %77 = vector.shape_cast %76 : vector<18x16x64xbf16> to vector<288x64xbf16>
    %c2_68 = arith.constant 2 : index
    %c0_69 = arith.constant 0 : index
    %c0_70 = arith.constant 0 : index
    %78 = vector.load %arg3[%c2_68, %c0_69, %c0_70] : memref<3x64x192xbf16, #tpu.memory_space<vmem>>, vector<1x64x192xbf16>
    %79 = vector.shape_cast %78 : vector<1x64x192xbf16> to vector<64x192xbf16>
    %cst_71 = arith.constant dense<0.000000e+00> : vector<288x192xf32>
    %80 = tpu.matmul %77, %79, %cst_71 {dimension_numbers = #tpu.dot_dimension_numbers<[1], [0], [0], [1], [0, 0, 1, 1], [], []>} : vector<288x64xbf16>, vector<64x192xbf16>, vector<288x192xf32> -> vector<288x192xf32>
    %81 = arith.addf %74, %80 : vector<288x192xf32>
    %82 = vector.extract_strided_slice %81 {offsets = [0, 0], sizes = [256, 64], strides = [1, 1]} : vector<288x192xf32> to vector<256x64xf32>
    %83 = vector.extract_strided_slice %81 {offsets = [16, 64], sizes = [256, 64], strides = [1, 1]} : vector<288x192xf32> to vector<256x64xf32>
    %84 = arith.addf %82, %83 : vector<256x64xf32>
    %85 = vector.extract_strided_slice %81 {offsets = [32, 128], sizes = [256, 64], strides = [1, 1]} : vector<288x192xf32> to vector<256x64xf32>
    %86 = arith.addf %84, %85 : vector<256x64xf32>
    %c2_72 = arith.constant 2 : index
    %c0_73 = arith.constant 0 : index
    %87 = vector.load %arg4[%c2_72, %c0_73] : memref<4x64xf32, #tpu.memory_space<vmem>>, vector<1x64xf32>
    %c3 = arith.constant 3 : index
    %c0_74 = arith.constant 0 : index
    %88 = vector.load %arg4[%c3, %c0_74] : memref<4x64xf32, #tpu.memory_space<vmem>>, vector<1x64xf32>
    %cst_75 = arith.constant dense<0.000000e+00> : vector<64xf32>
    %89 = vector.multi_reduction <add>, %86, %cst_75 [0] : vector<256x64xf32> to vector<64xf32>
    %90 = vector.shape_cast %89 : vector<64xf32> to vector<1x64xf32>
    %cst_76 = arith.constant 3.906250e-03 : f32
    %91 = vector.broadcast %cst_76 : f32 to vector<1x64xf32>
    %92 = arith.mulf %90, %91 : vector<1x64xf32>
    %93 = vector.broadcast %92 : vector<1x64xf32> to vector<256x64xf32>
    %94 = arith.subf %86, %93 : vector<256x64xf32>
    %95 = arith.mulf %94, %94 : vector<256x64xf32>
    %cst_77 = arith.constant dense<0.000000e+00> : vector<64xf32>
    %96 = vector.multi_reduction <add>, %95, %cst_77 [0] : vector<256x64xf32> to vector<64xf32>
    %97 = vector.shape_cast %96 : vector<64xf32> to vector<1x64xf32>
    %cst_78 = arith.constant 3.906250e-03 : f32
    %98 = vector.broadcast %cst_78 : f32 to vector<1x64xf32>
    %99 = arith.mulf %97, %98 : vector<1x64xf32>
    %cst_79 = arith.constant 9.99999974E-6 : f32
    %100 = vector.broadcast %cst_79 : f32 to vector<1x64xf32>
    %101 = arith.addf %99, %100 : vector<1x64xf32>
    %102 = math.rsqrt %101 : vector<1x64xf32>
    %103 = arith.mulf %102, %87 : vector<1x64xf32>
    %104 = vector.broadcast %103 : vector<1x64xf32> to vector<256x64xf32>
    %105 = arith.mulf %94, %104 : vector<256x64xf32>
    %106 = vector.broadcast %88 : vector<1x64xf32> to vector<256x64xf32>
    %107 = arith.addf %105, %106 : vector<256x64xf32>
    %108 = vector.shape_cast %107 : vector<256x64xf32> to vector<1x16x16x64xf32>
    %c0_80 = arith.constant 0 : index
    %c0_81 = arith.constant 0 : index
    %c0_82 = arith.constant 0 : index
    %c0_83 = arith.constant 0 : index
    %109 = vector.load %arg1[%c0_80, %c0_81, %c0_82, %c0_83] : memref<1x16x16x64xf32, #tpu.memory_space<vmem>>, vector<1x16x16x64xf32>
    %110 = arith.addf %108, %109 : vector<1x16x16x64xf32>
    %c0_84 = arith.constant 0 : index
    %c0_85 = arith.constant 0 : index
    %c0_86 = arith.constant 0 : index
    %c0_87 = arith.constant 0 : index
    %111 = vector.load %arg5[%c0_84, %c0_85, %c0_86, %c0_87] : memref<1x16x16x64xf32, #tpu.memory_space<vmem>>, vector<1x16x16x64xf32>
    tpu.vector_store %arg5[%c0_84, %c0_85, %c0_86, %c0_87], %110 {strides = array<i32>} : memref<1x16x16x64xf32, #tpu.memory_space<vmem>>, vector<1x16x16x64xf32>,
    return
  }
  func.func @transform_0(%arg0: i32) -> (i32, i32, i32, i32) {
    %c0_i32 = arith.constant 0 : i32
    %c0_i32_0 = arith.constant 0 : i32
    %c0_i32_1 = arith.constant 0 : i32
    %c0_i32_2 = arith.constant 0 : i32
    return %arg0, %c0_i32, %c0_i32_0, %c0_i32_1 : i32, i32, i32, i32
  }
  func.func @transform_1(%arg0: i32) -> (i32, i32, i32) {
    %c0_i32 = arith.constant 0 : i32
    %c0_i32_0 = arith.constant 0 : i32
    %c0_i32_1 = arith.constant 0 : i32
    %c0_i32_2 = arith.constant 0 : i32
    return %c0_i32, %c0_i32_0, %c0_i32_1 : i32, i32, i32
  }
  func.func @transform_2(%arg0: i32) -> (i32, i32, i32) {
    %c0_i32 = arith.constant 0 : i32
    %c0_i32_0 = arith.constant 0 : i32
    %c0_i32_1 = arith.constant 0 : i32
    %c0_i32_2 = arith.constant 0 : i32
    return %c0_i32, %c0_i32_0, %c0_i32_1 : i32, i32, i32
  }
  func.func @transform_3(%arg0: i32) -> (i32, i32) {
    %c0_i32 = arith.constant 0 : i32
    %c0_i32_0 = arith.constant 0 : i32
    %c0_i32_1 = arith.constant 0 : i32
    return %c0_i32, %c0_i32_0 : i32, i32
  }
  func.func @transform_4(%arg0: i32) -> (i32, i32, i32, i32) {
    %c0_i32 = arith.constant 0 : i32
    %c0_i32_0 = arith.constant 0 : i32
    %c0_i32_1 = arith.constant 0 : i32
    %c0_i32_2 = arith.constant 0 : i32
    return %arg0, %c0_i32, %c0_i32_0, %c0_i32_1 : i32, i32, i32, i32
  }
}

</mosaic_0001>

<bundles_post_ra>
// kernel: tpu_custom_call.1
= control target key start
LH: loop header
LB: loop body
LE: loop exit
PB: predicated region body
PF: predicated region fallthrough
CT: control target
= control target key end

     0   :  { %9 = vsyncpa [#allocation4], 0  ;;  %s7019_s0 = inlined_call_operand.hbm [shape: f32[2,16,16,64], index: 0, kind: input, shape index: {}]   ;;  %s7020_s1 = inlined_call_operand.hbm [shape: bf16[3,64,192], index: 1, kind: input, shape index: {}]   ;;  %s7021_s2 = inlined_call_operand.hbm [shape: bf16[3,64,192], index: 2, kind: input, shape index: {}]   ;;  %s7022_s3 = inlined_call_operand.vmem [shape: f32[4,64], index: 3, kind: input, shape index: {}]   ;;  %s7023_s4 = inlined_call_operand.hbm [shape: f32[2,16,16,64], index: 4, kind: output, shape index: {}]  }
   0x1   :  { %11 = vsyncpa [#allocation4 + $0x1], 0 }
   0x2   :  { %12 = vsyncpa [#allocation7], 0 }
   0x3   :  { %13 = vsyncpa [#allocation5], 0 }
   0x4   :  { %15 = vsyncpa [#allocation5 + $0x1], 0  ;;  %s4721_s15 = smov 0   ;;  %s4723_s16 = smov 0  }
   0x5   :  { %s4725_s17 = smov 0   ;;  %s4727_s18 = smov 0  }
   0x6 LB: > { %s4742_s19 = sadd.s32 4294967295, %s4683_s18   ;;  %s3943_s20 = sadd.s32 4294967294, %s4683_s18   ;;  %s4683_s18 = sphi %s4727_s18, %s7121_s18   ;;  %s4679_s17 = sphi %s4725_s17, %s7120_s17   ;;  %s4675_s16 = sphi %s4723_s16, %s7119_s16   ;;  %s4671_s15 = sphi %s4721_s15, %s7118_s15  }
   0x7   : > { %p41_p0 = scmp.ne.s32.totalorder %s4675_s16, %s4671_s15  ;;  %p7024_p1 = scmp.eq.s32.totalorder %s4742_s19, 0 }
   0x8   : > { %p134_p3 = scmp.eq.s32.totalorder %s3943_s20, 1  ;;  %p3944_p5 = scmp.ge.s32.totalorder %s4683_s18, 1 }
   0x9   : > { %p4751_p4 = por %p7024_p1, %p41_p0  ;;  %p141_p7 = scmp.lt.s32.totalorder %s4683_s18, 3 }
   0xa   : > { %p4756_p6 = por %p134_p3, %p41_p0  ;;  %s4685_s24 = smov [#allocation6]  }
   0xb   : > { %s7043_s21 = scalar_select %p4751_p4, 1, 0 }
   0xc   : > { %s7044_s22 = scalar_select %p4756_p6, 1, 0 }
   0xd   : > { %p4761_p8 = pnand %p3944_p5, %p141_p7  ;;  %s153_s25 = sshll.u32 %s4685_s24, 4  ;;  %s4765_s25 = int_to_ptr.vmem [resolvable:$true] %s153_s25 }
   0xe   : > { %s4686_s27 = smov [#allocation8]   ;;  %s4527_s5 = scalar_lea.hbm %s7020_s1, 3072 }
   0xf   : > { %p4389_p9 = pneg %p4761_p8  ;;  %s166_s28 = sshll.u32 %s4686_s27, 4  ;;  %s4776_s28 = int_to_ptr.vmem [resolvable:$true] %s166_s28 }
  0x10   : > { %p4528_p12 = scmp.ne.s32.totalorder %s7020_s1, %s4527_s5  ;;  %p4534_p5 = scmp.lt.u32.totalorder %s4527_s5, %s7020_s1 }
  0x11   : > { %p4772_p11 = pnand %p4389_p9, %p7024_p1 }
  0x13   : > { %p4529_p13 = pneg %p4772_p11 }
  0x15   : > { %p4530_p0 = pnand %p4529_p13, %p4528_p12 }
  0x17   : > { %p4531_p3 = pneg %p4530_p0 }
  0x19   : > { %p4536_p7 = pnand %p4534_p5, %p4531_p3 }
  0x1b   : > { %4539 = shalt.err (!%p4536_p7)
}
  0x1c   : > { %s4540_s10 = scalar_lea.vmem %s4765_s25, 3072  ;;  %p4548_p2 = scmp.lt.s32.totalorder %s4765_s25, %s4765_s25 }
  0x1d   : > { %p4541_p9 = scmp.ne.s32.totalorder %s4765_s25, %s4540_s10  ;;  %p4549_p12 = scmp.lt.s32.totalorder %s4540_s10, %s4540_s10 }
  0x1f   : > { %p4543_p10 = pnand %p4541_p9, %p4529_p13  ;;  %p4550_p0 = por %p4549_p12, %p4548_p2 }
  0x21   : > { %p4544_p1 = pneg %p4543_p10 }
  0x23   : > { %p4551_p6 = pnand %p4550_p0, %p4544_p1 }
  0x25   : > { %4554 = shalt.err (!%p4551_p6)
}
  0x26   : > { %s4687_s11 = smov 128   ;;  %s4688_s12 = smov 8  }
  0x27   : > { %4392 = dma.hbm_to_vmem [thread:$0]  (!%p4772_p11), %s7020_s1, 3072, %s4765_s25, [#allocation7], %s4687_s11, %s4687_s11, %s4688_s12  }
  0x28   : > { %s4555_s27 = scalar_lea.hbm %s7021_s2, 3072 }
  0x29   : > { %p4556_p1 = scmp.ne.s32.totalorder %s7021_s2, %s4555_s27  ;;  %p4562_p10 = scmp.lt.u32.totalorder %s4555_s27, %s7021_s2 }
  0x2b   : > { %p4558_p2 = pnand %p4556_p1, %p4529_p13 }
  0x2d   : > { %p4559_p6 = pneg %p4558_p2 }
  0x2f   : > { %p4564_p3 = pnand %p4562_p10, %p4559_p6 }
  0x31   : > { %4567 = shalt.err (!%p4564_p3)
}
  0x32   : > { %s4568_s25 = scalar_lea.vmem %s4776_s28, 3072  ;;  %p4576_p12 = scmp.lt.s32.totalorder %s4776_s28, %s4776_s28 }
  0x33   : > { %p4569_p5 = scmp.ne.s32.totalorder %s4776_s28, %s4568_s25  ;;  %p4577_p0 = scmp.lt.s32.totalorder %s4568_s25, %s4568_s25 }
  0x35   : > { %p4571_p7 = pnand %p4569_p5, %p4529_p13  ;;  %p4578_p1 = por %p4577_p0, %p4576_p12 }
  0x37   : > { %p4572_p9 = pneg %p4571_p7 }
  0x39   : > { %p4579_p2 = pnand %p4578_p1, %p4572_p9 }
  0x3b   : > { %4582 = shalt.err (!%p4579_p2)
}
  0x3c   : > { %4395 = dma.hbm_to_vmem [thread:$0]  (!%p4772_p11), %s7021_s2, 3072, %s4776_s28, [#allocation7], %s4687_s11, %s4687_s11, %s4688_s12  }
  0x3d   : > { %s4837_s26 = sadd.s32 1, %s4683_s18   ;;  %s28_s9 = sadd.s32 1, %s4679_s17 }
  0x3e   : > { %s25_s10 = ssub.s32 %s4683_s18, %s4837_s26  ;;  %p35_p13 = scmp.ne.s32.totalorder %s4679_s17, %s4675_s16 }
  0x3f   : > { %p26_p6 = scmp.eq.s32.totalorder %s25_s10, 0  ;;  %p36_p10 = scmp.eq.s32.totalorder %s4683_s18, 0 }
  0x40   : > { %p7047_p3 = scmp.eq.s32.totalorder %s4742_s19, 1  ;;  %p4406_p7 = scmp.lt.s32.totalorder %s4683_s18, 2 }
  0x41   : > { %s4853_s14 = scalar_select %p26_p6, %s4679_s17, %s28_s9  }
  0x42   : > { %p4847_p5 = por %p7047_p3, %p35_p13  ;;  %p37_p9 = por %p36_p10, %p35_p13 }
  0x43   : > { %s183_s20 = sand.u32 1, %s4679_s17   ;;  %s4119_s28 = sshll.u32 %s4683_s18, 12 }
  0x44   : > { %s7048_s13 = scalar_select %p4847_p5, 1, 0 }
  0x45   : > { %s3948_s24 = sshll.u32 %s183_s20, 8  ;;  %s4860_s30 = scalar_lea.hbm %s7019_s0, %s4119_s28 }
  0x46   : > { %s187_s5 = scalar_lea.vmem [#allocation3], %s3948_s24  ;;  %p4864_p11 = pnand %p4406_p7, %p37_p9 }
  0x47   : > { %s194_s6 = sshll.u32 %s187_s5, 4  ;;  %s4868_s7 = scalar_lea.sflag [#allocation4], %s183_s20  ;;  %s4862_s6 = int_to_ptr.vmem [resolvable:$true] %s194_s6 }
  0x48   : > { %s4583_s8 = scalar_lea.hbm %s4860_s30, 4096  ;;  %p4585_p0 = pneg %p4864_p11 }
  0x49   : > { %p4584_p12 = scmp.ne.s32.totalorder %s4860_s30, %s4583_s8  ;;  %s4588_s24 = scalar_lea.hbm %s7019_s0, 8192 }
  0x4a   : > { %p4589_p13 = scmp.lt.u32.totalorder %s4860_s30, %s7019_s0  ;;  %p4590_p6 = scmp.lt.u32.totalorder %s4588_s24, %s4583_s8 }
  0x4b   : > { %p4586_p1 = pnand %p4585_p0, %p4584_p12  ;;  %p4592_p3 = scmp.lt.u32.totalorder %s4583_s8, %s4860_s30 }
  0x4c   : > { %p4591_p10 = por %p4590_p6, %p4589_p13 }
  0x4d   : > { %p4587_p2 = pneg %p4586_p1 }
  0x4e   : > { %p4593_p7 = por %p4592_p3, %p4591_p10 }
  0x50   : > { %p4594_p9 = pnand %p4593_p7, %p4587_p2 }
  0x52   : > { %4597 = shalt.err (!%p4594_p9)
}
  0x53   : > { %s4598_s20 = scalar_lea.vmem %s4862_s6, 4096  ;;  %s4689_s29 = smov [#allocation3]  }
  0x54   : > { %p4599_p12 = scmp.ne.s32.totalorder %s4862_s6, %s4598_s20  ;;  %s4603_s5 = sshll.u32 %s4689_s29, 4  ;;  %s4604_s5 = int_to_ptr.vmem [resolvable:$false] %s4603_s5 }
  0x55   : > { %s4605_s9 = scalar_lea.vmem %s4604_s5, 8192  ;;  %p4606_p4 = scmp.lt.s32.totalorder %s4862_s6, %s4604_s5 }
  0x56   : > { %p4601_p1 = pnand %p4599_p12, %p4585_p0  ;;  %p4607_p13 = scmp.lt.s32.totalorder %s4605_s9, %s4598_s20 }
  0x58   : > { %p4602_p5 = pneg %p4601_p1  ;;  %p4608_p6 = por %p4607_p13, %p4606_p4 }
  0x5a   : > { %p4609_p10 = pnand %p4608_p6, %p4602_p5 }
  0x5c   : > { %4612 = shalt.err (!%p4609_p10)
}
  0x5d   : > { %4399 = dma.hbm_to_vmem [thread:$0]  (!%p4864_p11), %s4860_s30, 4096, %s4862_s6, %s4868_s7, %s4687_s11, %s4687_s11, %s4688_s12  }
  0x5e   : > { %206 = sbr.rel (%p4761_p8) target bundleno = 1943 (0x797), region = 36 }
  0x65   : > { %s4902_s8 = sand.u32 1, %s4675_s16   ;;  %p7050_p4 = scmp.ne.s32.totalorder %s7043_s21, 0 }
  0x66   : > { %s3952_s10 = sshll.u32 %s4902_s8, 8  ;;  %s209_s24 = scalar_lea.sflag [#allocation4], %s4902_s8 }
  0x67   : > { %s4908_s25 = scalar_lea.vmem [#allocation3], %s3952_s10 }
  0x68   : > { %4658 = dma.done.wait (%p7050_p4), %s209_s24, 4096  }
  0x69   : > { %4660 = vsyncadd (%p7050_p4), %s209_s24, 4294963200  ;;  %p7051_p5 = scmp.eq.s32.totalorder %s4742_s19, 0 }
  0x6b   : > { %4662 = dma.done.wait (%p7051_p5), [#allocation7], 6144   ;;  %p7052_p8 = pmov %p7051_p5 }
  0x6c   : > { %vm246_vm0 = vcmask 523264   ;;  %vm249_vm1 = vcmask 517120   ;;  %v7027_v0 = vmov 0   ;;  %v4691_v1 = vmov 0.0   ;;  %v4451_v2 = vld [vmem:[#allocation6 + $0x44] ss:$8 sps:$4 sm:$0xff]  }
  0x6d   : > { %4664 = vsyncadd (%p7052_p8), [#allocation7], 4294961152  ;;  %604 = vmatprep.mubr.bf16.mxu0 %v7027_v0  ;;  %247 = vst.msk [vmem:[#allocation2] sm:$0xff] %vm246_vm0, %v4691_v1  ;;  %2362 = vmatprep.mubr.bf16.mxu1 %v7027_v0  ;;  %v4453_v3 = vld [vmem:[#allocation6 + $0x40] ss:$8 sps:$4 sm:$0xff]   ;;  %v291_v11 = vld [vmem:[%s4908_s25 + $0x10] sm:$0xff] }
  0x6e   : > { %248 = vst.msk [vmem:[#allocation2 + $0x8] sm:$0xff] %vm246_vm0, %v4691_v1  ;;  %252 = vst.msk [vmem:[#allocation2 + $0x198] sm:$0xff] %vm246_vm0, %v4691_v1  ;;  %572 = vmatprep.subr.bf16.mxu0 %v4451_v2  ;;  %v4454_v4 = vld [vmem:[#allocation6 + $0x54] ss:$8 sps:$4 sm:$0xff]   ;;  %v4456_v5 = vld [vmem:[#allocation6 + $0x50] ss:$8 sps:$4 sm:$0xff]  }
  0x6f   : > { %250 = vst.msk [vmem:[#allocation2 + $0x10] sm:$0x3] %vm249_vm1, %v4691_v1  ;;  %254 = vst.msk [vmem:[#allocation2 + $0x1a8] sm:$0x3] %vm249_vm1, %v4691_v1  ;;  %573 = vmatpush1.bf16.msra.mxu0 %v4453_v3  ;;  %v4457_v6 = vld [vmem:[#allocation6 + $0x64] ss:$8 sps:$4 sm:$0xff]  }
  0x70   : > { %253 = vst.msk [vmem:[#allocation2 + $0x1a0] sm:$0xff] %vm246_vm0, %v4691_v1  ;;  %574 = vmatprep.subr.bf16.mxu0 %v4454_v4  ;;  %v4459_v7 = vld [vmem:[#allocation6 + $0x60] ss:$8 sps:$4 sm:$0xff]   ;;  %v4460_v8 = vld [vmem:[#allocation6 + $0x74] ss:$8 sps:$4 sm:$0xff]   ;;  %323 = vst.msk [vmem:[#allocation2 + $0x31] sm:$0xff] %vm246_vm0, %v291_v11 }
  0x71   : > { %v289_v9 = vld [vmem:[%s4908_s25] sm:$0xff]  ;;  %v290_v10 = vld [vmem:[%s4908_s25 + $0x8] sm:$0xff]  ;;  %v292_v12 = vld [vmem:[%s4908_s25 + $0x18] sm:$0xff]  ;;  %vm256_vm2 = vcmask 516096   ;;  %s4692_s21 = smov 64   ;;  %s6784_s20 = scalar_lea.vmem [#allocation9], %s3952_s10 }
  0x72   : > { %321 = vst.msk [vmem:[#allocation2 + $0x19] sm:$0xff] %vm246_vm0, %v289_v9  ;;  %322 = vst.msk [vmem:[#allocation2 + $0x21] sm:$0xff] %vm246_vm0, %v290_v10  ;;  %v293_v13 = vld [vmem:[%s4908_s25 + $0x20] sm:$0xff]  ;;  %v4462_v14 = vld [vmem:[#allocation6 + $0x70] ss:$8 sps:$4 sm:$0xff]   ;;  %s4120_s29 = sshll.u32 %s4742_s19, 12 }
  0x73   : > { %575 = vmatpush1.bf16.msra.mxu0 %v4456_v5  ;;  %324 = vst.msk [vmem:[#allocation2 + $0x39] sm:$0xff] %vm246_vm0, %v292_v12  ;;  %v294_v16 = vld [vmem:[%s4908_s25 + $0x28] sm:$0xff]  ;;  %325 = vst.msk [vmem:[#allocation2 + $0x49] sm:$0xff] %vm246_vm0, %v293_v13  ;;  %v295_v17 = vld [vmem:[%s4908_s25 + $0x30] sm:$0xff]  ;;  %s3851_s5 = sshll.u32 %s6784_s20, 4  ;;  %s6943_s24 = scalar_lea.hbm %s7023_s4, %s4120_s29  ;;  %s6947_s5 = int_to_ptr.vmem [resolvable:$true] %s3851_s5 }
  0x74   : > { %576 = vmatprep.subr.bf16.mxu0 %v4457_v6  ;;  %v296_v18 = vld [vmem:[%s4908_s25 + $0x38] sm:$0xff]  ;;  %326 = vst.msk [vmem:[#allocation2 + $0x51] sm:$0xff] %vm246_vm0, %v294_v16  ;;  %327 = vst.msk [vmem:[#allocation2 + $0x61] sm:$0xff] %vm246_vm0, %v295_v17  ;;  %v4465_v20 = vld [vmem:[#allocation6 + $0x4] ss:$8 sps:$4 sm:$0xff]   ;;  %s3838_s19 = scalar_lea.sflag [#allocation5], %s4902_s8 }
  0x75   : > { %v415_v15 = vld [vmem:[#allocation2 + $0x1] sm:$0xff]  ;;  %328 = vst.msk [vmem:[#allocation2 + $0x69] sm:$0xff] %vm246_vm0, %v296_v18  ;;  %v297_v21 = vld [vmem:[%s4908_s25 + $0x40] sm:$0xff]  ;;  %v298_v22 = vld [vmem:[%s4908_s25 + $0x48] sm:$0xff]  ;;  %p7115_p0 = scmp.ne.s32.totalorder %s7048_s13, 0 }
  0x76   : > { %v416_v19 = vld [vmem:[#allocation2 + $0x9] sm:$0xff]  ;;  %329 = vst.msk [vmem:[#allocation2 + $0x79] sm:$0xff] %vm246_vm0, %v297_v21  ;;  %330 = vst.msk [vmem:[#allocation2 + $0x81] sm:$0xff] %vm246_vm0, %v298_v22  ;;  %v299_v23 = vld [vmem:[%s4908_s25 + $0x50] sm:$0xff] }
  0x77   : > { %577 = vmatpush1.bf16.msra.mxu0 %v4459_v7  ;;  %v300_v24 = vld [vmem:[%s4908_s25 + $0x58] sm:$0xff]  ;;  %v301_v25 = vld [vmem:[%s4908_s25 + $0x60] sm:$0xff]  ;;  %331 = vst.msk [vmem:[#allocation2 + $0x91] sm:$0xff] %vm246_vm0, %v299_v23  ;;  %v302_v26 = vld [vmem:[%s4908_s25 + $0x68] sm:$0xff]  ;;  %v451_v29 = vpack.c.bf16 %v416_v19, %v415_v15 }
  0x78   : > { %578 = vmatprep.subr.bf16.mxu0 %v4460_v8  ;;  %332 = vst.msk [vmem:[#allocation2 + $0x99] sm:$0xff] %vm246_vm0, %v300_v24  ;;  %333 = vst.msk [vmem:[#allocation2 + $0xa9] sm:$0xff] %vm246_vm0, %v301_v25  ;;  %v303_v27 = vld [vmem:[%s4908_s25 + $0x70] sm:$0xff]  ;;  %v304_v28 = vld [vmem:[%s4908_s25 + $0x78] sm:$0xff] }
  0x79   : > { %334 = vst.msk [vmem:[#allocation2 + $0xb1] sm:$0xff] %vm246_vm0, %v302_v26  ;;  %335 = vst.msk [vmem:[#allocation2 + $0xc1] sm:$0xff] %vm246_vm0, %v303_v27  ;;  %v305_v30 = vld [vmem:[%s4908_s25 + $0x80] sm:$0xff]  ;;  %v306_v31 = vld [vmem:[%s4908_s25 + $0x88] sm:$0xff] }
  0x7a   : > { %336 = vst.msk [vmem:[#allocation2 + $0xc9] sm:$0xff] %vm246_vm0, %v304_v28  ;;  %v4463_v32 = vld [vmem:[#allocation6] ss:$8 sps:$4 sm:$0xff]   ;;  %337 = vst.msk [vmem:[#allocation2 + $0xd9] sm:$0xff] %vm246_vm0, %v305_v30  ;;  %v4468_v33 = vld [vmem:[#allocation6 + $0x14] ss:$8 sps:$4 sm:$0xff]  }
  0x7b   : > { %579 = vmatpush1.bf16.msra.mxu0 %v4462_v14  ;;  %338 = vst.msk [vmem:[#allocation2 + $0xe1] sm:$0xff] %vm246_vm0, %v306_v31  ;;  %v4466_v34 = vld [vmem:[#allocation6 + $0x10] ss:$8 sps:$4 sm:$0xff]   ;;  %v4471_v39 = vld [vmem:[#allocation6 + $0x24] ss:$8 sps:$4 sm:$0xff]  }
  0x7c   : > { %873 = vmatprep.subr.bf16.mxu0 %v4465_v20  ;;  %v307_v35 = vld [vmem:[%s4908_s25 + $0x90] sm:$0xff]  ;;  %v308_v38 = vld [vmem:[%s4908_s25 + $0x98] sm:$0xff]  ;;  %v4469_v41 = vld [vmem:[#allocation6 + $0x20] ss:$8 sps:$4 sm:$0xff]   ;;  %257 = vst.msk [vmem:[#allocation2 + $0x18] sm:$0x1] %vm256_vm2, %v4691_v1 }
  0x7d   : > { %v417_v36 = vld [vmem:[#allocation2 + $0x19] sm:$0xff]  ;;  %v418_v37 = vld [vmem:[#allocation2 + $0x21] sm:$0xff]  ;;  %339 = vst.msk [vmem:[#allocation2 + $0xf1] sm:$0xff] %vm246_vm0, %v307_v35  ;;  %340 = vst.msk [vmem:[#allocation2 + $0xf9] sm:$0xff] %vm246_vm0, %v308_v38 }
  0x7e   : > { %3964 = vmatmul.mubr.msk.bf16.vlgmr.msra.gmra.mrb[0].mxu0 %vm246_vm0, %v451_v29  ;;  %v452_v40 = vpack.c.bf16 %v418_v37, %v417_v36  ;;  %v309_v42 = vld [vmem:[%s4908_s25 + $0xa0] sm:$0xff]  ;;  %v310_v43 = vld [vmem:[%s4908_s25 + $0xa8] sm:$0xff]  ;;  %v311_v44 = vld [vmem:[%s4908_s25 + $0xb0] sm:$0xff]  ;;  %258 = vst.msk [vmem:[#allocation2 + $0x30] sm:$0x1] %vm256_vm2, %v4691_v1 }
  0x7f   : > { %874 = vmatpush1.bf16.msra.mxu0 %v4463_v32  ;;  %612 = vmatprep.mubr.bf16.mxu0 %v7027_v0  ;;  %341 = vst.msk [vmem:[#allocation2 + $0x109] sm:$0xff] %vm246_vm0, %v309_v42  ;;  %v312_v45 = vld [vmem:[%s4908_s25 + $0xb8] sm:$0xff]  ;;  %342 = vst.msk [vmem:[#allocation2 + $0x111] sm:$0xff] %vm246_vm0, %v310_v43  ;;  %v313_v46 = vld [vmem:[%s4908_s25 + $0xc0] sm:$0xff] }
  0x80   : > { %875 = vmatprep.subr.bf16.mxu0 %v4468_v33  ;;  %343 = vst.msk [vmem:[#allocation2 + $0x121] sm:$0xff] %vm246_vm0, %v311_v44  ;;  %344 = vst.msk [vmem:[#allocation2 + $0x129] sm:$0xff] %vm246_vm0, %v312_v45  ;;  %v314_v47 = vld [vmem:[%s4908_s25 + $0xc8] sm:$0xff]  ;;  %v4474_v49 = vld [vmem:[#allocation6 + $0x34] ss:$8 sps:$4 sm:$0xff]  }
  0x81   : > { %v419_v48 = vld [vmem:[#allocation2 + $0x31] sm:$0xff]  ;;  %345 = vst.msk [vmem:[#allocation2 + $0x139] sm:$0xff] %vm246_vm0, %v313_v46  ;;  %346 = vst.msk [vmem:[#allocation2 + $0x141] sm:$0xff] %vm246_vm0, %v314_v47  ;;  %v420_v50 = vld [vmem:[#allocation2 + $0x39] sm:$0xff] }
  0x82   : > { %v315_v51 = vld [vmem:[%s4908_s25 + $0xd0] sm:$0xff]  ;;  %v316_v52 = vld [vmem:[%s4908_s25 + $0xd8] sm:$0xff]  ;;  %v317_v54 = vld [vmem:[%s4908_s25 + $0xe0] sm:$0xff]  ;;  %v453_v58 = vpack.c.bf16 %v420_v50, %v419_v48  ;;  %259 = vst.msk [vmem:[#allocation2 + $0x48] sm:$0x1] %vm256_vm2, %v4691_v1 }
  0x83   : > { %876 = vmatpush1.bf16.msra.mxu0 %v4466_v34  ;;  %v4472_v53 = vld [vmem:[#allocation6 + $0x30] ss:$8 sps:$4 sm:$0xff]   ;;  %347 = vst.msk [vmem:[#allocation2 + $0x151] sm:$0xff] %vm246_vm0, %v315_v51  ;;  %348 = vst.msk [vmem:[#allocation2 + $0x159] sm:$0xff] %vm246_vm0, %v316_v52  ;;  %v318_v55 = vld [vmem:[%s4908_s25 + $0xe8] sm:$0xff] }
  0x84   : > { %877 = vmatprep.subr.bf16.mxu0 %v4471_v39  ;;  %349 = vst.msk [vmem:[#allocation2 + $0x169] sm:$0xff] %vm246_vm0, %v317_v54  ;;  %350 = vst.msk [vmem:[#allocation2 + $0x171] sm:$0xff] %vm246_vm0, %v318_v55  ;;  %v319_v56 = vld [vmem:[%s4908_s25 + $0xf0] sm:$0xff]  ;;  %v320_v57 = vld [vmem:[%s4908_s25 + $0xf8] sm:$0xff] }
  0x85   : > { %351 = vst.msk [vmem:[#allocation2 + $0x181] sm:$0xff] %vm246_vm0, %v319_v56  ;;  %352 = vst.msk [vmem:[#allocation2 + $0x189] sm:$0xff] %vm246_vm0, %v320_v57  ;;  %v421_v59 = vld [vmem:[#allocation2 + $0x49] sm:$0xff]  ;;  %v422_v60 = vld [vmem:[#allocation2 + $0x51] sm:$0xff] }
  0x86   : > { %3965 = vmatmul.mubr.msk.bf16.gmra.mrb[4].mxu0 %vm246_vm0, %v452_v40  ;;  %260 = vst.msk [vmem:[#allocation2 + $0x60] sm:$0x1] %vm256_vm2, %v4691_v1  ;;  %261 = vst.msk [vmem:[#allocation2 + $0x78] sm:$0x1] %vm256_vm2, %v4691_v1  ;;  %v4477_v61 = vld [vmem:[#allocation6 + $0x84] ss:$8 sps:$4 sm:$0xff]   ;;  %v454_v62 = vpack.c.bf16 %v422_v60, %v421_v59 }
  0x87   : > { %620 = vmatprep.mubr.bf16.mxu0 %v7027_v0  ;;  %878 = vmatpush1.bf16.msra.mxu0 %v4469_v41  ;;  %262 = vst.msk [vmem:[#allocation2 + $0x90] sm:$0x1] %vm256_vm2, %v4691_v1  ;;  %263 = vst.msk [vmem:[#allocation2 + $0xa8] sm:$0x1] %vm256_vm2, %v4691_v1  ;;  %v423_v63 = vld [vmem:[#allocation2 + $0x61] sm:$0xff]  ;;  %v424_v2 = vld [vmem:[#allocation2 + $0x69] sm:$0xff] }
  0x88   : > { %879 = vmatprep.subr.bf16.mxu0 %v4474_v49  ;;  %264 = vst.msk [vmem:[#allocation2 + $0xc0] sm:$0x1] %vm256_vm2, %v4691_v1  ;;  %265 = vst.msk [vmem:[#allocation2 + $0xd8] sm:$0x1] %vm256_vm2, %v4691_v1  ;;  %v455_v3 = vpack.c.bf16 %v424_v2, %v423_v63  ;;  %v426_v4 = vld [vmem:[#allocation2 + $0x81] sm:$0xff]  ;;  %v427_v6 = vld [vmem:[#allocation2 + $0x91] sm:$0xff] }
  0x89   : > { %266 = vst.msk [vmem:[#allocation2 + $0xf0] sm:$0x1] %vm256_vm2, %v4691_v1  ;;  %267 = vst.msk [vmem:[#allocation2 + $0x108] sm:$0x1] %vm256_vm2, %v4691_v1  ;;  %v428_v7 = vld [vmem:[#allocation2 + $0x99] sm:$0xff]  ;;  %v429_v9 = vld [vmem:[#allocation2 + $0xa9] sm:$0xff] }
  0x8a   : > { %268 = vst.msk [vmem:[#allocation2 + $0x120] sm:$0x1] %vm256_vm2, %v4691_v1  ;;  %269 = vst.msk [vmem:[#allocation2 + $0x138] sm:$0x1] %vm256_vm2, %v4691_v1  ;;  %v457_v8 = vpack.c.bf16 %v428_v7, %v427_v6  ;;  %v430_v10 = vld [vmem:[#allocation2 + $0xb1] sm:$0xff]  ;;  %v431_v12 = vld [vmem:[#allocation2 + $0xc1] sm:$0xff] }
  0x8b   : > { %880 = vmatpush1.bf16.msra.mxu0 %v4472_v53  ;;  %270 = vst.msk [vmem:[#allocation2 + $0x150] sm:$0x1] %vm256_vm2, %v4691_v1  ;;  %271 = vst.msk [vmem:[#allocation2 + $0x168] sm:$0x1] %vm256_vm2, %v4691_v1  ;;  %v458_v11 = vpack.c.bf16 %v430_v10, %v429_v9  ;;  %v432_v13 = vld [vmem:[#allocation2 + $0xc9] sm:$0xff]  ;;  %v433_v15 = vld [vmem:[#allocation2 + $0xd9] sm:$0xff] }
  0x8c   : > { %272 = vst.msk [vmem:[#allocation2 + $0x180] sm:$0x1] %vm256_vm2, %v4691_v1  ;;  %273 = vst.msk [vmem:[#allocation2 + $0x29] sm:$0x1] %vm256_vm2, %v4691_v1  ;;  %1237 = vmatprep.subr.bf16.mxu0 %v4477_v61  ;;  %v459_v14 = vpack.c.bf16 %v432_v13, %v431_v12  ;;  %v434_v16 = vld [vmem:[#allocation2 + $0xe1] sm:$0xff]  ;;  %v435_v18 = vld [vmem:[#allocation2 + $0xf1] sm:$0xff] }
  0x8d   : > { %274 = vst.msk [vmem:[#allocation2 + $0x41] sm:$0x1] %vm256_vm2, %v4691_v1  ;;  %275 = vst.msk [vmem:[#allocation2 + $0x59] sm:$0x1] %vm256_vm2, %v4691_v1  ;;  %v460_v17 = vpack.c.bf16 %v434_v16, %v433_v15  ;;  %v436_v19 = vld [vmem:[#allocation2 + $0xf9] sm:$0xff]  ;;  %v437_v21 = vld [vmem:[#allocation2 + $0x109] sm:$0xff] }
  0x8e   : > { %276 = vst.msk [vmem:[#allocation2 + $0x71] sm:$0x1] %vm256_vm2, %v4691_v1  ;;  %277 = vst.msk [vmem:[#allocation2 + $0x89] sm:$0x1] %vm256_vm2, %v4691_v1  ;;  %3966 = vmatmul.mubr.msk.bf16.gmra.mrb[8].mxu0 %vm246_vm0, %v453_v58  ;;  %v461_v20 = vpack.c.bf16 %v436_v19, %v435_v18  ;;  %v438_v22 = vld [vmem:[#allocation2 + $0x111] sm:$0xff]  ;;  %v439_v24 = vld [vmem:[#allocation2 + $0x121] sm:$0xff] }
  0x8f   : > { %278 = vst.msk [vmem:[#allocation2 + $0xa1] sm:$0x1] %vm256_vm2, %v4691_v1  ;;  %279 = vst.msk [vmem:[#allocation2 + $0xb9] sm:$0x1] %vm256_vm2, %v4691_v1  ;;  %630 = vmatprep.mubr.bf16.mxu0 %v7027_v0  ;;  %v462_v23 = vpack.c.bf16 %v438_v22, %v437_v21  ;;  %v440_v25 = vld [vmem:[#allocation2 + $0x129] sm:$0xff]  ;;  %v441_v27 = vld [vmem:[#allocation2 + $0x139] sm:$0xff] }
  0x90   : > { %280 = vst.msk [vmem:[#allocation2 + $0xd1] sm:$0x1] %vm256_vm2, %v4691_v1  ;;  %281 = vst.msk [vmem:[#allocation2 + $0xe9] sm:$0x1] %vm256_vm2, %v4691_v1  ;;  %v463_v26 = vpack.c.bf16 %v440_v25, %v439_v24  ;;  %v442_v28 = vld [vmem:[#allocation2 + $0x141] sm:$0xff]  ;;  %v443_v30 = vld [vmem:[#allocation2 + $0x151] sm:$0xff] }
  0x91   : > { %282 = vst.msk [vmem:[#allocation2 + $0x101] sm:$0x1] %vm256_vm2, %v4691_v1  ;;  %283 = vst.msk [vmem:[#allocation2 + $0x119] sm:$0x1] %vm256_vm2, %v4691_v1  ;;  %v464_v29 = vpack.c.bf16 %v442_v28, %v441_v27  ;;  %v444_v31 = vld [vmem:[#allocation2 + $0x159] sm:$0xff]  ;;  %v445_v33 = vld [vmem:[#allocation2 + $0x169] sm:$0xff] }
  0x92   : > { %284 = vst.msk [vmem:[#allocation2 + $0x131] sm:$0x1] %vm256_vm2, %v4691_v1  ;;  %285 = vst.msk [vmem:[#allocation2 + $0x149] sm:$0x1] %vm256_vm2, %v4691_v1  ;;  %v465_v32 = vpack.c.bf16 %v444_v31, %v443_v30  ;;  %v446_v34 = vld [vmem:[#allocation2 + $0x171] sm:$0xff]  ;;  %v447_v36 = vld [vmem:[#allocation2 + $0x181] sm:$0xff] }
  0x93   : > { %286 = vst.msk [vmem:[#allocation2 + $0x161] sm:$0x1] %vm256_vm2, %v4691_v1  ;;  %287 = vst.msk [vmem:[#allocation2 + $0x179] sm:$0x1] %vm256_vm2, %v4691_v1  ;;  %v466_v35 = vpack.c.bf16 %v446_v34, %v445_v33  ;;  %v448_v37 = vld [vmem:[#allocation2 + $0x189] sm:$0xff]  ;;  %v449_v39 = vld [vmem:[#allocation2 + $0x199] sm:$0xff] }
  0x94   : > { %288 = vst.msk [vmem:[#allocation2 + $0x191] sm:$0x1] %vm256_vm2, %v4691_v1  ;;  %v425_v1 = vld [vmem:[#allocation2 + $0x79] sm:$0xff]  ;;  %v467_v38 = vpack.c.bf16 %v448_v37, %v447_v36  ;;  %v450_v40 = vld [vmem:[#allocation2 + $0x1a1] sm:$0xff]  ;;  %v357_v54 = vld [vmem:[#allocation2 + $0x30] sm:$0xff] }
  0x95   : > { %v456_v5 = vpack.c.bf16 %v426_v4, %v425_v1  ;;  %v468_v41 = vpack.c.bf16 %v450_v40, %v449_v39  ;;  %v353_v42 = vld [vmem:[#allocation2] sm:$0xff]  ;;  %v354_v43 = vld [vmem:[#allocation2 + $0x8] sm:$0xff]  ;;  %v4475_v45 = vld [vmem:[#allocation6 + $0x80] ss:$8 sps:$4 sm:$0xff]  }
  0x96   : > { %3967 = vmatmul.mubr.msk.bf16.gmra.mrb[12].mxu0 %vm246_vm0, %v454_v62  ;;  %v389_v44 = vpack.c.bf16 %v354_v43, %v353_v42  ;;  %v4480_v46 = vld [vmem:[#allocation6 + $0x94] ss:$8 sps:$4 sm:$0xff]   ;;  %v355_v47 = vld [vmem:[#allocation2 + $0x18] sm:$0xff]  ;;  %v4478_v49 = vld [vmem:[#allocation6 + $0x90] ss:$8 sps:$4 sm:$0xff]  }
  0x97   : > { %640 = vmatprep.mubr.bf16.mxu0 %v7027_v0  ;;  %v356_v48 = vld [vmem:[#allocation2 + $0x20] sm:$0xff]  ;;  %v4483_v50 = vld [vmem:[#allocation6 + $0xa4] ss:$8 sps:$4 sm:$0xff]   ;;  %v4481_v52 = vld [vmem:[#allocation6 + $0xa0] ss:$8 sps:$4 sm:$0xff]  }
  0x98   : > { %v390_v51 = vpack.c.bf16 %v356_v48, %v355_v47  ;;  %v4486_v53 = vld [vmem:[#allocation6 + $0xb4] ss:$8 sps:$4 sm:$0xff]   ;;  %v358_v55 = vld [vmem:[#allocation2 + $0x38] sm:$0xff]  ;;  %v4484_v56 = vld [vmem:[#allocation6 + $0xb0] ss:$8 sps:$4 sm:$0xff]  }
  0x99   : > { %v391_v57 = vpack.c.bf16 %v358_v55, %v357_v54  ;;  %v359_v58 = vld [vmem:[#allocation2 + $0x48] sm:$0xff]  ;;  %v360_v59 = vld [vmem:[#allocation2 + $0x50] sm:$0xff]  ;;  %v361_v61 = vld [vmem:[#allocation2 + $0x60] sm:$0xff] }
  0x9a   : > { %v392_v60 = vpack.c.bf16 %v360_v59, %v359_v58  ;;  %v362_v62 = vld [vmem:[#allocation2 + $0x68] sm:$0xff]  ;;  %v363_v2 = vld [vmem:[#allocation2 + $0x78] sm:$0xff]  ;;  %v365_v4 = vld [vmem:[#allocation2 + $0x90] sm:$0xff] }
  0x9b   : > { %v393_v63 = vpack.c.bf16 %v362_v62, %v361_v61  ;;  %v367_v7 = vld [vmem:[#allocation2 + $0xa8] sm:$0xff]  ;;  %v369_v10 = vld [vmem:[#allocation2 + $0xc0] sm:$0xff]  ;;  %v371_v13 = vld [vmem:[#allocation2 + $0xd8] sm:$0xff] }
  0x9c   : > { %v374_v21 = vld [vmem:[#allocation2 + $0xf8] sm:$0xff]  ;;  %v376_v24 = vld [vmem:[#allocation2 + $0x110] sm:$0xff]  ;;  %v378_v27 = vld [vmem:[#allocation2 + $0x128] sm:$0xff] }
  0x9d   : > { %v380_v30 = vld [vmem:[#allocation2 + $0x140] sm:$0xff]  ;;  %v382_v33 = vld [vmem:[#allocation2 + $0x158] sm:$0xff]  ;;  %v384_v36 = vld [vmem:[#allocation2 + $0x170] sm:$0xff] }
  0x9e   : > { %3968 = vmatmul.mubr.msk.bf16.gmra.mrb[16].mxu0 %vm246_vm0, %v455_v3  ;;  %v364_v3 = vld [vmem:[#allocation2 + $0x80] sm:$0xff]  ;;  %v386_v39 = vld [vmem:[#allocation2 + $0x188] sm:$0xff]  ;;  %v1087_v54 = vld [vmem:[#allocation2 + $0x52] sm:$0xff] }
  0x9f   : > { %650 = vmatprep.mubr.bf16.mxu0 %v7027_v0  ;;  %v394_v1 = vpack.c.bf16 %v364_v3, %v363_v2  ;;  %v388_v42 = vld [vmem:[#allocation2 + $0x1a0] sm:$0xff]  ;;  %v1092_v62 = vld [vmem:[#allocation2 + $0x92] sm:$0xff]  ;;  %v1094_v3 = vld [vmem:[#allocation2 + $0xaa] sm:$0xff] }
  0xa0   : > { %v1082_v47 = vld [vmem:[#allocation2 + $0x1a] sm:$0xff]  ;;  %v1083_v48 = vld [vmem:[#allocation2 + $0x22] sm:$0xff] }
  0xa1   : > { %v1090_v59 = vld [vmem:[#allocation2 + $0x7a] sm:$0xff] }
  0xa6   : > { %3969 = vmatmul.mubr.msk.bf16.gmra.mrb[20].mxu0 %vm246_vm0, %v456_v5  ;;  %v366_v5 = vld [vmem:[#allocation2 + $0x98] sm:$0xff] }
  0xa7   : > { %660 = vmatprep.mubr.bf16.mxu0 %v7027_v0  ;;  %v395_v6 = vpack.c.bf16 %v366_v5, %v365_v4  ;;  %v1096_v5 = vld [vmem:[#allocation2 + $0xc2] sm:$0xff] }
  0xae   : > { %3970 = vmatmul.mubr.msk.bf16.gmra.mrb[24].mxu0 %vm246_vm0, %v457_v8  ;;  %v368_v8 = vld [vmem:[#allocation2 + $0xb0] sm:$0xff] }
  0xaf   : > { %670 = vmatprep.mubr.bf16.mxu0 %v7027_v0  ;;  %v396_v9 = vpack.c.bf16 %v368_v8, %v367_v7 }
  0xb6   : > { %3971 = vmatmul.mubr.msk.bf16.gmra.mrb[28].mxu0 %vm246_vm0, %v458_v11  ;;  %v370_v11 = vld [vmem:[#allocation2 + $0xc8] sm:$0xff] }
  0xb7   : > { %680 = vmatprep.mubr.bf16.mxu0 %v7027_v0  ;;  %v397_v12 = vpack.c.bf16 %v370_v11, %v369_v10 }
  0xbe   : > { %3972 = vmatmul.mubr.msk.bf16.gmra.mrb[32].mxu0 %vm246_vm0, %v459_v14  ;;  %v372_v14 = vld [vmem:[#allocation2 + $0xe0] sm:$0xff] }
  0xbf   : > { %690 = vmatprep.mubr.bf16.mxu0 %v7027_v0 }
  0xc6   : > { %3973 = vmatmul.mubr.msk.bf16.gmra.mrb[36].mxu0 %vm246_vm0, %v460_v17  ;;  %v398_v17 = vpack.c.bf16 %v372_v14, %v371_v13  ;;  %v1099_v13 = vld [vmem:[#allocation2 + $0xe2] sm:$0xff] }
  0xc7   : > { %700 = vmatprep.mubr.bf16.mxu0 %v7027_v0 }
  0xce   : > { %3974 = vmatmul.mubr.msk.bf16.gmra.mrb[40].mxu0 %vm246_vm0, %v461_v20  ;;  %v373_v20 = vld [vmem:[#allocation2 + $0xf0] sm:$0xff] }
  0xcf   : > { %710 = vmatprep.mubr.bf16.mxu0 %v7027_v0  ;;  %v399_v22 = vpack.c.bf16 %v374_v21, %v373_v20 }
  0xd6   : > { %3975 = vmatmul.mubr.msk.bf16.gmra.mrb[44].mxu0 %vm246_vm0, %v462_v23  ;;  %v375_v23 = vld [vmem:[#allocation2 + $0x108] sm:$0xff] }
  0xd7   : > { %720 = vmatprep.mubr.bf16.mxu0 %v7027_v0  ;;  %v400_v25 = vpack.c.bf16 %v376_v24, %v375_v23  ;;  %v1100_v23 = vld [vmem:[#allocation2 + $0xf2] sm:$0xff]  ;;  %v1101_v24 = vld [vmem:[#allocation2 + $0xfa] sm:$0xff] }
  0xde   : > { %3976 = vmatmul.mubr.msk.bf16.gmra.mrb[48].mxu0 %vm246_vm0, %v463_v26  ;;  %v377_v26 = vld [vmem:[#allocation2 + $0x120] sm:$0xff] }
  0xdf   : > { %730 = vmatprep.mubr.bf16.mxu0 %v7027_v0  ;;  %v401_v28 = vpack.c.bf16 %v378_v27, %v377_v26  ;;  %v1102_v26 = vld [vmem:[#allocation2 + $0x10a] sm:$0xff]  ;;  %v1103_v27 = vld [vmem:[#allocation2 + $0x112] sm:$0xff] }
  0xe6   : > { %3977 = vmatmul.mubr.msk.bf16.gmra.mrb[52].mxu0 %vm246_vm0, %v464_v29  ;;  %v379_v29 = vld [vmem:[#allocation2 + $0x138] sm:$0xff] }
  0xe7   : > { %740 = vmatprep.mubr.bf16.mxu0 %v7027_v0  ;;  %v402_v31 = vpack.c.bf16 %v380_v30, %v379_v29  ;;  %v1106_v30 = vld [vmem:[#allocation2 + $0x13a] sm:$0xff] }
  0xee   : > { %3978 = vmatmul.mubr.msk.bf16.gmra.mrb[56].mxu0 %vm246_vm0, %v465_v32  ;;  %v381_v32 = vld [vmem:[#allocation2 + $0x150] sm:$0xff] }
  0xef   : > { %750 = vmatprep.mubr.bf16.mxu0 %v7027_v0  ;;  %v403_v34 = vpack.c.bf16 %v382_v33, %v381_v32  ;;  %v1108_v33 = vld [vmem:[#allocation2 + $0x152] sm:$0xff] }
  0xf6   : > { %3979 = vmatmul.mubr.msk.bf16.gmra.mrb[60].mxu0 %vm246_vm0, %v466_v35  ;;  %v383_v35 = vld [vmem:[#allocation2 + $0x168] sm:$0xff] }
  0xf7   : > { %760 = vmatprep.mubr.bf16.mxu0 %v7027_v0  ;;  %v404_v37 = vpack.c.bf16 %v384_v36, %v383_v35  ;;  %v1110_v36 = vld [vmem:[#allocation2 + $0x16a] sm:$0xff] }
  0xfe   : > { %3980 = vmatmul.mubr.msk.bf16.gmra.mrb[64].mxu0 %vm246_vm0, %v467_v38  ;;  %v385_v38 = vld [vmem:[#allocation2 + $0x180] sm:$0xff] }
  0xff   : > { %770 = vmatprep.mubr.bf16.mxu0 %v7027_v0  ;;  %v405_v40 = vpack.c.bf16 %v386_v39, %v385_v38  ;;  %v1112_v39 = vld [vmem:[#allocation2 + $0x182] sm:$0xff] }
 0x106   : > { %3981 = vmatmul.mubr.msk.bf16.gmra.mrb[68].mxu0 %vm246_vm0, %v468_v41  ;;  %v387_v41 = vld [vmem:[#allocation2 + $0x198] sm:$0xff] }
 0x107   : > { %905 = vmatprep.mubr.bf16.mxu0 %v7027_v0  ;;  %v406_v43 = vpack.c.bf16 %v388_v42, %v387_v41  ;;  %v1114_v42 = vld [vmem:[#allocation2 + $0x19a] sm:$0xff] }
 0x10e   : > { %3990 = vmatmul.mubr.msk.bf16.vlgmr.msra.gmra.mrb[72].mxu0 %vm246_vm0, %v389_v44  ;;  %v1080_v44 = vld [vmem:[#allocation2 + $0x2] sm:$0xff] }
 0x10f   : > { %1238 = vmatpush1.bf16.msra.mxu0 %v4475_v45  ;;  %913 = vmatprep.mubr.bf16.mxu0 %v7027_v0  ;;  %v1081_v45 = vld [vmem:[#allocation2 + $0xa] sm:$0xff] }
 0x110   : > { %1239 = vmatprep.subr.bf16.mxu0 %v4480_v46  ;;  %v1116_v46 = vpack.c.bf16 %v1081_v45, %v1080_v44 }
 0x113   : > { %1240 = vmatpush1.bf16.msra.mxu0 %v4478_v49  ;;  %v1117_v49 = vpack.c.bf16 %v1083_v48, %v1082_v47 }
 0x114   : > { %1241 = vmatprep.subr.bf16.mxu0 %v4483_v50  ;;  %v1084_v50 = vld [vmem:[#allocation2 + $0x32] sm:$0xff] }
 0x116   : > { %3991 = vmatmul.mubr.msk.bf16.gmra.mrb[4].mxu0 %vm246_vm0, %v390_v51  ;;  %v1085_v51 = vld [vmem:[#allocation2 + $0x3a] sm:$0xff] }
 0x117   : > { %921 = vmatprep.mubr.bf16.mxu0 %v7027_v0  ;;  %1242 = vmatpush1.bf16.msra.mxu0 %v4481_v52  ;;  %v1118_v52 = vpack.c.bf16 %v1085_v51, %v1084_v50 }
 0x118   : > { %1243 = vmatprep.subr.bf16.mxu0 %v4486_v53  ;;  %v1086_v53 = vld [vmem:[#allocation2 + $0x4a] sm:$0xff] }
 0x119   : > { %v1119_v55 = vpack.c.bf16 %v1087_v54, %v1086_v53 }
 0x11b   : > { %1244 = vmatpush1.bf16.msra.mxu0 %v4484_v56  ;;  %v1088_v56 = vld [vmem:[#allocation2 + $0x62] sm:$0xff] }
 0x11e   : > { %3992 = vmatmul.mubr.msk.bf16.gmra.mrb[8].mxu0 %vm246_vm0, %v391_v57  ;;  %v1089_v57 = vld [vmem:[#allocation2 + $0x6a] sm:$0xff] }
 0x11f   : > { %931 = vmatprep.mubr.bf16.mxu0 %v7027_v0  ;;  %v1120_v58 = vpack.c.bf16 %v1089_v57, %v1088_v56 }
 0x126   : > { %3993 = vmatmul.mubr.msk.bf16.gmra.mrb[12].mxu0 %vm246_vm0, %v392_v60  ;;  %v1091_v60 = vld [vmem:[#allocation2 + $0x82] sm:$0xff] }
 0x127   : > { %941 = vmatprep.mubr.bf16.mxu0 %v7027_v0  ;;  %v1121_v61 = vpack.c.bf16 %v1091_v60, %v1090_v59 }
 0x12e   : > { %3994 = vmatmul.mubr.msk.bf16.gmra.mrb[16].mxu0 %vm246_vm0, %v393_v63  ;;  %v1093_v63 = vld [vmem:[#allocation2 + $0x9a] sm:$0xff] }
 0x12f   : > { %951 = vmatprep.mubr.bf16.mxu0 %v7027_v0  ;;  %v1122_v2 = vpack.c.bf16 %v1093_v63, %v1092_v62 }
 0x136   : > { %3995 = vmatmul.mubr.msk.bf16.gmra.mrb[20].mxu0 %vm246_vm0, %v394_v1  ;;  %v1095_v1 = vld [vmem:[#allocation2 + $0xb2] sm:$0xff] }
 0x137   : > { %961 = vmatprep.mubr.bf16.mxu0 %v7027_v0  ;;  %v1123_v4 = vpack.c.bf16 %v1095_v1, %v1094_v3 }
 0x13e   : > { %3996 = vmatmul.mubr.msk.bf16.gmra.mrb[24].mxu0 %vm246_vm0, %v395_v6  ;;  %v1097_v6 = vld [vmem:[#allocation2 + $0xca] sm:$0xff] }
 0x13f   : > { %971 = vmatprep.mubr.bf16.mxu0 %v7027_v0 }
 0x146   : > { %3997 = vmatmul.mubr.msk.bf16.gmra.mrb[28].mxu0 %vm246_vm0, %v396_v9  ;;  %v1124_v9 = vpack.c.bf16 %v1097_v6, %v1096_v5 }
 0x147   : > { %981 = vmatprep.mubr.bf16.mxu0 %v7027_v0 }
 0x14e   : > { %3998 = vmatmul.mubr.msk.bf16.gmra.mrb[32].mxu0 %vm246_vm0, %v397_v12  ;;  %v1098_v12 = vld [vmem:[#allocation2 + $0xda] sm:$0xff] }
 0x14f   : > { %991 = vmatprep.mubr.bf16.mxu0 %v7027_v0 }
 0x151   : > { %v5112_v15 = vpop.f32.mrb[0].mxu0 }
 0x152   : > { %v608_v16 = vpop.f32.mrb[1].mxu0 }
 0x153   : > { %v5114_v18 = vpop.f32.mrb[2].mxu0 }
 0x154   : > { %v611_v19 = vpop.f32.mrb[3].mxu0 }
 0x155   : > { %v1125_v19 = vpack.c.bf16 %v1099_v13, %v1098_v12 }
 0x156   : > { %3999 = vmatmul.mubr.msk.bf16.gmra.mrb[36].mxu0 %vm246_vm0, %v398_v17 }
 0x157   : > { %1001 = vmatprep.mubr.bf16.mxu0 %v7027_v0 }
 0x15e   : > { %4000 = vmatmul.mubr.msk.bf16.gmra.mrb[40].mxu0 %vm246_vm0, %v399_v22 }
 0x15f   : > { %1011 = vmatprep.mubr.bf16.mxu0 %v7027_v0 }
 0x166   : > { %4001 = vmatmul.mubr.msk.bf16.gmra.mrb[44].mxu0 %vm246_vm0, %v400_v25  ;;  %v1126_v25 = vpack.c.bf16 %v1101_v24, %v1100_v23 }
 0x167   : > { %1021 = vmatprep.mubr.bf16.mxu0 %v7027_v0 }
 0x16e   : > { %4002 = vmatmul.mubr.msk.bf16.gmra.mrb[48].mxu0 %vm246_vm0, %v401_v28  ;;  %v1105_v28 = vld [vmem:[#allocation2 + $0x12a] sm:$0xff] }
 0x16f   : > { %1031 = vmatprep.mubr.bf16.mxu0 %v7027_v0 }
 0x176   : > { %4003 = vmatmul.mubr.msk.bf16.gmra.mrb[52].mxu0 %vm246_vm0, %v402_v31  ;;  %v1107_v31 = vld [vmem:[#allocation2 + $0x142] sm:$0xff] }
 0x177   : > { %1041 = vmatprep.mubr.bf16.mxu0 %v7027_v0  ;;  %v1129_v32 = vpack.c.bf16 %v1107_v31, %v1106_v30 }
 0x17e   : > { %4004 = vmatmul.mubr.msk.bf16.gmra.mrb[56].mxu0 %vm246_vm0, %v403_v34  ;;  %v1109_v34 = vld [vmem:[#allocation2 + $0x15a] sm:$0xff] }
 0x17f   : > { %1051 = vmatprep.mubr.bf16.mxu0 %v7027_v0  ;;  %v1130_v35 = vpack.c.bf16 %v1109_v34, %v1108_v33 }
 0x186   : > { %4005 = vmatmul.mubr.msk.bf16.gmra.mrb[60].mxu0 %vm246_vm0, %v404_v37  ;;  %v1111_v37 = vld [vmem:[#allocation2 + $0x172] sm:$0xff] }
 0x187   : > { %1061 = vmatprep.mubr.bf16.mxu0 %v7027_v0  ;;  %v1131_v38 = vpack.c.bf16 %v1111_v37, %v1110_v36 }
 0x18e   : > { %4006 = vmatmul.mubr.msk.bf16.gmra.mrb[64].mxu0 %vm246_vm0, %v405_v40  ;;  %v1113_v40 = vld [vmem:[#allocation2 + $0x18a] sm:$0xff] }
 0x18f   : > { %1071 = vmatprep.mubr.bf16.mxu0 %v7027_v0  ;;  %v1132_v41 = vpack.c.bf16 %v1113_v40, %v1112_v39 }
 0x196   : > { %4007 = vmatmul.mubr.msk.bf16.gmra.mrb[76].mxu0 %vm246_vm0, %v406_v43  ;;  %v1115_v43 = vld [vmem:[#allocation2 + $0x1a2] sm:$0xff] }
 0x197   : > { %1269 = vmatprep.mubr.bf16.mxu0 %v7027_v0  ;;  %v1133_v44 = vpack.c.bf16 %v1115_v43, %v1114_v42 }
 0x19e   : > { %4016 = vmatmul.mubr.msk.bf16.vlgmr.msra.gmra.mrb[80].mxu0 %vm246_vm0, %v1116_v46 }
 0x19f   : > { %1277 = vmatprep.mubr.bf16.mxu0 %v7027_v0 }
 0x1a6   : > { %4017 = vmatmul.mubr.msk.bf16.gmra.mrb[4].mxu0 %vm246_vm0, %v1117_v49 }
 0x1a7   : > { %1285 = vmatprep.mubr.bf16.mxu0 %v7027_v0 }
 0x1ae   : > { %4018 = vmatmul.mubr.msk.bf16.gmra.mrb[8].mxu0 %vm246_vm0, %v1118_v52 }
 0x1af   : > { %1295 = vmatprep.mubr.bf16.mxu0 %v7027_v0 }
 0x1b6   : > { %4019 = vmatmul.mubr.msk.bf16.gmra.mrb[12].mxu0 %vm246_vm0, %v1119_v55 }
 0x1b7   : > { %1305 = vmatprep.mubr.bf16.mxu0 %v7027_v0 }
 0x1be   : > { %4020 = vmatmul.mubr.msk.bf16.gmra.mrb[16].mxu0 %vm246_vm0, %v1120_v58 }
 0x1bf   : > { %1315 = vmatprep.mubr.bf16.mxu0 %v7027_v0 }
 0x1c6   : > { %4021 = vmatmul.mubr.msk.bf16.gmra.mrb[20].mxu0 %vm246_vm0, %v1121_v61 }
 0x1c7   : > { %1325 = vmatprep.mubr.bf16.mxu0 %v7027_v0 }
 0x1ce   : > { %4022 = vmatmul.mubr.msk.bf16.gmra.mrb[24].mxu0 %vm246_vm0, %v1122_v2 }
 0x1cf   : > { %1335 = vmatprep.mubr.bf16.mxu0 %v7027_v0 }
 0x1d6   : > { %4023 = vmatmul.mubr.msk.bf16.gmra.mrb[28].mxu0 %vm246_vm0, %v1123_v4 }
 0x1d7   : > { %1345 = vmatprep.mubr.bf16.mxu0 %v7027_v0 }
 0x1d9   : > { %v772_v7 = vpop.f32.mrb[68].mxu0 }
 0x1da   : > { %v773_v8 = vpop.f32.mrb[69].mxu0 }
 0x1db   : > { %v775_v10 = vpop.f32.mrb[70].mxu0 }
 0x1dc   : > { %v776_v11 = vpop.f32.mrb[71].mxu0 }
 0x1de   : > { %4024 = vmatmul.mubr.msk.bf16.gmra.mrb[32].mxu0 %vm246_vm0, %v1124_v9 }
 0x1df   : > { %1355 = vmatprep.mubr.bf16.mxu0 %v7027_v0 }
 0x1e1   : > { %v907_v14 = vpop.f32.mrb[72].mxu0 }
 0x1e2   : > { %v908_v16 = vadd.f32 %v907_v14, %v5112_v15  ;;  %v909_v17 = vpop.f32.mrb[73].mxu0  ;;  %v1127_v15 = vpack.c.bf16 %v1103_v27, %v1102_v26 }
 0x1e3   : > { %v910_v20 = vpop.f32.mrb[74].mxu0 }
 0x1e4   : > { %v911_v21 = vadd.f32 %v910_v20, %v5114_v18  ;;  %v912_v22 = vpop.f32.mrb[75].mxu0  ;;  %v1104_v18 = vld [vmem:[#allocation2 + $0x122] sm:$0xff] }
 0x1e5   : > { %v1128_v29 = vpack.c.bf16 %v1105_v28, %v1104_v18 }
 0x1e6   : > { %4025 = vmatmul.mubr.msk.bf16.gmra.mrb[36].mxu0 %vm246_vm0, %v1125_v19 }
 0x1e7   : > { %1365 = vmatprep.mubr.bf16.mxu0 %v7027_v0 }
 0x1ee   : > { %4026 = vmatmul.mubr.msk.bf16.gmra.mrb[40].mxu0 %vm246_vm0, %v1126_v25 }
 0x1ef   : > { %1375 = vmatprep.mubr.bf16.mxu0 %v7027_v0 }
 0x1f6   : > { %4027 = vmatmul.mubr.msk.bf16.gmra.mrb[44].mxu0 %vm246_vm0, %v1127_v15 }
 0x1f7   : > { %1385 = vmatprep.mubr.bf16.mxu0 %v7027_v0 }
 0x1fe   : > { %4028 = vmatmul.mubr.msk.bf16.gmra.mrb[48].mxu0 %vm246_vm0, %v1128_v29 }
 0x1ff   : > { %1395 = vmatprep.mubr.bf16.mxu0 %v7027_v0 }
 0x206   : > { %4029 = vmatmul.mubr.msk.bf16.gmra.mrb[52].mxu0 %vm246_vm0, %v1129_v32 }
 0x207   : > { %1405 = vmatprep.mubr.bf16.mxu0 %v7027_v0 }
 0x20e   : > { %4030 = vmatmul.mubr.msk.bf16.gmra.mrb[56].mxu0 %vm246_vm0, %v1130_v35 }
 0x20f   : > { %1415 = vmatprep.mubr.bf16.mxu0 %v7027_v0 }
 0x216   : > { %4031 = vmatmul.mubr.msk.bf16.gmra.mrb[60].mxu0 %vm246_vm0, %v1131_v38 }
 0x217   : > { %1425 = vmatprep.mubr.bf16.mxu0 %v7027_v0 }
 0x21e   : > { %4032 = vmatmul.mubr.msk.bf16.gmra.mrb[64].mxu0 %vm246_vm0, %v1132_v41 }
 0x21f   : > { %1435 = vmatprep.mubr.bf16.mxu0 %v7027_v0 }
 0x226   : > { %4033 = vmatmul.mubr.msk.bf16.gmra.mrb[84].mxu0 %vm246_vm0, %v1133_v44 }
 0x269   : > { %v1073_v45 = vpop.f32.mrb[76].mxu0 }
 0x26a   : > { %v1074_v46 = vpop.f32.mrb[77].mxu0 }
 0x26b   : > { %v5171_v47 = vadd.f32 %v1074_v46, %v773_v8  ;;  %v1076_v48 = vpop.f32.mrb[78].mxu0 }
 0x26c   : > { %v1077_v49 = vpop.f32.mrb[79].mxu0 }
 0x26d   : > { %v5173_v50 = vadd.f32 %v1077_v49, %v776_v11 }
 0x271   : > { %v1271_v51 = vpop.f32.mrb[80].mxu0 }
 0x272   : > { %v5175_v52 = vadd.f32 %v1271_v51, %v908_v16  ;;  %v1273_v53 = vpop.f32.mrb[81].mxu0 }
 0x273   : > { %v1274_v54 = vpop.f32.mrb[82].mxu0 }
 0x274   : > { %v5177_v55 = vadd.f32 %v1274_v54, %v911_v21  ;;  %v1276_v56 = vpop.f32.mrb[83].mxu0 }
 0x279   : > { %v5179_v57 = vpop.f32.mrb[4].mxu0 }
 0x27a   : > { %1542 = vrot.lane.b32.xlu0 %v5179_v57, %s4692_s21  ;;  %v1281_v58 = vpop.f32.mrb[5].mxu0 }
 0x27b   : > { %v5183_v59 = vpop.f32.mrb[6].mxu0 }
 0x27c   : > { %v1284_v60 = vpop.f32.mrb[7].mxu0 }
 0x27e   : > { %1544 = vrot.lane.b32.xlu0 %v5183_v59, %s4692_s21 }
 0x281   : > { %v5187_v61 = vpop.f32.mrb[8].mxu0 }
 0x282   : > { %1546 = vrot.lane.b32.xlu1 %v5187_v61, %s4692_s21  ;;  %v5191_v62 = vpop.f32.mrb[9].mxu0 }
 0x283   : > { %v5193_v63 = vpop.f32.mrb[10].mxu0 }
 0x284   : > { %v5195_v2 = vpop.f32.mrb[11].mxu0 }
 0x286   : > { %1548 = vrot.lane.b32.xlu1 %v5193_v63, %s4692_s21 }
 0x289   : > { %v5199_v3 = vpop.f32.mrb[12].mxu0 }
 0x28a   : > { %1550 = vrot.lane.b32.xlu0 %v5199_v3, %s4692_s21  ;;  %v5203_v1 = vpop.f32.mrb[13].mxu0 }
 0x28b   : > { %v5205_v4 = vpop.f32.mrb[14].mxu0 }
 0x28c   : > { %1552 = vrot.lane.b32.xlu1 %v5205_v4, %s4692_s21  ;;  %v5209_v5 = vpop.f32.mrb[15].mxu0 }
 0x291   : > { %v5211_v6 = vpop.f32.mrb[16].mxu0 }
 0x292   : > { %1554 = vrot.lane.b32.xlu0 %v5211_v6, %s4692_s21  ;;  %v5215_v7 = vpop.f32.mrb[17].mxu0 }
 0x293   : > { %v5217_v8 = vpop.f32.mrb[18].mxu0 }
 0x294   : > { %1556 = vrot.lane.b32.xlu1 %v5217_v8, %s4692_s21  ;;  %v5221_v9 = vpop.f32.mrb[19].mxu0 }
 0x299   : > { %v5223_v10 = vpop.f32.mrb[20].mxu0 }
 0x29a   : > { %1558 = vrot.lane.b32.xlu0 %v5223_v10, %s4692_s21  ;;  %v5227_v11 = vpop.f32.mrb[21].mxu0 }
 0x29b   : > { %v5229_v12 = vpop.f32.mrb[22].mxu0 }
 0x29c   : > { %1560 = vrot.lane.b32.xlu1 %v5229_v12, %s4692_s21  ;;  %v5233_v13 = vpop.f32.mrb[23].mxu0 }
 0x2a1   : > { %v5235_v14 = vpop.f32.mrb[24].mxu0 }
 0x2a2   : > { %1562 = vrot.lane.b32.xlu0 %v5235_v14, %s4692_s21  ;;  %v5239_v16 = vpop.f32.mrb[25].mxu0 }
 0x2a3   : > { %v5241_v17 = vpop.f32.mrb[26].mxu0 }
 0x2a4   : > { %1564 = vrot.lane.b32.xlu1 %v5241_v17, %s4692_s21  ;;  %v5245_v19 = vpop.f32.mrb[27].mxu0 }
 0x2a9   : > { %v5247_v20 = vpop.f32.mrb[28].mxu0 }
 0x2aa   : > { %1566 = vrot.lane.b32.xlu0 %v5247_v20, %s4692_s21  ;;  %v5251_v21 = vpop.f32.mrb[29].mxu0 }
 0x2ab   : > { %v5253_v22 = vpop.f32.mrb[30].mxu0 }
 0x2ac   : > { %1568 = vrot.lane.b32.xlu1 %v5253_v22, %s4692_s21  ;;  %v5257_v23 = vpop.f32.mrb[31].mxu0 }
 0x2b1   : > { %v5259_v24 = vpop.f32.mrb[32].mxu0 }
 0x2b2   : > { %1570 = vrot.lane.b32.xlu0 %v5259_v24, %s4692_s21  ;;  %v5263_v25 = vpop.f32.mrb[33].mxu0 }
 0x2b3   : > { %v5265_v26 = vpop.f32.mrb[34].mxu0 }
 0x2b4   : > { %1572 = vrot.lane.b32.xlu1 %v5265_v26, %s4692_s21  ;;  %v5269_v27 = vpop.f32.mrb[35].mxu0 }
 0x2b9   : > { %v5271_v15 = vpop.f32.mrb[36].mxu0 }
 0x2ba   : > { %1574 = vrot.lane.b32.xlu0 %v5271_v15, %s4692_s21  ;;  %v5275_v18 = vpop.f32.mrb[37].mxu0 }
 0x2bb   : > { %v5277_v28 = vpop.f32.mrb[38].mxu0 }
 0x2bc   : > { %1576 = vrot.lane.b32.xlu1 %v5277_v28, %s4692_s21  ;;  %v5281_v29 = vpop.f32.mrb[39].mxu0 }
 0x2c1   : > { %v5283_v30 = vpop.f32.mrb[40].mxu0 }
 0x2c2   : > { %1578 = vrot.lane.b32.xlu0 %v5283_v30, %s4692_s21  ;;  %v5287_v31 = vpop.f32.mrb[41].mxu0 }
 0x2c3   : > { %v5289_v32 = vpop.f32.mrb[42].mxu0 }
 0x2c4   : > { %1580 = vrot.lane.b32.xlu1 %v5289_v32, %s4692_s21  ;;  %v5293_v33 = vpop.f32.mrb[43].mxu0 }
 0x2c9   : > { %v5295_v34 = vpop.f32.mrb[44].mxu0 }
 0x2ca   : > { %1582 = vrot.lane.b32.xlu0 %v5295_v34, %s4692_s21  ;;  %v5299_v35 = vpop.f32.mrb[45].mxu0 }
 0x2cb   : > { %v5301_v36 = vpop.f32.mrb[46].mxu0 }
 0x2cc   : > { %1584 = vrot.lane.b32.xlu1 %v5301_v36, %s4692_s21  ;;  %v5305_v37 = vpop.f32.mrb[47].mxu0 }
 0x2d1   : > { %v5307_v38 = vpop.f32.mrb[48].mxu0 }
 0x2d2   : > { %1586 = vrot.lane.b32.xlu0 %v5307_v38, %s4692_s21  ;;  %v5311_v39 = vpop.f32.mrb[49].mxu0 }
 0x2d3   : > { %v5313_v40 = vpop.f32.mrb[50].mxu0 }
 0x2d4   : > { %1588 = vrot.lane.b32.xlu1 %v5313_v40, %s4692_s21  ;;  %v5317_v41 = vpop.f32.mrb[51].mxu0 }
 0x2d9   : > { %v5319_v42 = vpop.f32.mrb[52].mxu0 }
 0x2da   : > { %7053 = vst [vmem:[#allocation13_spill] sm:$0xff] %v5319_v42  ;;  %1590 = vrot.lane.b32.xlu0 %v5319_v42, %s4692_s21  ;;  %v5323_v43 = vpop.f32.mrb[53].mxu0 }
 0x2db   : > { %v5325_v44 = vpop.f32.mrb[54].mxu0 }
 0x2dc   : > { %7054 = vst [vmem:[#allocation14_spill] sm:$0xff] %v5325_v44  ;;  %1592 = vrot.lane.b32.xlu1 %v5325_v44, %s4692_s21  ;;  %v5329_v45 = vpop.f32.mrb[55].mxu0 }
 0x2e1   : > { %v5331_v46 = vpop.f32.mrb[56].mxu0 }
 0x2e2   : > { %7055 = vst [vmem:[#allocation15_spill] sm:$0xff] %v5331_v46  ;;  %1594 = vrot.lane.b32.xlu0 %v5331_v46, %s4692_s21  ;;  %v5335_v48 = vpop.f32.mrb[57].mxu0 }
 0x2e3   : > { %v5337_v49 = vpop.f32.mrb[58].mxu0 }
 0x2e4   : > { %7056 = vst [vmem:[#allocation16_spill] sm:$0xff] %v5337_v49  ;;  %1596 = vrot.lane.b32.xlu1 %v5337_v49, %s4692_s21  ;;  %v5341_v51 = vpop.f32.mrb[59].mxu0 }
 0x2e5   : > { %7057 = vst [vmem:[#allocation17_spill] sm:$0xff] %v5341_v51 }
 0x2e9   : > { %v5343_v53 = vpop.f32.mrb[60].mxu0 }
 0x2ea   : > { %7058 = vst [vmem:[#allocation18_spill] sm:$0xff] %v5343_v53  ;;  %1598 = vrot.lane.b32.xlu0 %v5343_v53, %s4692_s21  ;;  %v5347_v54 = vpop.f32.mrb[61].mxu0 }
 0x2eb   : > { %7059 = vst [vmem:[#allocation19_spill] sm:$0xff] %v5347_v54  ;;  %v5349_v56 = vpop.f32.mrb[62].mxu0 }
 0x2ec   : > { %7060 = vst [vmem:[#allocation20_spill] sm:$0xff] %v5349_v56  ;;  %v1543_v58 = vpop.permute.xlu0 %1542  ;;  %1600 = vrot.lane.b32.xlu1 %v5349_v56, %s4692_s21  ;;  %v5353_v60 = vpop.f32.mrb[63].mxu0 }
 0x2ed   : > { %7061 = vst [vmem:[#allocation21_spill] sm:$0xff] %v5353_v60  ;;  %v1638_v0 = vadd.f32 %v1543_v58, %v5175_v52 }
 0x2ef   : > { %v5357_v49 = vadd.f32 %v1638_v0, %v5191_v62 }
 0x2f0   : > { %v1545_v46 = vpop.permute.xlu0 %1544 }
 0x2f1   : > { %v1639_v44 = vadd.f32 %v1545_v46, %v5177_v55  ;;  %v1427_v42 = vpop.f32.mrb[64].mxu0 }
 0x2f2   : > { %1602 = vrot.lane.b32.xlu0 %v1427_v42, %s4692_s21  ;;  %v5361_v53 = vpop.f32.mrb[65].mxu0 }
 0x2f3   : > { %7062 = vst [vmem:[#allocation22_spill] sm:$0xff] %v5361_v53  ;;  %v5364_v54 = vadd.f32 %v1639_v44, %v5195_v2  ;;  %v1431_v51 = vpop.f32.mrb[66].mxu0 }
 0x2f4   : > { %v1547_v56 = vpop.permute.xlu1 %1546  ;;  %1604 = vrot.lane.b32.xlu1 %v1431_v51, %s4692_s21  ;;  %v5367_v60 = vpop.f32.mrb[67].mxu0 }
 0x2f5   : > { %7063 = vst [vmem:[#allocation23_spill] sm:$0xff] %v5367_v60  ;;  %v1640_v0 = vadd.f32 %v1547_v56, %v5179_v57 }
 0x2f7   : > { %v5371_v52 = vadd.f32 %v1640_v0, %v5203_v1 }
 0x2f8   : > { %v1549_v55 = vpop.permute.xlu1 %1548 }
 0x2f9   : > { %v1641_v62 = vadd.f32 %v1549_v55, %v5183_v59  ;;  %v1437_v42 = vpop.f32.mrb[84].mxu0 }
 0x2fa   : > { %v1438_v46 = vpop.f32.mrb[85].mxu0 }
 0x2fb   : > { %v5375_v58 = vadd.f32 %v1641_v62, %v5209_v5  ;;  %v5378_v2 = vadd.f32 %v1438_v46, %v5171_v47  ;;  %v1440_v44 = vpop.f32.mrb[86].mxu0 }
 0x2fc   : > { %v1551_v51 = vpop.permute.xlu0 %1550  ;;  %v1441_v53 = vpop.f32.mrb[87].mxu0 }
 0x2fd   : > { %v1642_v60 = vadd.f32 %v1551_v51, %v5187_v61  ;;  %v5382_v57 = vadd.f32 %v1441_v53, %v5173_v50  ;;  %v1705_v50 = vsel %vm246_vm0, %v5364_v54, 0.0 }
 0x2fe   : > { %v1553_v1 = vpop.permute.xlu1 %1552 }
 0x2ff   : > { %v5385_v56 = vadd.f32 %v1642_v60, %v5215_v7  ;;  %v1643_v59 = vadd.f32 %v1553_v1, %v5193_v63  ;;  %v1704_v63 = vsel %vm246_vm0, %v5357_v49, 0.0 }
 0x300   : > { %v1706_v53 = vadd.f32 %v1705_v50, %v1704_v63 }
 0x301   : > { %v5389_v5 = vadd.f32 %v1643_v59, %v5221_v9  ;;  %v1707_v9 = vsel %vm246_vm0, %v5371_v52, 0.0  ;;  %v1711_v46 = vsel %vm246_vm0, %v5385_v56, 0.0 }
 0x304   : > { %v1555_v0 = vpop.permute.xlu0 %1554 }
 0x305   : > { %v1644_v47 = vadd.f32 %v1555_v0, %v5199_v3  ;;  %v1713_v0 = vsel %vm246_vm0, %v5389_v5, 0.0 }
 0x306   : > { %v1557_v55 = vpop.permute.xlu1 %1556 }
 0x307   : > { %v5393_v62 = vadd.f32 %v1644_v47, %v5227_v11  ;;  %v1645_v61 = vadd.f32 %v1557_v55, %v5205_v4  ;;  %v1709_v11 = vsel %vm246_vm0, %v5375_v58, 0.0  ;;  %v1708_v4 = vadd.f32 %v1707_v9, %v1706_v53 }
 0x309   : > { %v5399_v7 = vadd.f32 %v1645_v61, %v5233_v13  ;;  %v1710_v51 = vadd.f32 %v1709_v11, %v1708_v4 }
 0x30b   : > { %v1712_v59 = vadd.f32 %v1711_v46, %v1710_v51 }
 0x30c   : > { %v1559_v3 = vpop.permute.xlu0 %1558 }
 0x30d   : > { %v1646_v60 = vadd.f32 %v1559_v3, %v5211_v6  ;;  %v1715_v6 = vsel %vm246_vm0, %v5393_v62, 0.0  ;;  %v1714_v61 = vadd.f32 %v1713_v0, %v1712_v59 }
 0x30e   : > { %v1561_v42 = vpop.permute.xlu1 %1560 }
 0x30f   : > { %v5411_v13 = vadd.f32 %v1646_v60, %v5239_v16  ;;  %v1647_v44 = vadd.f32 %v1561_v42, %v5217_v8  ;;  %v1716_v63 = vadd.f32 %v1715_v6, %v1714_v61 }
 0x311   : > { %v5415_v1 = vadd.f32 %v1647_v44, %v5245_v19  ;;  %v1717_v19 = vsel %vm246_vm0, %v5399_v7, 0.0  ;;  %v1719_v53 = vsel %vm246_vm0, %v5411_v13, 0.0 }
 0x312   : > { %v1718_v3 = vadd.f32 %v1717_v19, %v1716_v63 }
 0x314   : > { %v1563_v47 = vpop.permute.xlu0 %1562  ;;  %v1720_v60 = vadd.f32 %v1719_v53, %v1718_v3 }
 0x315   : > { %v1648_v55 = vadd.f32 %v1563_v47, %v5223_v10 }
 0x316   : > { %v1565_v50 = vpop.permute.xlu1 %1564 }
 0x317   : > { %v5423_v16 = vadd.f32 %v1648_v55, %v5251_v21  ;;  %v1649_v8 = vadd.f32 %v1565_v50, %v5229_v12  ;;  %v1721_v21 = vsel %vm246_vm0, %v5415_v1, 0.0 }
 0x318   : > { %v1722_v44 = vadd.f32 %v1721_v21, %v1720_v60 }
 0x319   : > { %v5429_v9 = vadd.f32 %v1649_v8, %v5257_v23  ;;  %v1723_v23 = vsel %vm246_vm0, %v5423_v16, 0.0 }
 0x31a   : > { %v1724_v51 = vadd.f32 %v1723_v23, %v1722_v44 }
 0x31c   : > { %v1567_v11 = vpop.permute.xlu0 %1566 }
 0x31d   : > { %v1650_v10 = vadd.f32 %v1567_v11, %v5235_v14  ;;  %v1725_v14 = vsel %vm246_vm0, %v5429_v9, 0.0 }
 0x31e   : > { %v1569_v4 = vpop.permute.xlu1 %1568  ;;  %v1726_v55 = vadd.f32 %v1725_v14, %v1724_v51 }
 0x31f   : > { %v5437_v12 = vadd.f32 %v1650_v10, %v5263_v25  ;;  %v1651_v42 = vadd.f32 %v1569_v4, %v5241_v17 }
 0x321   : > { %v5443_v46 = vadd.f32 %v1651_v42, %v5269_v27  ;;  %v1727_v25 = vsel %vm246_vm0, %v5437_v12, 0.0 }
 0x322   : > { %v1728_v61 = vadd.f32 %v1727_v25, %v1726_v55 }
 0x323   : > { %v1729_v50 = vsel %vm246_vm0, %v5443_v46, 0.0 }
 0x324   : > { %v1571_v59 = vpop.permute.xlu0 %1570  ;;  %v1730_v19 = vadd.f32 %v1729_v50, %v1728_v61 }
 0x325   : > { %v1652_v0 = vadd.f32 %v1571_v59, %v5247_v20 }
 0x326   : > { %v1573_v47 = vpop.permute.xlu1 %1572 }
 0x327   : > { %v5451_v17 = vadd.f32 %v1652_v0, %v5275_v18  ;;  %v1653_v6 = vadd.f32 %v1573_v47, %v5253_v22 }
 0x329   : > { %v5455_v27 = vadd.f32 %v1653_v6, %v5281_v29  ;;  %v1731_v20 = vsel %vm246_vm0, %v5451_v17, 0.0 }
 0x32a   : > { %v1732_v3 = vadd.f32 %v1731_v20, %v1730_v19 }
 0x32b   : > { %v1733_v29 = vsel %vm246_vm0, %v5455_v27, 0.0 }
 0x32c   : > { %v1575_v8 = vpop.permute.xlu0 %1574  ;;  %v1734_v60 = vadd.f32 %v1733_v29, %v1732_v3 }
 0x32d   : > { %v1654_v63 = vadd.f32 %v1575_v8, %v5259_v24 }
 0x32e   : > { %v1577_v53 = vpop.permute.xlu1 %1576 }
 0x32f   : > { %v5463_v18 = vadd.f32 %v1654_v63, %v5287_v31  ;;  %v1655_v22 = vadd.f32 %v1577_v53, %v5265_v26 }
 0x331   : > { %v5469_v11 = vadd.f32 %v1655_v22, %v5293_v33  ;;  %v1735_v10 = vsel %vm246_vm0, %v5463_v18, 0.0 }
 0x332   : > { %v1736_v21 = vadd.f32 %v1735_v10, %v1734_v60 }
 0x333   : > { %v1737_v31 = vsel %vm246_vm0, %v5469_v11, 0.0 }
 0x334   : > { %v1579_v4 = vpop.permute.xlu0 %1578  ;;  %v1738_v51 = vadd.f32 %v1737_v31, %v1736_v21  ;;  %v7065_v31 = vld [vmem:[#allocation13_spill] sm:$0xff] }
 0x335   : > { %v1656_v24 = vadd.f32 %v1579_v4, %v5271_v15  ;;  %v7064_v4 = vld [vmem:[#allocation17_spill] sm:$0xff] }
 0x336   : > { %v1581_v42 = vpop.permute.xlu1 %1580 }
 0x337   : > { %v5477_v26 = vadd.f32 %v1656_v24, %v5299_v35  ;;  %v1657_v23 = vadd.f32 %v1581_v42, %v5277_v28 }
 0x339   : > { %v1739_v33 = vsel %vm246_vm0, %v5477_v26, 0.0  ;;  %v5483_v44 = vadd.f32 %v1657_v23, %v5305_v37 }
 0x33a   : > { %v1740_v59 = vadd.f32 %v1739_v33, %v1738_v51  ;;  %v7066_v51 = vld [vmem:[#allocation19_spill] sm:$0xff] }
 0x33b   : > { %v1741_v15 = vsel %vm246_vm0, %v5483_v44, 0.0 }
 0x33c   : > { %v1583_v14 = vpop.permute.xlu0 %1582  ;;  %v1742_v25 = vadd.f32 %v1741_v15, %v1740_v59  ;;  %v7068_v15 = vld [vmem:[#allocation21_spill] sm:$0xff] }
 0x33d   : > { %v1658_v0 = vadd.f32 %v1583_v14, %v5283_v30 }
 0x33e   : > { %v1585_v47 = vpop.permute.xlu1 %1584 }
 0x33f   : > { %v5489_v35 = vadd.f32 %v1658_v0, %v5311_v39  ;;  %v1659_v28 = vadd.f32 %v1585_v47, %v5289_v32 }
 0x341   : > { %v1743_v6 = vsel %vm246_vm0, %v5489_v35, 0.0  ;;  %v5495_v37 = vadd.f32 %v1659_v28, %v5317_v41 }
 0x342   : > { %v1744_v55 = vadd.f32 %v1743_v6, %v1742_v25  ;;  %v7069_v6 = vld [vmem:[#allocation15_spill] sm:$0xff] }
 0x343   : > { %v1745_v61 = vsel %vm246_vm0, %v5495_v37, 0.0 }
 0x344   : > { %v1746_v50 = vadd.f32 %v1745_v61, %v1744_v55  ;;  %v1587_v8 = vpop.permute.xlu0 %1586 }
 0x345   : > { %v1660_v30 = vadd.f32 %v1587_v8, %v5295_v34 }
 0x346   : > { %v1589_v20 = vpop.permute.xlu1 %1588 }
 0x347   : > { %v1692_v39 = vadd.f32 %v1660_v30, %v5323_v43  ;;  %v1661_v32 = vadd.f32 %v1589_v20, %v5301_v36  ;;  %v7071_v30 = vld [vmem:[#allocation16_spill] sm:$0xff] }
 0x349   : > { %v1747_v63 = vsel %vm246_vm0, %v1692_v39, 0.0  ;;  %v1693_v19 = vadd.f32 %v1661_v32, %v5329_v45 }
 0x34a   : > { %v1748_v53 = vadd.f32 %v1747_v63, %v1746_v50  ;;  %v7070_v50 = vld [vmem:[#allocation22_spill] sm:$0xff]  ;;  %v7072_v63 = vld [vmem:[#allocation23_spill] sm:$0xff] }
 0x34b   : > { %v1749_v41 = vsel %vm246_vm0, %v1693_v19, 0.0 }
 0x34c   : > { %v1750_v22 = vadd.f32 %v1749_v41, %v1748_v53  ;;  %v1591_v3 = vpop.permute.xlu0 %1590 }
 0x34d   : > { %v1662_v29 = vadd.f32 %v1591_v3, %v5307_v38  ;;  %v7067_v38 = vld [vmem:[#allocation14_spill] sm:$0xff] }
 0x34e   : > { %v1593_v10 = vpop.permute.xlu1 %1592 }
 0x34f   : > { %v1694_v60 = vadd.f32 %v1662_v29, %v5335_v48  ;;  %v1663_v34 = vadd.f32 %v1593_v10, %v5313_v40  ;;  %v7073_v10 = vld [vmem:[#allocation18_spill] sm:$0xff] }
 0x351   : > { %v1751_v43 = vsel %vm246_vm0, %v1694_v60, 0.0  ;;  %v1695_v36 = vadd.f32 %v1663_v34, %v7064_v4 }
 0x352   : > { %v1752_v24 = vadd.f32 %v1751_v43, %v1750_v22 }
 0x353   : > { %v1753_v21 = vsel %vm246_vm0, %v1695_v36, 0.0 }
 0x354   : > { %v1754_v45 = vadd.f32 %v1753_v21, %v1752_v24  ;;  %v1595_v42 = vpop.permute.xlu0 %1594  ;;  %v7074_v24 = vld [vmem:[#allocation20_spill] sm:$0xff] }
 0x355   : > { %v1664_v23 = vadd.f32 %v1595_v42, %v7065_v31 }
 0x356   : > { %v1597_v33 = vpop.permute.xlu1 %1596 }
 0x357   : > { %v1696_v59 = vadd.f32 %v1664_v23, %v7066_v51  ;;  %v1665_v14 = vadd.f32 %v1597_v33, %v7067_v38 }
 0x359   : > { %v1755_v48 = vsel %vm246_vm0, %v1696_v59, 0.0  ;;  %v1697_v40 = vadd.f32 %v1665_v14, %v7068_v15 }
 0x35a   : > { %v1756_v0 = vadd.f32 %v1755_v48, %v1754_v45 }
 0x35b   : > { %v1757_v47 = vsel %vm246_vm0, %v1697_v40, 0.0 }
 0x35c   : > { %v1758_v28 = vadd.f32 %v1757_v47, %v1756_v0  ;;  %v1599_v25 = vpop.permute.xlu0 %1598 }
 0x35d   : > { %v1666_v55 = vadd.f32 %v1599_v25, %v7069_v6 }
 0x35e   : > { %v1601_v61 = vpop.permute.xlu1 %1600 }
 0x35f   : > { %v1698_v8 = vadd.f32 %v1666_v55, %v7070_v50  ;;  %v1667_v20 = vadd.f32 %v1601_v61, %v7071_v30  ;;  %v4489_v55 = vld [vmem:[#allocation8 + $0x40] ss:$8 sps:$4 sm:$0xff]  }
 0x361   : > { %v1759_v32 = vsel %vm246_vm0, %v1698_v8, 0.0  ;;  %v1699_v53 = vadd.f32 %v1667_v20, %v7072_v63 }
 0x362   : > { %v1760_v41 = vadd.f32 %v1759_v32, %v1758_v28  ;;  %v4487_v28 = vld [vmem:[#allocation8 + $0x44] ss:$8 sps:$4 sm:$0xff]  }
 0x363   : > { %v1761_v22 = vsel %vm246_vm0, %v1699_v53, 0.0  ;;  %2330 = vmatprep.subr.bf16.mxu1 %v4487_v28 }
 0x364   : > { %v1762_v3 = vadd.f32 %v1761_v22, %v1760_v41  ;;  %v1603_v29 = vpop.permute.xlu0 %1602  ;;  %2331 = vmatpush1.bf16.msra.mxu1 %v4489_v55 }
 0x365   : > { %v1668_v34 = vadd.f32 %v1603_v29, %v7073_v10  ;;  %v4496_v10 = vld [vmem:[#allocation8 + $0x74] ss:$8 sps:$4 sm:$0xff]  }
 0x366   : > { %v1605_v43 = vpop.permute.xlu1 %1604 }
 0x367   : > { %v1700_v4 = vadd.f32 %v1668_v34, %v5378_v2  ;;  %v1669_v21 = vadd.f32 %v1605_v43, %v7074_v24 }
 0x369   : > { %v1763_v45 = vsel %vm246_vm0, %v1700_v4, 0.0  ;;  %v1701_v42 = vadd.f32 %v1669_v21, %v5382_v57 }
 0x36a   : > { %v1764_v31 = vadd.f32 %v1763_v45, %v1762_v3 }
 0x36b   : > { %v1765_v23 = vsel %vm246_vm0, %v1701_v42, 0.0 }
 0x36c   : > { %v1766_v33 = vadd.f32 %v1765_v23, %v1764_v31 }
 0x36e   : > { %v1767_v51 = vrot.slane %v1766_v33, 4 }
 0x370   : > { %v1768_v38 = vadd.f32 %v1767_v51, %v1766_v33  ;;  %v2173_v51 = vld [vmem:[#allocation2 + $0x1] sm:$0xff] }
 0x372   : > { %v1769_v14 = vrot.slane %v1768_v38, 2 }
 0x374   : > { %v1770_v48 = vadd.f32 %v1769_v14, %v1768_v38  ;;  %v2174_v38 = vld [vmem:[#allocation2 + $0x9] sm:$0xff] }
 0x375   : > { %v2209_v55 = vpack.c.bf16 %v2174_v38, %v2173_v51 }
 0x376   : > { %v1771_v15 = vrot.slane %v1770_v48, 1 }
 0x378   : > { %v1772_v0 = vadd.f32 %v1771_v15, %v1770_v48 }
 0x37a   : > { %v5529_v47 = vmul.f32 0.00390625, %v1772_v0  ;;  %v4499_v0 = vld [vmem:[#allocation8] ss:$8 sps:$4 sm:$0xff]  }
 0x37c   : > { %v5533_v2 = vsub.f32 %v5489_v35, %v5529_v47  ;;  %v5537_v57 = vsub.f32 %v5495_v37, %v5529_v47  ;;  %v5540_v25 = vsub.f32 %v1692_v39, %v5529_v47  ;;  %v5543_v6 = vsub.f32 %v1693_v19, %v5529_v47 }
 0x37d   : > { %v5546_v61 = vsub.f32 %v1694_v60, %v5529_v47  ;;  %v5549_v50 = vsub.f32 %v1695_v36, %v5529_v47  ;;  %v5552_v35 = vsub.f32 %v1696_v59, %v5529_v47  ;;  %v5555_v30 = vsub.f32 %v1697_v40, %v5529_v47  ;;  %v4490_v40 = vld [vmem:[#allocation8 + $0x54] ss:$8 sps:$4 sm:$0xff]  }
 0x37e   : > { %v5558_v37 = vsub.f32 %v1698_v8, %v5529_v47  ;;  %v5561_v39 = vsub.f32 %v1699_v53, %v5529_v47  ;;  %v5564_v19 = vsub.f32 %v1700_v4, %v5529_v47  ;;  %v5567_v60 = vsub.f32 %v1701_v42, %v5529_v47  ;;  %v4492_v8 = vld [vmem:[#allocation8 + $0x50] ss:$8 sps:$4 sm:$0xff]   ;;  %2332 = vmatprep.subr.bf16.mxu1 %v4490_v40  ;;  %v4495_v53 = vld [vmem:[#allocation8 + $0x60] ss:$8 sps:$4 sm:$0xff]  }
 0x37f   : > { %v5571_v36 = vsub.f32 %v5357_v49, %v5529_v47  ;;  %v5575_v59 = vsub.f32 %v5364_v54, %v5529_v47  ;;  %v5579_v20 = vsub.f32 %v5371_v52, %v5529_v47  ;;  %2333 = vmatpush1.bf16.msra.mxu1 %v4492_v8  ;;  %v5583_v32 = vsub.f32 %v5375_v58, %v5529_v47  ;;  %v4493_v54 = vld [vmem:[#allocation8 + $0x64] ss:$8 sps:$4 sm:$0xff]  }
 0x380   : > { %v5591_v41 = vsub.f32 %v5385_v56, %v5529_v47  ;;  %2334 = vmatprep.subr.bf16.mxu1 %v4493_v54  ;;  %v5597_v58 = vsub.f32 %v5389_v5, %v5529_v47  ;;  %v4498_v56 = vld [vmem:[#allocation8 + $0x70] ss:$8 sps:$4 sm:$0xff]   ;;  %v5605_v43 = vsub.f32 %v5393_v62, %v5529_v47  ;;  %v5612_v21 = vsub.f32 %v5399_v7, %v5529_v47 }
 0x381   : > { %v1806_v49 = vmul.f32 %v5571_v36, %v5571_v36  ;;  %v1807_v63 = vmul.f32 %v5575_v59, %v5575_v59  ;;  %v1808_v52 = vmul.f32 %v5579_v20, %v5579_v20  ;;  %v1809_v22 = vmul.f32 %v5583_v32, %v5583_v32 }
 0x382   : > { %v1810_v4 = vmul.f32 %v5591_v41, %v5591_v41  ;;  %v1811_v45 = vmul.f32 %v5597_v58, %v5597_v58  ;;  %v5619_v62 = vsub.f32 %v5411_v13, %v5529_v47  ;;  %v1812_v23 = vmul.f32 %v5605_v43, %v5605_v43  ;;  %v4501_v13 = vld [vmem:[#allocation8 + $0x4] ss:$8 sps:$4 sm:$0xff]  }
 0x383   : > { %2335 = vmatpush1.bf16.msra.mxu1 %v4495_v53  ;;  %v1838_v3 = vsel %vm246_vm0, %v1806_v49, 0.0  ;;  %v1839_v29 = vsel %vm246_vm0, %v1807_v63, 0.0  ;;  %v1841_v5 = vsel %vm246_vm0, %v1808_v52, 0.0  ;;  %v1843_v42 = vsel %vm246_vm0, %v1809_v22, 0.0 }
 0x384   : > { %v1840_v34 = vadd.f32 %v1839_v29, %v1838_v3  ;;  %2336 = vmatprep.subr.bf16.mxu1 %v4496_v10  ;;  %v1845_v33 = vsel %vm246_vm0, %v1810_v4, 0.0  ;;  %v5626_v7 = vsub.f32 %v5415_v1, %v5529_v47  ;;  %v1813_v48 = vmul.f32 %v5612_v21, %v5612_v21 }
 0x385   : > { %v1847_v15 = vsel %vm246_vm0, %v1811_v45, 0.0  ;;  %v5633_v40 = vsub.f32 %v5423_v16, %v5529_v47  ;;  %v1814_v8 = vmul.f32 %v5619_v62, %v5619_v62  ;;  %v1849_v49 = vsel %vm246_vm0, %v1812_v23, 0.0 }
 0x386   : > { %v1842_v24 = vadd.f32 %v1841_v5, %v1840_v34  ;;  %v5641_v63 = vsub.f32 %v5429_v9, %v5529_v47  ;;  %v1815_v54 = vmul.f32 %v5626_v7, %v5626_v7  ;;  %v1851_v53 = vsel %vm246_vm0, %v1813_v48, 0.0 }
 0x387   : > { %2337 = vmatpush1.bf16.msra.mxu1 %v4498_v56  ;;  %v7075_v16 = vmov 0   ;;  %v5649_v22 = vsub.f32 %v5437_v12, %v5529_v47  ;;  %v1816_v3 = vmul.f32 %v5633_v40, %v5633_v40  ;;  %v1853_v29 = vsel %vm246_vm0, %v1814_v8, 0.0 }
 0x388   : > { %v1844_v31 = vadd.f32 %v1843_v42, %v1842_v24  ;;  %2631 = vmatprep.subr.bf16.mxu1 %v4501_v13  ;;  %v5656_v10 = vsub.f32 %v5443_v46, %v5529_v47  ;;  %v1817_v34 = vmul.f32 %v5641_v63, %v5641_v63  ;;  %v1855_v56 = vsel %vm246_vm0, %v1815_v54, 0.0 }
 0x389   : > { %v5663_v12 = vsub.f32 %v5451_v17, %v5529_v47  ;;  %v1818_v5 = vmul.f32 %v5649_v22, %v5649_v22  ;;  %v1857_v24 = vsel %vm246_vm0, %v1816_v3, 0.0  ;;  %v5670_v46 = vsub.f32 %v5455_v27, %v5529_v47  ;;  %v4502_v3 = vld [vmem:[#allocation8 + $0x10] ss:$8 sps:$4 sm:$0xff]  }
 0x38a   : > { %v1846_v14 = vadd.f32 %v1845_v33, %v1844_v31  ;;  %4043 = vmatmul.mubr.msk.bf16.vlgmr.msra.gmra.mrb[0].mxu1 %vm246_vm0, %v2209_v55  ;;  %v1819_v42 = vmul.f32 %v5656_v10, %v5656_v10  ;;  %v1859_v31 = vsel %vm246_vm0, %v1817_v34, 0.0  ;;  %v5677_v17 = vsub.f32 %v5463_v18, %v5529_v47 }
 0x38b   : > { %2632 = vmatpush1.bf16.msra.mxu1 %v4499_v0  ;;  %2370 = vmatprep.mubr.bf16.mxu1 %v7075_v16  ;;  %v1820_v33 = vmul.f32 %v5663_v12, %v5663_v12  ;;  %v1861_v51 = vsel %vm246_vm0, %v1818_v5, 0.0  ;;  %v5684_v27 = vsub.f32 %v5469_v11, %v5529_v47  ;;  %v5691_v18 = vsub.f32 %v5477_v26, %v5529_v47 }
 0x38c   : > { %v1848_v28 = vadd.f32 %v1847_v15, %v1846_v14  ;;  %v1821_v14 = vmul.f32 %v5670_v46, %v5670_v46  ;;  %v1863_v48 = vsel %vm246_vm0, %v1819_v42, 0.0  ;;  %v1822_v0 = vmul.f32 %v5677_v17, %v5677_v17 }
 0x38d   : > { %v1865_v13 = vsel %vm246_vm0, %v1820_v33, 0.0  ;;  %v5698_v11 = vsub.f32 %v5483_v44, %v5529_v47  ;;  %v1823_v55 = vmul.f32 %v5684_v27, %v5684_v27  ;;  %v1824_v26 = vmul.f32 %v5691_v18, %v5691_v18  ;;  %v4504_v44 = vld [vmem:[#allocation8 + $0x14] ss:$8 sps:$4 sm:$0xff]  }
 0x38e   : > { %v1850_v1 = vadd.f32 %v1849_v49, %v1848_v28  ;;  %v1867_v8 = vsel %vm246_vm0, %v1821_v14, 0.0  ;;  %2633 = vmatprep.subr.bf16.mxu1 %v4504_v44 }
 0x38f   : > { %2634 = vmatpush1.bf16.msra.mxu1 %v4502_v3 }
 0x390   : > { %v1852_v52 = vadd.f32 %v1851_v53, %v1850_v1  ;;  %v1869_v1 = vsel %vm246_vm0, %v1822_v0, 0.0  ;;  %v1825_v53 = vmul.f32 %v5698_v11, %v5698_v11 }
 0x392   : > { %v1854_v9 = vadd.f32 %v1853_v29, %v1852_v52  ;;  %v1871_v52 = vsel %vm246_vm0, %v1823_v55, 0.0  ;;  %v1826_v29 = vmul.f32 %v5533_v2, %v5533_v2 }
 0x394   : > { %v1856_v4 = vadd.f32 %v1855_v56, %v1854_v9  ;;  %v1873_v9 = vsel %vm246_vm0, %v1824_v26, 0.0  ;;  %v1827_v56 = vmul.f32 %v5537_v57, %v5537_v57 }
 0x396   : > { %v1858_v45 = vadd.f32 %v1857_v24, %v1856_v4  ;;  %v1875_v4 = vsel %vm246_vm0, %v1825_v53, 0.0  ;;  %v1828_v24 = vmul.f32 %v5540_v25, %v5540_v25 }
 0x398   : > { %v1860_v23 = vadd.f32 %v1859_v31, %v1858_v45  ;;  %v1877_v45 = vsel %vm246_vm0, %v1826_v29, 0.0  ;;  %v1829_v31 = vmul.f32 %v5543_v6, %v5543_v6 }
 0x39a   : > { %v1862_v38 = vadd.f32 %v1861_v51, %v1860_v23  ;;  %v1879_v23 = vsel %vm246_vm0, %v1827_v56, 0.0  ;;  %v1830_v51 = vmul.f32 %v5546_v61, %v5546_v61 }
 0x39c   : > { %v1864_v15 = vadd.f32 %v1863_v48, %v1862_v38  ;;  %v1881_v38 = vsel %vm246_vm0, %v1828_v24, 0.0  ;;  %v1831_v48 = vmul.f32 %v5549_v50, %v5549_v50 }
 0x39e   : > { %v1866_v28 = vadd.f32 %v1865_v13, %v1864_v15  ;;  %v1883_v15 = vsel %vm246_vm0, %v1829_v31, 0.0  ;;  %v1832_v13 = vmul.f32 %v5552_v35, %v5552_v35 }
 0x3a0   : > { %v1868_v49 = vadd.f32 %v1867_v8, %v1866_v28  ;;  %v1885_v28 = vsel %vm246_vm0, %v1830_v51, 0.0  ;;  %v1833_v8 = vmul.f32 %v5555_v30, %v5555_v30 }
 0x3a2   : > { %v1870_v54 = vadd.f32 %v1869_v1, %v1868_v49  ;;  %v1887_v49 = vsel %vm246_vm0, %v1831_v48, 0.0  ;;  %v1834_v1 = vmul.f32 %v5558_v37, %v5558_v37  ;;  %v1891_v3 = vsel %vm246_vm0, %v1833_v8, 0.0  ;;  %v4507_v48 = vld [vmem:[#allocation8 + $0x24] ss:$8 sps:$4 sm:$0xff]   ;;  %v1702_v8 = vld [vmem:[%s7022_s3] sm:$0x1] }
 0x3a3   : > { %2635 = vmatprep.subr.bf16.mxu1 %v4507_v48 }
 0x3a4   : > { %v1872_v47 = vadd.f32 %v1871_v52, %v1870_v54  ;;  %v1889_v54 = vsel %vm246_vm0, %v1832_v13, 0.0  ;;  %v1835_v52 = vmul.f32 %v5561_v39, %v5561_v39  ;;  %v1893_v29 = vsel %vm246_vm0, %v1834_v1, 0.0 }
 0x3a6   : > { %v1874_v34 = vadd.f32 %v1873_v9, %v1872_v47  ;;  %v1836_v47 = vmul.f32 %v5564_v19, %v5564_v19  ;;  %v1895_v56 = vsel %vm246_vm0, %v1835_v52, 0.0 }
 0x3a8   : > { %v1876_v5 = vadd.f32 %v1875_v4, %v1874_v34  ;;  %v1837_v34 = vmul.f32 %v5567_v60, %v5567_v60 }
 0x3aa   : > { %v1878_v42 = vadd.f32 %v1877_v45, %v1876_v5  ;;  %v1897_v5 = vsel %vm246_vm0, %v1836_v47, 0.0  ;;  %v1899_v45 = vsel %vm246_vm0, %v1837_v34, 0.0 }
 0x3ac   : > { %v1880_v33 = vadd.f32 %v1879_v23, %v1878_v42 }
 0x3ae   : > { %v1882_v14 = vadd.f32 %v1881_v38, %v1880_v33 }
 0x3b0   : > { %v1884_v0 = vadd.f32 %v1883_v15, %v1882_v14  ;;  %v4505_v14 = vld [vmem:[#allocation8 + $0x20] ss:$8 sps:$4 sm:$0xff]  }
 0x3b1   : > { %2636 = vmatpush1.bf16.msra.mxu1 %v4505_v14 }
 0x3b2   : > { %v1886_v55 = vadd.f32 %v1885_v28, %v1884_v0  ;;  %v1911_v28 = vlaneseq }
 0x3b4   : > { %v1888_v26 = vadd.f32 %v1887_v49, %v1886_v55  ;;  %v5747_v55 = vshrl.u32 %v1911_v28, 7 }
 0x3b6   : > { %v1890_v53 = vadd.f32 %v1889_v54, %v1888_v26  ;;  %7076 = vst [vmem:[#allocation17_spill] sm:$0xff] %v5747_v55  ;;  %v7035_v49 = vsub.s32 0, %v5747_v55 }
 0x3b8   : > { %v1892_v44 = vadd.f32 %v1891_v3, %v1890_v53  ;;  %v5758_v53 = vld [vmem:[%s7022_s3 + $0x1] ss:$0 sm:$0xff] }
 0x3ba   : > { %v1894_v9 = vadd.f32 %v1893_v29, %v1892_v44 }
 0x3bc   : > { %v1896_v4 = vadd.f32 %v1895_v56, %v1894_v9 }
 0x3be   : > { %v1898_v24 = vadd.f32 %v1897_v5, %v1896_v4 }
 0x3c0   : > { %v1900_v42 = vadd.f32 %v1899_v45, %v1898_v24 }
 0x3c2   : > { %v1901_v31 = vrot.slane %v1900_v42, 4 }
 0x3c4   : > { %v1902_v23 = vadd.f32 %v1901_v31, %v1900_v42  ;;  %v4508_v31 = vld [vmem:[#allocation8 + $0x30] ss:$8 sps:$4 sm:$0xff]  }
 0x3c6   : > { %v1903_v33 = vrot.slane %v1902_v23, 2 }
 0x3c8   : > { %v1904_v51 = vadd.f32 %v1903_v33, %v1902_v23 }
 0x3ca   : > { %v1905_v38 = vrot.slane %v1904_v51, 1 }
 0x3cc   : > { %v1906_v15 = vadd.f32 %v1905_v38, %v1904_v51 }
 0x3ce   : > { %v1907_v0 = vmul.f32 0.00390625, %v1906_v15 }
 0x3d0   : > { %v1908_v13 = vadd.f32 1e-05, %v1907_v0 }
 0x3d2   : > { %4523 = vrsqrt.f32 %v1908_v13 }
 0x3dc   : > { %v4524_v26 = vpop.eup %4523 }
 0x3dd   : > { %v1910_v1 = vmul.f32 %v4524_v26, %v1702_v8 }
 0x3df   : > { %v1914_v54 = vrot.slane %v1910_v1, %v7035_v49 }
 0x3e1   : > { %v1946_v52 = vmul.f32 %v1914_v54, %v5567_v60  ;;  %v1915_v29 = vmul.f32 %v1914_v54, %v5571_v36  ;;  %v1916_v9 = vmul.f32 %v1914_v54, %v5575_v59  ;;  %v1917_v34 = vmul.f32 %v1914_v54, %v5579_v20 }
 0x3e2   : > { %v1918_v56 = vmul.f32 %v1914_v54, %v5583_v32  ;;  %v1919_v4 = vmul.f32 %v1914_v54, %v5591_v41  ;;  %v1920_v5 = vmul.f32 %v1914_v54, %v5597_v58  ;;  %v1921_v60 = vmul.f32 %v1914_v54, %v5605_v43 }
 0x3e3   : > { %v1982_v3 = vadd.f32 %v5758_v53, %v1946_v52  ;;  %v1922_v24 = vmul.f32 %v1914_v54, %v5612_v21  ;;  %v1923_v45 = vmul.f32 %v1914_v54, %v5619_v62  ;;  %v1924_v36 = vmul.f32 %v1914_v54, %v5626_v7  ;;  %v4510_v7 = vld [vmem:[#allocation8 + $0x34] ss:$8 sps:$4 sm:$0xff]  }
 0x3e4   : > { %v1925_v59 = vmul.f32 %v1914_v54, %v5633_v40  ;;  %v1926_v20 = vmul.f32 %v1914_v54, %v5641_v63  ;;  %v1927_v42 = vmul.f32 %v1914_v54, %v5649_v22  ;;  %v1928_v32 = vmul.f32 %v1914_v54, %v5656_v10  ;;  %2637 = vmatprep.subr.bf16.mxu1 %v4510_v7 }
 0x3e5   : > { %vm2014_vm3 = vcmp.ge.f32.partialorder %v1982_v3, 0.0  ;;  %v2046_v44 = vmul.f32 0.2, %v1982_v3  ;;  %v1929_v41 = vmul.f32 %v1914_v54, %v5663_v12  ;;  %v1930_v58 = vmul.f32 %v1914_v54, %v5670_v46  ;;  %2638 = vmatpush1.bf16.msra.mxu1 %v4508_v31 }
 0x3e6   : > { %v1931_v43 = vmul.f32 %v1914_v54, %v5677_v17  ;;  %v1932_v21 = vmul.f32 %v1914_v54, %v5684_v27  ;;  %v1933_v62 = vmul.f32 %v1914_v54, %v5691_v18  ;;  %v1934_v40 = vmul.f32 %v1914_v54, %v5698_v11 }
 0x3e7   : > { %v2078_v47 = vsel %vm2014_vm3, %v1982_v3, %v2046_v44  ;;  %v1935_v63 = vmul.f32 %v1914_v54, %v5533_v2  ;;  %v1936_v22 = vmul.f32 %v1914_v54, %v5537_v57  ;;  %v1937_v10 = vmul.f32 %v1914_v54, %v5540_v25 }
 0x3e8   : > { %2110 = vst.msk [vmem:[#allocation2 + $0x189] sm:$0xff] %vm246_vm0, %v2078_v47  ;;  %v1938_v12 = vmul.f32 %v1914_v54, %v5543_v6  ;;  %v1939_v46 = vmul.f32 %v1914_v54, %v5546_v61  ;;  %v1940_v17 = vmul.f32 %v1914_v54, %v5549_v50  ;;  %v1941_v27 = vmul.f32 %v1914_v54, %v5552_v35 }
 0x3e9   : > { %v1942_v18 = vmul.f32 %v1914_v54, %v5555_v30  ;;  %v1943_v23 = vmul.f32 %v1914_v54, %v5558_v37  ;;  %v1944_v11 = vmul.f32 %v1914_v54, %v5561_v39  ;;  %v1945_v2 = vmul.f32 %v1914_v54, %v5564_v19 }
 0x3ea   : > { %v1951_v57 = vadd.f32 %v5758_v53, %v1915_v29  ;;  %v5796_v25 = vadd.f32 %v5758_v53, %v1916_v9  ;;  %v5799_v6 = vadd.f32 %v5758_v53, %v1917_v34  ;;  %v5802_v61 = vadd.f32 %v5758_v53, %v1918_v56 }
 0x3eb   : > { %v5805_v50 = vadd.f32 %v5758_v53, %v1919_v4  ;;  %v5808_v35 = vadd.f32 %v5758_v53, %v1920_v5  ;;  %v5811_v30 = vadd.f32 %v5758_v53, %v1921_v60  ;;  %v5814_v37 = vadd.f32 %v5758_v53, %v1922_v24 }
 0x3ec   : > { %v5817_v39 = vadd.f32 %v5758_v53, %v1923_v45  ;;  %v5820_v19 = vadd.f32 %v5758_v53, %v1924_v36  ;;  %v5823_v33 = vadd.f32 %v5758_v53, %v1925_v59  ;;  %v5826_v51 = vadd.f32 %v5758_v53, %v1926_v20 }
 0x3ed   : > { %v5829_v38 = vadd.f32 %v5758_v53, %v1927_v42  ;;  %v5832_v14 = vadd.f32 %v5758_v53, %v1928_v32  ;;  %v5835_v48 = vadd.f32 %v5758_v53, %v1929_v41  ;;  %v5838_v15 = vadd.f32 %v5758_v53, %v1930_v58 }
 0x3ee   : > { %v5841_v0 = vadd.f32 %v5758_v53, %v1931_v43  ;;  %v5844_v13 = vadd.f32 %v5758_v53, %v1932_v21  ;;  %v5847_v28 = vadd.f32 %v5758_v53, %v1933_v62  ;;  %v5850_v8 = vadd.f32 %v5758_v53, %v1934_v40 }
 0x3ef   : > { %v5853_v26 = vadd.f32 %v5758_v53, %v1935_v63  ;;  %v5856_v1 = vadd.f32 %v5758_v53, %v1936_v22  ;;  %v5859_v54 = vadd.f32 %v5758_v53, %v1937_v10  ;;  %v5862_v52 = vadd.f32 %v5758_v53, %v1938_v12 }
 0x3f0   : > { %v5865_v3 = vadd.f32 %v5758_v53, %v1939_v46  ;;  %v5868_v44 = vadd.f32 %v5758_v53, %v1940_v17  ;;  %v5871_v47 = vadd.f32 %v5758_v53, %v1941_v27  ;;  %v5874_v29 = vadd.f32 %v5758_v53, %v1942_v18 }
 0x3f1   : > { %v5877_v9 = vadd.f32 %v5758_v53, %v1943_v23  ;;  %v5880_v34 = vadd.f32 %v5758_v53, %v1944_v11  ;;  %vm1983_vm4 = vcmp.ge.f32.partialorder %v1951_v57, 0.0  ;;  %vm1984_vm5 = vcmp.ge.f32.partialorder %v5796_v25, 0.0 }
 0x3f2   : > { %vm1985_vm6 = vcmp.ge.f32.partialorder %v5799_v6, 0.0  ;;  %vm1986_vm7 = vcmp.ge.f32.partialorder %v5802_v61, 0.0  ;;  %vm1987_vm8 = vcmp.ge.f32.partialorder %v5805_v50, 0.0  ;;  %vm1988_vm9 = vcmp.ge.f32.partialorder %v5808_v35, 0.0 }
 0x3f3   : > { %vm1989_vm10 = vcmp.ge.f32.partialorder %v5811_v30, 0.0  ;;  %vm1990_vm11 = vcmp.ge.f32.partialorder %v5814_v37, 0.0  ;;  %v2015_v56 = vmul.f32 0.2, %v1951_v57  ;;  %v2016_v4 = vmul.f32 0.2, %v5796_v25 }
 0x3f4   : > { %v5897_v5 = vadd.f32 %v5758_v53, %v1945_v2  ;;  %vm1998_vm12 = vcmp.ge.f32.partialorder %v5838_v15, 0.0  ;;  %v2017_v60 = vmul.f32 0.2, %v5799_v6  ;;  %v2018_v24 = vmul.f32 0.2, %v5802_v61 }
 0x3f5   : > { %v2019_v45 = vmul.f32 0.2, %v5805_v50  ;;  %vm2003_vm15 = vcmp.ge.f32.partialorder %v5853_v26, 0.0  ;;  %vm2004_vm3 = vcmp.ge.f32.partialorder %v5856_v1, 0.0  ;;  %v2020_v53 = vmul.f32 0.2, %v5808_v35 }
 0x3f6   : > { %v2021_v36 = vmul.f32 0.2, %v5811_v30  ;;  %v2022_v59 = vmul.f32 0.2, %v5814_v37  ;;  %v2047_v20 = vsel %vm1983_vm4, %v1951_v57, %v2015_v56  ;;  %vm2005_vm14 = vcmp.ge.f32.partialorder %v5859_v54, 0.0 }
 0x3f7   : > { %v2023_v42 = vmul.f32 0.2, %v5817_v39  ;;  %v2024_v32 = vmul.f32 0.2, %v5820_v19  ;;  %v2025_v41 = vmul.f32 0.2, %v5823_v33  ;;  %v2048_v58 = vsel %vm1984_vm5, %v5796_v25, %v2016_v4 }
 0x3f8   : > { %2079 = vst.msk [vmem:[#allocation2 + $0x19] sm:$0xff] %vm246_vm0, %v2047_v20  ;;  %vm2009_vm4 = vcmp.ge.f32.partialorder %v5871_v47, 0.0  ;;  %vm2010_vm13 = vcmp.ge.f32.partialorder %v5874_v29, 0.0  ;;  %vm2011_vm2 = vcmp.ge.f32.partialorder %v5877_v9, 0.0  ;;  %vm2012_vm1 = vcmp.ge.f32.partialorder %v5880_v34, 0.0  ;;  %2080 = vst.msk [vmem:[#allocation2 + $0x21] sm:$0xff] %vm246_vm0, %v2048_v58 }
 0x3f9   : > { %v2026_v43 = vmul.f32 0.2, %v5826_v51  ;;  %v2027_v21 = vmul.f32 0.2, %v5829_v38  ;;  %v2028_v62 = vmul.f32 0.2, %v5832_v14  ;;  %v2049_v31 = vsel %vm1985_vm6, %v5799_v6, %v2017_v60 }
 0x3fa   : > { %vm2013_vm5 = vcmp.ge.f32.partialorder %v5897_v5, 0.0  ;;  %v2029_v7 = vmul.f32 0.2, %v5835_v48  ;;  %v2030_v40 = vmul.f32 0.2, %v5838_v15  ;;  %v2050_v22 = vsel %vm1986_vm7, %v5802_v61, %v2018_v24  ;;  %2081 = vst.msk [vmem:[#allocation2 + $0x31] sm:$0xff] %vm246_vm0, %v2049_v31 }
 0x3fb   : > { %v2031_v63 = vmul.f32 0.2, %v5841_v0  ;;  %v2032_v10 = vmul.f32 0.2, %v5844_v13  ;;  %v2033_v12 = vmul.f32 0.2, %v5847_v28  ;;  %v2051_v17 = vsel %vm1987_vm8, %v5805_v50, %v2019_v45 }
 0x3fc   : > { %v2034_v46 = vmul.f32 0.2, %v5850_v8  ;;  %2082 = vst.msk [vmem:[#allocation2 + $0x39] sm:$0xff] %vm246_vm0, %v2050_v22  ;;  %v2035_v27 = vmul.f32 0.2, %v5853_v26  ;;  %v2052_v11 = vsel %vm1988_vm9, %v5808_v35, %v2020_v53  ;;  %2083 = vst.msk [vmem:[#allocation2 + $0x49] sm:$0xff] %vm246_vm0, %v2051_v17  ;;  %v2053_v6 = vsel %vm1989_vm10, %v5811_v30, %v2021_v36 }
 0x3fd   : > { %v2036_v18 = vmul.f32 0.2, %v5856_v1  ;;  %v2037_v23 = vmul.f32 0.2, %v5859_v54  ;;  %v2038_v2 = vmul.f32 0.2, %v5862_v52  ;;  %v2054_v56 = vsel %vm1990_vm11, %v5814_v37, %v2022_v59 }
 0x3fe   : > { %v2039_v57 = vmul.f32 0.2, %v5865_v3  ;;  %v2040_v25 = vmul.f32 0.2, %v5868_v44  ;;  %2084 = vst.msk [vmem:[#allocation2 + $0x51] sm:$0xff] %vm246_vm0, %v2052_v11  ;;  %2085 = vst.msk [vmem:[#allocation2 + $0x61] sm:$0xff] %vm246_vm0, %v2053_v6 }
 0x3ff   : > { %v2041_v61 = vmul.f32 0.2, %v5871_v47  ;;  %v2042_v50 = vmul.f32 0.2, %v5874_v29  ;;  %v2043_v35 = vmul.f32 0.2, %v5877_v9 }
 0x400   : > { %v2044_v4 = vmul.f32 0.2, %v5880_v34  ;;  %v2045_v60 = vmul.f32 0.2, %v5897_v5  ;;  %vm7077_vm6 = vcmp.ge.f32.partialorder %v5817_v39, 0.0  ;;  %vm7078_vm7 = vcmp.ge.f32.partialorder %v5820_v19, 0.0 }
 0x401   : > { %v2055_v30 = vsel %vm7077_vm6, %v5817_v39, %v2023_v42  ;;  %v2056_v24 = vsel %vm7078_vm7, %v5820_v19, %v2024_v32  ;;  %2086 = vst.msk [vmem:[#allocation2 + $0x69] sm:$0xff] %vm246_vm0, %v2054_v56  ;;  %vm7079_vm8 = vcmp.ge.f32.partialorder %v5823_v33, 0.0  ;;  %vm7080_vm9 = vcmp.ge.f32.partialorder %v5826_v51, 0.0 }
 0x402   : > { %v2057_v37 = vsel %vm7079_vm8, %v5823_v33, %v2025_v41  ;;  %v2058_v45 = vsel %vm7080_vm9, %v5826_v51, %v2026_v43  ;;  %vm7081_vm10 = vcmp.ge.f32.partialorder %v5829_v38, 0.0  ;;  %vm7082_vm11 = vcmp.ge.f32.partialorder %v5832_v14, 0.0  ;;  %2087 = vst.msk [vmem:[#allocation2 + $0x79] sm:$0xff] %vm246_vm0, %v2055_v30  ;;  %2088 = vst.msk [vmem:[#allocation2 + $0x81] sm:$0xff] %vm246_vm0, %v2056_v24 }
 0x403   : > { %v2059_v53 = vsel %vm7081_vm10, %v5829_v38, %v2027_v21  ;;  %v2060_v39 = vsel %vm7082_vm11, %v5832_v14, %v2028_v62  ;;  %vm7083_vm6 = vcmp.ge.f32.partialorder %v5835_v48, 0.0  ;;  %v2062_v33 = vsel %vm1998_vm12, %v5838_v15, %v2030_v40  ;;  %2089 = vst.msk [vmem:[#allocation2 + $0x91] sm:$0xff] %vm246_vm0, %v2057_v37  ;;  %2090 = vst.msk [vmem:[#allocation2 + $0x99] sm:$0xff] %vm246_vm0, %v2058_v45  ;;  %v2179_v20 = vld [vmem:[#allocation2 + $0x49] sm:$0xff] }
 0x404   : > { %v2061_v19 = vsel %vm7083_vm6, %v5835_v48, %v2029_v7  ;;  %vm7084_vm7 = vcmp.ge.f32.partialorder %v5841_v0, 0.0  ;;  %vm7085_vm8 = vcmp.ge.f32.partialorder %v5844_v13, 0.0  ;;  %2091 = vst.msk [vmem:[#allocation2 + $0xa9] sm:$0xff] %vm246_vm0, %v2059_v53  ;;  %2092 = vst.msk [vmem:[#allocation2 + $0xb1] sm:$0xff] %vm246_vm0, %v2060_v39  ;;  %vm7086_vm9 = vcmp.ge.f32.partialorder %v5847_v28, 0.0 }
 0x405   : > { %v2063_v51 = vsel %vm7084_vm7, %v5841_v0, %v2031_v63  ;;  %v2064_v38 = vsel %vm7085_vm8, %v5844_v13, %v2032_v10  ;;  %v2065_v14 = vsel %vm7086_vm9, %v5847_v28, %v2033_v12  ;;  %vm7087_vm12 = vcmp.ge.f32.partialorder %v5850_v8, 0.0  ;;  %2093 = vst.msk [vmem:[#allocation2 + $0xc1] sm:$0xff] %vm246_vm0, %v2061_v19  ;;  %2094 = vst.msk [vmem:[#allocation2 + $0xc9] sm:$0xff] %vm246_vm0, %v2062_v33  ;;  %v2175_v13 = vld [vmem:[#allocation2 + $0x19] sm:$0xff]  ;;  %v2176_v28 = vld [vmem:[#allocation2 + $0x21] sm:$0xff] }
 0x406   : > { %v2066_v48 = vsel %vm7087_vm12, %v5850_v8, %v2034_v46  ;;  %v2067_v15 = vsel %vm2003_vm15, %v5853_v26, %v2035_v27  ;;  %v2068_v0 = vsel %vm2004_vm3, %v5856_v1, %v2036_v18  ;;  %2095 = vst.msk [vmem:[#allocation2 + $0xd9] sm:$0xff] %vm246_vm0, %v2063_v51  ;;  %2096 = vst.msk [vmem:[#allocation2 + $0xe1] sm:$0xff] %vm246_vm0, %v2064_v38  ;;  %vm7088_vm15 = vcmp.ge.f32.partialorder %v5862_v52, 0.0  ;;  %v2180_v42 = vld [vmem:[#allocation2 + $0x51] sm:$0xff]  ;;  %v2181_v41 = vld [vmem:[#allocation2 + $0x61] sm:$0xff] }
 0x407   : > { %v2069_v8 = vsel %vm2005_vm14, %v5859_v54, %v2037_v23  ;;  %v2070_v26 = vsel %vm7088_vm15, %v5862_v52, %v2038_v2  ;;  %vm7089_vm3 = vcmp.ge.f32.partialorder %v5865_v3, 0.0  ;;  %vm7090_vm10 = vcmp.ge.f32.partialorder %v5868_v44, 0.0  ;;  %2097 = vst.msk [vmem:[#allocation2 + $0xf1] sm:$0xff] %vm246_vm0, %v2065_v14  ;;  %2098 = vst.msk [vmem:[#allocation2 + $0xf9] sm:$0xff] %vm246_vm0, %v2066_v48 }
 0x408   : > { %v2071_v1 = vsel %vm7089_vm3, %v5865_v3, %v2039_v57  ;;  %v2072_v36 = vsel %vm7090_vm10, %v5868_v44, %v2040_v25  ;;  %2099 = vst.msk [vmem:[#allocation2 + $0x109] sm:$0xff] %vm246_vm0, %v2067_v15  ;;  %2100 = vst.msk [vmem:[#allocation2 + $0x111] sm:$0xff] %vm246_vm0, %v2068_v0  ;;  %v2073_v54 = vsel %vm2009_vm4, %v5871_v47, %v2041_v61  ;;  %v2182_v58 = vld [vmem:[#allocation2 + $0x69] sm:$0xff] }
 0x409   : > { %v2074_v52 = vsel %vm2010_vm13, %v5874_v29, %v2042_v50  ;;  %v2075_v3 = vsel %vm2011_vm2, %v5877_v9, %v2043_v35  ;;  %v2076_v44 = vsel %vm2012_vm1, %v5880_v34, %v2044_v4  ;;  %2101 = vst.msk [vmem:[#allocation2 + $0x121] sm:$0xff] %vm246_vm0, %v2069_v8  ;;  %2102 = vst.msk [vmem:[#allocation2 + $0x129] sm:$0xff] %vm246_vm0, %v2070_v26  ;;  %v2177_v9 = vld [vmem:[#allocation2 + $0x31] sm:$0xff]  ;;  %v2178_v34 = vld [vmem:[#allocation2 + $0x39] sm:$0xff] }
 0x40a   : > { %2103 = vst.msk [vmem:[#allocation2 + $0x139] sm:$0xff] %vm246_vm0, %v2071_v1  ;;  %2104 = vst.msk [vmem:[#allocation2 + $0x141] sm:$0xff] %vm246_vm0, %v2072_v36  ;;  %v2077_v47 = vsel %vm2013_vm5, %v5897_v5, %v2045_v60  ;;  %v2210_v29 = vpack.c.bf16 %v2176_v28, %v2175_v13  ;;  %v2211_v59 = vpack.c.bf16 %v2178_v34, %v2177_v9  ;;  %v4513_v5 = vld [vmem:[#allocation8 + $0x84] ss:$8 sps:$4 sm:$0xff]   ;;  %v2184_v62 = vld [vmem:[#allocation2 + $0x81] sm:$0xff] }
 0x40b   : > { %2105 = vst.msk [vmem:[#allocation2 + $0x151] sm:$0xff] %vm246_vm0, %v2073_v54  ;;  %2106 = vst.msk [vmem:[#allocation2 + $0x159] sm:$0xff] %vm246_vm0, %v2074_v52  ;;  %2995 = vmatprep.subr.bf16.mxu1 %v4513_v5  ;;  %v2212_v32 = vpack.c.bf16 %v2180_v42, %v2179_v20  ;;  %v2213_v43 = vpack.c.bf16 %v2182_v58, %v2181_v41  ;;  %v2183_v21 = vld [vmem:[#allocation2 + $0x79] sm:$0xff]  ;;  %v2185_v7 = vld [vmem:[#allocation2 + $0x91] sm:$0xff] }
 0x40c   : > { %2107 = vst.msk [vmem:[#allocation2 + $0x169] sm:$0xff] %vm246_vm0, %v2075_v3  ;;  %2108 = vst.msk [vmem:[#allocation2 + $0x171] sm:$0xff] %vm246_vm0, %v2076_v44  ;;  %4044 = vmatmul.mubr.msk.bf16.gmra.mrb[4].mxu1 %vm246_vm0, %v2210_v29  ;;  %v2214_v31 = vpack.c.bf16 %v2184_v62, %v2183_v21  ;;  %v2186_v40 = vld [vmem:[#allocation2 + $0x99] sm:$0xff]  ;;  %v2187_v22 = vld [vmem:[#allocation2 + $0xa9] sm:$0xff] }
 0x40d   : > { %2109 = vst.msk [vmem:[#allocation2 + $0x181] sm:$0xff] %vm246_vm0, %v2077_v47  ;;  %2378 = vmatprep.mubr.bf16.mxu1 %v7075_v16  ;;  %v2215_v63 = vpack.c.bf16 %v2186_v40, %v2185_v7  ;;  %v2188_v10 = vld [vmem:[#allocation2 + $0xb1] sm:$0xff]  ;;  %v2189_v46 = vld [vmem:[#allocation2 + $0xc1] sm:$0xff]  ;;  %v2190_v17 = vld [vmem:[#allocation2 + $0xc9] sm:$0xff] }
 0x40e   : > { %v2216_v12 = vpack.c.bf16 %v2188_v10, %v2187_v22  ;;  %v2217_v27 = vpack.c.bf16 %v2190_v17, %v2189_v46  ;;  %v2191_v18 = vld [vmem:[#allocation2 + $0xd9] sm:$0xff]  ;;  %v2192_v23 = vld [vmem:[#allocation2 + $0xe1] sm:$0xff]  ;;  %v2193_v2 = vld [vmem:[#allocation2 + $0xf1] sm:$0xff] }
 0x40f   : > { %v2218_v11 = vpack.c.bf16 %v2192_v23, %v2191_v18  ;;  %v2194_v57 = vld [vmem:[#allocation2 + $0xf9] sm:$0xff]  ;;  %v2195_v6 = vld [vmem:[#allocation2 + $0x109] sm:$0xff]  ;;  %v2196_v61 = vld [vmem:[#allocation2 + $0x111] sm:$0xff] }
 0x410   : > { %v2219_v25 = vpack.c.bf16 %v2194_v57, %v2193_v2  ;;  %v2220_v50 = vpack.c.bf16 %v2196_v61, %v2195_v6  ;;  %v2197_v35 = vld [vmem:[#allocation2 + $0x121] sm:$0xff]  ;;  %v2198_v56 = vld [vmem:[#allocation2 + $0x129] sm:$0xff]  ;;  %v2207_v28 = vld [vmem:[#allocation2 + $0x199] sm:$0xff] }
 0x411   : > { %v2221_v4 = vpack.c.bf16 %v2198_v56, %v2197_v35  ;;  %v2199_v45 = vld [vmem:[#allocation2 + $0x139] sm:$0xff]  ;;  %v2200_v53 = vld [vmem:[#allocation2 + $0x141] sm:$0xff]  ;;  %v2206_v0 = vld [vmem:[#allocation2 + $0x189] sm:$0xff] }
 0x412   : > { %v2222_v39 = vpack.c.bf16 %v2200_v53, %v2199_v45  ;;  %v2201_v19 = vld [vmem:[#allocation2 + $0x151] sm:$0xff]  ;;  %v2202_v33 = vld [vmem:[#allocation2 + $0x159] sm:$0xff]  ;;  %v2208_v8 = vld [vmem:[#allocation2 + $0x1a1] sm:$0xff] }
 0x413   : > { %v2223_v51 = vpack.c.bf16 %v2202_v33, %v2201_v19  ;;  %v2203_v38 = vld [vmem:[#allocation2 + $0x169] sm:$0xff]  ;;  %v2204_v14 = vld [vmem:[#allocation2 + $0x171] sm:$0xff]  ;;  %v2226_v26 = vpack.c.bf16 %v2208_v8, %v2207_v28  ;;  %v2111_v1 = vld [vmem:[#allocation2] sm:$0xff] }
 0x414   : > { %4045 = vmatmul.mubr.msk.bf16.gmra.mrb[8].mxu1 %vm246_vm0, %v2211_v59  ;;  %v2224_v48 = vpack.c.bf16 %v2204_v14, %v2203_v38  ;;  %v2205_v15 = vld [vmem:[#allocation2 + $0x181] sm:$0xff]  ;;  %v4511_v52 = vld [vmem:[#allocation8 + $0x80] ss:$8 sps:$4 sm:$0xff]   ;;  %v4519_v47 = vld [vmem:[#allocation8 + $0xa4] ss:$8 sps:$4 sm:$0xff]  }
 0x415   : > { %2388 = vmatprep.mubr.bf16.mxu1 %v7075_v16  ;;  %v2225_v13 = vpack.c.bf16 %v2206_v0, %v2205_v15  ;;  %v2112_v36 = vld [vmem:[#allocation2 + $0x8] sm:$0xff]  ;;  %v2113_v29 = vld [vmem:[#allocation2 + $0x18] sm:$0xff]  ;;  %v2114_v9 = vld [vmem:[#allocation2 + $0x20] sm:$0xff] }
 0x416   : > { %v2147_v54 = vpack.c.bf16 %v2112_v36, %v2111_v1  ;;  %v4516_v3 = vld [vmem:[#allocation8 + $0x94] ss:$8 sps:$4 sm:$0xff]   ;;  %v4514_v44 = vld [vmem:[#allocation8 + $0x90] ss:$8 sps:$4 sm:$0xff]   ;;  %v4517_v34 = vld [vmem:[#allocation8 + $0xa0] ss:$8 sps:$4 sm:$0xff]   ;;  %v2148_v59 = vpack.c.bf16 %v2114_v9, %v2113_v29 }
 0x417   : > { %v4522_v5 = vld [vmem:[#allocation8 + $0xb4] ss:$8 sps:$4 sm:$0xff]   ;;  %v4520_v20 = vld [vmem:[#allocation8 + $0xb0] ss:$8 sps:$4 sm:$0xff]   ;;  %v2115_v42 = vld [vmem:[#allocation2 + $0x30] sm:$0xff] }
 0x418   : > { %v2117_v58 = vld [vmem:[#allocation2 + $0x48] sm:$0xff]  ;;  %v2119_v62 = vld [vmem:[#allocation2 + $0x60] sm:$0xff]  ;;  %v2121_v40 = vld [vmem:[#allocation2 + $0x78] sm:$0xff] }
 0x419   : > { %v2123_v10 = vld [vmem:[#allocation2 + $0x90] sm:$0xff]  ;;  %v2125_v17 = vld [vmem:[#allocation2 + $0xa8] sm:$0xff]  ;;  %v2127_v23 = vld [vmem:[#allocation2 + $0xc0] sm:$0xff] }
 0x41a   : > { %v2129_v57 = vld [vmem:[#allocation2 + $0xd8] sm:$0xff]  ;;  %v2131_v61 = vld [vmem:[#allocation2 + $0xf0] sm:$0xff]  ;;  %v2133_v56 = vld [vmem:[#allocation2 + $0x108] sm:$0xff] }
 0x41b   : > { %v2136_v45 = vld [vmem:[#allocation2 + $0x128] sm:$0xff]  ;;  %v2138_v19 = vld [vmem:[#allocation2 + $0x140] sm:$0xff]  ;;  %v2140_v38 = vld [vmem:[#allocation2 + $0x158] sm:$0xff] }
 0x41c   : > { %4046 = vmatmul.mubr.msk.bf16.gmra.mrb[12].mxu1 %vm246_vm0, %v2212_v32  ;;  %v2116_v32 = vld [vmem:[#allocation2 + $0x38] sm:$0xff]  ;;  %v2142_v15 = vld [vmem:[#allocation2 + $0x170] sm:$0xff]  ;;  %v2144_v28 = vld [vmem:[#allocation2 + $0x188] sm:$0xff] }
 0x41d   : > { %2398 = vmatprep.mubr.bf16.mxu1 %v7075_v16  ;;  %v2149_v41 = vpack.c.bf16 %v2116_v32, %v2115_v42  ;;  %v2146_v1 = vld [vmem:[#allocation2 + $0x1a0] sm:$0xff]  ;;  %v2842_v9 = vld [vmem:[#allocation2 + $0x32] sm:$0xff] }
 0x41e   : > { %v2846_v32 = vld [vmem:[#allocation2 + $0x62] sm:$0xff] }
 0x424   : > { %4047 = vmatmul.mubr.msk.bf16.gmra.mrb[16].mxu1 %vm246_vm0, %v2213_v43  ;;  %v2118_v43 = vld [vmem:[#allocation2 + $0x50] sm:$0xff] }
 0x425   : > { %2408 = vmatprep.mubr.bf16.mxu1 %v7075_v16  ;;  %v2150_v21 = vpack.c.bf16 %v2118_v43, %v2117_v58  ;;  %v2848_v43 = vld [vmem:[#allocation2 + $0x7a] sm:$0xff] }
 0x42c   : > { %4048 = vmatmul.mubr.msk.bf16.gmra.mrb[20].mxu1 %vm246_vm0, %v2214_v31  ;;  %v2120_v31 = vld [vmem:[#allocation2 + $0x68] sm:$0xff] }
 0x42d   : > { %2418 = vmatprep.mubr.bf16.mxu1 %v7075_v16  ;;  %v2151_v7 = vpack.c.bf16 %v2120_v31, %v2119_v62  ;;  %v2850_v31 = vld [vmem:[#allocation2 + $0x92] sm:$0xff] }
 0x434   : > { %4049 = vmatmul.mubr.msk.bf16.gmra.mrb[24].mxu1 %vm246_vm0, %v2215_v63  ;;  %v2122_v63 = vld [vmem:[#allocation2 + $0x80] sm:$0xff] }
 0x435   : > { %2428 = vmatprep.mubr.bf16.mxu1 %v7075_v16  ;;  %v2152_v22 = vpack.c.bf16 %v2122_v63, %v2121_v40  ;;  %v2852_v63 = vld [vmem:[#allocation2 + $0xaa] sm:$0xff] }
 0x43c   : > { %4050 = vmatmul.mubr.msk.bf16.gmra.mrb[28].mxu1 %vm246_vm0, %v2216_v12  ;;  %v2124_v12 = vld [vmem:[#allocation2 + $0x98] sm:$0xff] }
 0x43d   : > { %2438 = vmatprep.mubr.bf16.mxu1 %v7075_v16  ;;  %v2153_v46 = vpack.c.bf16 %v2124_v12, %v2123_v10 }
 0x444   : > { %4051 = vmatmul.mubr.msk.bf16.gmra.mrb[32].mxu1 %vm246_vm0, %v2217_v27  ;;  %v2126_v27 = vld [vmem:[#allocation2 + $0xb0] sm:$0xff] }
 0x445   : > { %2448 = vmatprep.mubr.bf16.mxu1 %v7075_v16  ;;  %v2154_v18 = vpack.c.bf16 %v2126_v27, %v2125_v17  ;;  %v2855_v17 = vld [vmem:[#allocation2 + $0xca] sm:$0xff] }
 0x44c   : > { %4052 = vmatmul.mubr.msk.bf16.gmra.mrb[36].mxu1 %vm246_vm0, %v2218_v11  ;;  %v2128_v11 = vld [vmem:[#allocation2 + $0xc8] sm:$0xff] }
 0x44d   : > { %2458 = vmatprep.mubr.bf16.mxu1 %v7075_v16  ;;  %v2155_v2 = vpack.c.bf16 %v2128_v11, %v2127_v23 }
 0x454   : > { %4053 = vmatmul.mubr.msk.bf16.gmra.mrb[40].mxu1 %vm246_vm0, %v2219_v25  ;;  %v2130_v25 = vld [vmem:[#allocation2 + $0xe0] sm:$0xff] }
 0x455   : > { %2468 = vmatprep.mubr.bf16.mxu1 %v7075_v16  ;;  %v2156_v6 = vpack.c.bf16 %v2130_v25, %v2129_v57  ;;  %v2856_v57 = vld [vmem:[#allocation2 + $0xda] sm:$0xff]  ;;  %v2857_v25 = vld [vmem:[#allocation2 + $0xe2] sm:$0xff] }
 0x45c   : > { %4054 = vmatmul.mubr.msk.bf16.gmra.mrb[44].mxu1 %vm246_vm0, %v2220_v50  ;;  %v2132_v50 = vld [vmem:[#allocation2 + $0xf8] sm:$0xff] }
 0x45d   : > { %2478 = vmatprep.mubr.bf16.mxu1 %v7075_v16  ;;  %v6089_v60 = vpop.f32.mrb[0].mxu1  ;;  %v2157_v35 = vpack.c.bf16 %v2132_v50, %v2131_v61 }
 0x45e   : > { %v2366_v30 = vpop.f32.mrb[1].mxu1 }
 0x45f   : > { %v6092_v24 = vpop.f32.mrb[2].mxu1 }
 0x460   : > { %v2369_v37 = vpop.f32.mrb[3].mxu1 }
 0x461   : > { %v2135_v37 = vld [vmem:[#allocation2 + $0x120] sm:$0xff] }
 0x462   : > { %v2159_v53 = vpack.c.bf16 %v2136_v45, %v2135_v37  ;;  %v2859_v37 = vld [vmem:[#allocation2 + $0xfa] sm:$0xff] }
 0x464   : > { %4055 = vmatmul.mubr.msk.bf16.gmra.mrb[48].mxu1 %vm246_vm0, %v2221_v4  ;;  %v2134_v4 = vld [vmem:[#allocation2 + $0x110] sm:$0xff] }
 0x465   : > { %2488 = vmatprep.mubr.bf16.mxu1 %v7075_v16  ;;  %v2158_v30 = vpack.c.bf16 %v2134_v4, %v2133_v56  ;;  %v2883_v4 = vpack.c.bf16 %v2857_v25, %v2856_v57 }
 0x46c   : > { %4056 = vmatmul.mubr.msk.bf16.gmra.mrb[52].mxu1 %vm246_vm0, %v2222_v39  ;;  %v2137_v39 = vld [vmem:[#allocation2 + $0x138] sm:$0xff] }
 0x46d   : > { %2498 = vmatprep.mubr.bf16.mxu1 %v7075_v16  ;;  %v2160_v33 = vpack.c.bf16 %v2138_v19, %v2137_v39  ;;  %v2861_v39 = vld [vmem:[#allocation2 + $0x112] sm:$0xff]  ;;  %v2863_v19 = vld [vmem:[#allocation2 + $0x12a] sm:$0xff] }
 0x474   : > { %4057 = vmatmul.mubr.msk.bf16.gmra.mrb[56].mxu1 %vm246_vm0, %v2223_v51  ;;  %v2139_v51 = vld [vmem:[#allocation2 + $0x150] sm:$0xff] }
 0x475   : > { %2508 = vmatprep.mubr.bf16.mxu1 %v7075_v16  ;;  %v2161_v14 = vpack.c.bf16 %v2140_v38, %v2139_v51  ;;  %v2864_v51 = vld [vmem:[#allocation2 + $0x13a] sm:$0xff]  ;;  %v2865_v38 = vld [vmem:[#allocation2 + $0x142] sm:$0xff] }
 0x47c   : > { %4058 = vmatmul.mubr.msk.bf16.gmra.mrb[60].mxu1 %vm246_vm0, %v2224_v48  ;;  %v2141_v48 = vld [vmem:[#allocation2 + $0x168] sm:$0xff] }
 0x47d   : > { %2518 = vmatprep.mubr.bf16.mxu1 %v7075_v16  ;;  %v2162_v0 = vpack.c.bf16 %v2142_v15, %v2141_v48  ;;  %v2866_v48 = vld [vmem:[#allocation2 + $0x152] sm:$0xff]  ;;  %v2867_v15 = vld [vmem:[#allocation2 + $0x15a] sm:$0xff] }
 0x484   : > { %4059 = vmatmul.mubr.msk.bf16.gmra.mrb[64].mxu1 %vm246_vm0, %v2225_v13  ;;  %v2143_v13 = vld [vmem:[#allocation2 + $0x180] sm:$0xff] }
 0x485   : > { %2528 = vmatprep.mubr.bf16.mxu1 %v7075_v16  ;;  %v2163_v8 = vpack.c.bf16 %v2144_v28, %v2143_v13  ;;  %v2868_v13 = vld [vmem:[#allocation2 + $0x16a] sm:$0xff]  ;;  %v2869_v28 = vld [vmem:[#allocation2 + $0x172] sm:$0xff] }
 0x48c   : > { %4060 = vmatmul.mubr.msk.bf16.gmra.mrb[68].mxu1 %vm246_vm0, %v2226_v26  ;;  %v2145_v26 = vld [vmem:[#allocation2 + $0x198] sm:$0xff] }
 0x48d   : > { %2663 = vmatprep.mubr.bf16.mxu1 %v7075_v16  ;;  %v2164_v36 = vpack.c.bf16 %v2146_v1, %v2145_v26  ;;  %v2870_v26 = vld [vmem:[#allocation2 + $0x182] sm:$0xff]  ;;  %v2871_v1 = vld [vmem:[#allocation2 + $0x18a] sm:$0xff] }
 0x494   : > { %4069 = vmatmul.mubr.msk.bf16.vlgmr.msra.gmra.mrb[72].mxu1 %vm246_vm0, %v2147_v54  ;;  %v2838_v54 = vld [vmem:[#allocation2 + $0x2] sm:$0xff] }
 0x495   : > { %2996 = vmatpush1.bf16.msra.mxu1 %v4511_v52  ;;  %2671 = vmatprep.mubr.bf16.mxu1 %v7075_v16  ;;  %v2839_v52 = vld [vmem:[#allocation2 + $0xa] sm:$0xff] }
 0x496   : > { %2997 = vmatprep.subr.bf16.mxu1 %v4516_v3  ;;  %v2874_v3 = vpack.c.bf16 %v2839_v52, %v2838_v54  ;;  %v2872_v54 = vld [vmem:[#allocation2 + $0x19a] sm:$0xff]  ;;  %v2873_v52 = vld [vmem:[#allocation2 + $0x1a2] sm:$0xff] }
 0x499   : > { %2998 = vmatpush1.bf16.msra.mxu1 %v4514_v44  ;;  %v2840_v44 = vld [vmem:[#allocation2 + $0x1a] sm:$0xff] }
 0x49a   : > { %2999 = vmatprep.subr.bf16.mxu1 %v4519_v47  ;;  %v2841_v47 = vld [vmem:[#allocation2 + $0x22] sm:$0xff] }
 0x49b   : > { %v2875_v29 = vpack.c.bf16 %v2841_v47, %v2840_v44 }
 0x49c   : > { %4070 = vmatmul.mubr.msk.bf16.gmra.mrb[4].mxu1 %vm246_vm0, %v2148_v59 }
 0x49d   : > { %2679 = vmatprep.mubr.bf16.mxu1 %v7075_v16  ;;  %3000 = vmatpush1.bf16.msra.mxu1 %v4517_v34  ;;  %v2843_v34 = vld [vmem:[#allocation2 + $0x3a] sm:$0xff] }
 0x49e   : > { %3001 = vmatprep.subr.bf16.mxu1 %v4522_v5  ;;  %v2876_v59 = vpack.c.bf16 %v2843_v34, %v2842_v9  ;;  %v2844_v5 = vld [vmem:[#allocation2 + $0x4a] sm:$0xff] }
 0x4a1   : > { %3002 = vmatpush1.bf16.msra.mxu1 %v4520_v20  ;;  %v2845_v20 = vld [vmem:[#allocation2 + $0x52] sm:$0xff] }
 0x4a2   : > { %v2877_v42 = vpack.c.bf16 %v2845_v20, %v2844_v5 }
 0x4a4   : > { %4071 = vmatmul.mubr.msk.bf16.gmra.mrb[8].mxu1 %vm246_vm0, %v2149_v41  ;;  %v2847_v41 = vld [vmem:[#allocation2 + $0x6a] sm:$0xff] }
 0x4a5   : > { %2689 = vmatprep.mubr.bf16.mxu1 %v7075_v16  ;;  %v2878_v58 = vpack.c.bf16 %v2847_v41, %v2846_v32 }
 0x4ac   : > { %4072 = vmatmul.mubr.msk.bf16.gmra.mrb[12].mxu1 %vm246_vm0, %v2150_v21  ;;  %v2849_v21 = vld [vmem:[#allocation2 + $0x82] sm:$0xff] }
 0x4ad   : > { %2699 = vmatprep.mubr.bf16.mxu1 %v7075_v16  ;;  %v2879_v62 = vpack.c.bf16 %v2849_v21, %v2848_v43 }
 0x4b4   : > { %4073 = vmatmul.mubr.msk.bf16.gmra.mrb[16].mxu1 %vm246_vm0, %v2151_v7  ;;  %v2851_v7 = vld [vmem:[#allocation2 + $0x9a] sm:$0xff] }
 0x4b5   : > { %2709 = vmatprep.mubr.bf16.mxu1 %v7075_v16  ;;  %v2880_v40 = vpack.c.bf16 %v2851_v7, %v2850_v31 }
 0x4bc   : > { %4074 = vmatmul.mubr.msk.bf16.gmra.mrb[20].mxu1 %vm246_vm0, %v2152_v22  ;;  %v2853_v22 = vld [vmem:[#allocation2 + $0xb2] sm:$0xff] }
 0x4bd   : > { %2719 = vmatprep.mubr.bf16.mxu1 %v7075_v16  ;;  %v2881_v10 = vpack.c.bf16 %v2853_v22, %v2852_v63 }
 0x4c4   : > { %4075 = vmatmul.mubr.msk.bf16.gmra.mrb[24].mxu1 %vm246_vm0, %v2153_v46  ;;  %v2854_v46 = vld [vmem:[#allocation2 + $0xc2] sm:$0xff] }
 0x4c5   : > { %2729 = vmatprep.mubr.bf16.mxu1 %v7075_v16  ;;  %v2882_v11 = vpack.c.bf16 %v2855_v17, %v2854_v46 }
 0x4cc   : > { %4076 = vmatmul.mubr.msk.bf16.gmra.mrb[28].mxu1 %vm246_vm0, %v2154_v18 }
 0x4cd   : > { %2739 = vmatprep.mubr.bf16.mxu1 %v7075_v16 }
 0x4d4   : > { %4077 = vmatmul.mubr.msk.bf16.gmra.mrb[32].mxu1 %vm246_vm0, %v2155_v2 }
 0x4d5   : > { %2749 = vmatprep.mubr.bf16.mxu1 %v7075_v16 }
 0x4dc   : > { %4078 = vmatmul.mubr.msk.bf16.gmra.mrb[36].mxu1 %vm246_vm0, %v2156_v6 }
 0x4dd   : > { %2759 = vmatprep.mubr.bf16.mxu1 %v7075_v16 }
 0x4e4   : > { %4079 = vmatmul.mubr.msk.bf16.gmra.mrb[40].mxu1 %vm246_vm0, %v2157_v35 }
 0x4e5   : > { %2769 = vmatprep.mubr.bf16.mxu1 %v7075_v16 }
 0x4ec   : > { %4080 = vmatmul.mubr.msk.bf16.gmra.mrb[44].mxu1 %vm246_vm0, %v2158_v30  ;;  %v2858_v30 = vld [vmem:[#allocation2 + $0xf2] sm:$0xff] }
 0x4ed   : > { %2779 = vmatprep.mubr.bf16.mxu1 %v7075_v16  ;;  %v2884_v45 = vpack.c.bf16 %v2859_v37, %v2858_v30 }
 0x4f4   : > { %4081 = vmatmul.mubr.msk.bf16.gmra.mrb[48].mxu1 %vm246_vm0, %v2159_v53  ;;  %v2860_v53 = vld [vmem:[#allocation2 + $0x10a] sm:$0xff] }
 0x4f5   : > { %2789 = vmatprep.mubr.bf16.mxu1 %v7075_v16 }
 0x4fc   : > { %4082 = vmatmul.mubr.msk.bf16.gmra.mrb[52].mxu1 %vm246_vm0, %v2160_v33 }
 0x4fd   : > { %2799 = vmatprep.mubr.bf16.mxu1 %v7075_v16 }
 0x504   : > { %4083 = vmatmul.mubr.msk.bf16.gmra.mrb[56].mxu1 %vm246_vm0, %v2161_v14  ;;  %v2887_v14 = vpack.c.bf16 %v2865_v38, %v2864_v51 }
 0x505   : > { %2809 = vmatprep.mubr.bf16.mxu1 %v7075_v16 }
 0x50c   : > { %4084 = vmatmul.mubr.msk.bf16.gmra.mrb[60].mxu1 %vm246_vm0, %v2162_v0  ;;  %v2888_v0 = vpack.c.bf16 %v2867_v15, %v2866_v48 }
 0x50d   : > { %2819 = vmatprep.mubr.bf16.mxu1 %v7075_v16 }
 0x514   : > { %4085 = vmatmul.mubr.msk.bf16.gmra.mrb[64].mxu1 %vm246_vm0, %v2163_v8  ;;  %v2889_v8 = vpack.c.bf16 %v2869_v28, %v2868_v13 }
 0x515   : > { %2829 = vmatprep.mubr.bf16.mxu1 %v7075_v16 }
 0x51c   : > { %4086 = vmatmul.mubr.msk.bf16.gmra.mrb[76].mxu1 %vm246_vm0, %v2164_v36  ;;  %v2890_v36 = vpack.c.bf16 %v2871_v1, %v2870_v26 }
 0x51d   : > { %3027 = vmatprep.mubr.bf16.mxu1 %v7075_v16 }
 0x524   : > { %4095 = vmatmul.mubr.msk.bf16.vlgmr.msra.gmra.mrb[80].mxu1 %vm246_vm0, %v2874_v3  ;;  %v2891_v3 = vpack.c.bf16 %v2873_v52, %v2872_v54 }
 0x525   : > { %3035 = vmatprep.mubr.bf16.mxu1 %v7075_v16 }
 0x52c   : > { %4096 = vmatmul.mubr.msk.bf16.gmra.mrb[4].mxu1 %vm246_vm0, %v2875_v29 }
 0x52d   : > { %3043 = vmatprep.mubr.bf16.mxu1 %v7075_v16 }
 0x534   : > { %4097 = vmatmul.mubr.msk.bf16.gmra.mrb[8].mxu1 %vm246_vm0, %v2876_v59 }
 0x535   : > { %3053 = vmatprep.mubr.bf16.mxu1 %v7075_v16 }
 0x53c   : > { %4098 = vmatmul.mubr.msk.bf16.gmra.mrb[12].mxu1 %vm246_vm0, %v2877_v42 }
 0x53d   : > { %3063 = vmatprep.mubr.bf16.mxu1 %v7075_v16 }
 0x544   : > { %4099 = vmatmul.mubr.msk.bf16.gmra.mrb[16].mxu1 %vm246_vm0, %v2878_v58 }
 0x545   : > { %3073 = vmatprep.mubr.bf16.mxu1 %v7075_v16 }
 0x54c   : > { %4100 = vmatmul.mubr.msk.bf16.gmra.mrb[20].mxu1 %vm246_vm0, %v2879_v62 }
 0x54d   : > { %3083 = vmatprep.mubr.bf16.mxu1 %v7075_v16 }
 0x554   : > { %4101 = vmatmul.mubr.msk.bf16.gmra.mrb[24].mxu1 %vm246_vm0, %v2880_v40 }
 0x555   : > { %3093 = vmatprep.mubr.bf16.mxu1 %v7075_v16 }
 0x55c   : > { %4102 = vmatmul.mubr.msk.bf16.gmra.mrb[28].mxu1 %vm246_vm0, %v2881_v10 }
 0x55d   : > { %3103 = vmatprep.mubr.bf16.mxu1 %v7075_v16 }
 0x55f   : > { %v2530_v12 = vpop.f32.mrb[68].mxu1 }
 0x560   : > { %v2531_v27 = vpop.f32.mrb[69].mxu1 }
 0x561   : > { %v2533_v18 = vpop.f32.mrb[70].mxu1 }
 0x562   : > { %v2534_v23 = vpop.f32.mrb[71].mxu1 }
 0x564   : > { %4103 = vmatmul.mubr.msk.bf16.gmra.mrb[32].mxu1 %vm246_vm0, %v2882_v11 }
 0x565   : > { %3113 = vmatprep.mubr.bf16.mxu1 %v7075_v16 }
 0x567   : > { %v2665_v2 = vpop.f32.mrb[72].mxu1 }
 0x568   : > { %v2666_v6 = vadd.f32 %v2665_v2, %v6089_v60  ;;  %v2667_v61 = vpop.f32.mrb[73].mxu1  ;;  %v2885_v60 = vpack.c.bf16 %v2861_v39, %v2860_v53 }
 0x569   : > { %v2668_v50 = vpop.f32.mrb[74].mxu1 }
 0x56a   : > { %v2669_v35 = vadd.f32 %v2668_v50, %v6092_v24  ;;  %v2670_v56 = vpop.f32.mrb[75].mxu1  ;;  %v2862_v24 = vld [vmem:[#allocation2 + $0x122] sm:$0xff] }
 0x56b   : > { %v2886_v33 = vpack.c.bf16 %v2863_v19, %v2862_v24 }
 0x56c   : > { %4104 = vmatmul.mubr.msk.bf16.gmra.mrb[36].mxu1 %vm246_vm0, %v2883_v4 }
 0x56d   : > { %3123 = vmatprep.mubr.bf16.mxu1 %v7075_v16 }
 0x574   : > { %4105 = vmatmul.mubr.msk.bf16.gmra.mrb[40].mxu1 %vm246_vm0, %v2884_v45 }
 0x575   : > { %3133 = vmatprep.mubr.bf16.mxu1 %v7075_v16 }
 0x57c   : > { %4106 = vmatmul.mubr.msk.bf16.gmra.mrb[44].mxu1 %vm246_vm0, %v2885_v60 }
 0x57d   : > { %3143 = vmatprep.mubr.bf16.mxu1 %v7075_v16 }
 0x584   : > { %4107 = vmatmul.mubr.msk.bf16.gmra.mrb[48].mxu1 %vm246_vm0, %v2886_v33 }
 0x585   : > { %3153 = vmatprep.mubr.bf16.mxu1 %v7075_v16 }
 0x58c   : > { %4108 = vmatmul.mubr.msk.bf16.gmra.mrb[52].mxu1 %vm246_vm0, %v2887_v14 }
 0x58d   : > { %3163 = vmatprep.mubr.bf16.mxu1 %v7075_v16 }
 0x594   : > { %4109 = vmatmul.mubr.msk.bf16.gmra.mrb[56].mxu1 %vm246_vm0, %v2888_v0 }
 0x595   : > { %3173 = vmatprep.mubr.bf16.mxu1 %v7075_v16 }
 0x59c   : > { %4110 = vmatmul.mubr.msk.bf16.gmra.mrb[60].mxu1 %vm246_vm0, %v2889_v8 }
 0x59d   : > { %3183 = vmatprep.mubr.bf16.mxu1 %v7075_v16 }
 0x5a4   : > { %4111 = vmatmul.mubr.msk.bf16.gmra.mrb[64].mxu1 %vm246_vm0, %v2890_v36 }
 0x5a5   : > { %3193 = vmatprep.mubr.bf16.mxu1 %v7075_v16 }
 0x5ac   : > { %4112 = vmatmul.mubr.msk.bf16.gmra.mrb[84].mxu1 %vm246_vm0, %v2891_v3 }
 0x5ef   : > { %v2831_v44 = vpop.f32.mrb[76].mxu1 }
 0x5f0   : > { %v2832_v47 = vpop.f32.mrb[77].mxu1 }
 0x5f1   : > { %v6178_v29 = vadd.f32 %v2832_v47, %v2531_v27  ;;  %v2834_v9 = vpop.f32.mrb[78].mxu1 }
 0x5f2   : > { %v2835_v34 = vpop.f32.mrb[79].mxu1 }
 0x5f3   : > { %v6180_v59 = vadd.f32 %v2835_v34, %v2534_v23 }
 0x5f7   : > { %v3029_v5 = vpop.f32.mrb[80].mxu1 }
 0x5f8   : > { %v6182_v20 = vadd.f32 %v3029_v5, %v2666_v6  ;;  %v3031_v42 = vpop.f32.mrb[81].mxu1 }
 0x5f9   : > { %v3032_v32 = vpop.f32.mrb[82].mxu1 }
 0x5fa   : > { %v6184_v41 = vadd.f32 %v3032_v32, %v2669_v35  ;;  %v3034_v16 = vpop.f32.mrb[83].mxu1 }
 0x5ff   : > { %v6186_v58 = vpop.f32.mrb[4].mxu1 }
 0x600   : > { %3300 = vrot.lane.b32.xlu0 %v6186_v58, %s4692_s21  ;;  %v3039_v43 = vpop.f32.mrb[5].mxu1 }
 0x601   : > { %v6190_v21 = vpop.f32.mrb[6].mxu1 }
 0x602   : > { %3302 = vrot.lane.b32.xlu1 %v6190_v21, %s4692_s21  ;;  %v3042_v62 = vpop.f32.mrb[7].mxu1 }
 0x607   : > { %v6194_v31 = vpop.f32.mrb[8].mxu1 }
 0x608   : > { %3304 = vrot.lane.b32.xlu0 %v6194_v31, %s4692_s21  ;;  %v6198_v7 = vpop.f32.mrb[9].mxu1 }
 0x609   : > { %v6200_v40 = vpop.f32.mrb[10].mxu1 }
 0x60a   : > { %3306 = vrot.lane.b32.xlu1 %v6200_v40, %s4692_s21  ;;  %v6204_v63 = vpop.f32.mrb[11].mxu1 }
 0x60f   : > { %v6206_v22 = vpop.f32.mrb[12].mxu1 }
 0x610   : > { %3308 = vrot.lane.b32.xlu0 %v6206_v22, %s4692_s21  ;;  %v6210_v10 = vpop.f32.mrb[13].mxu1 }
 0x611   : > { %v6212_v12 = vpop.f32.mrb[14].mxu1 }
 0x612   : > { %3310 = vrot.lane.b32.xlu1 %v6212_v12, %s4692_s21  ;;  %v6216_v46 = vpop.f32.mrb[15].mxu1 }
 0x617   : > { %v6218_v17 = vpop.f32.mrb[16].mxu1 }
 0x618   : > { %3312 = vrot.lane.b32.xlu0 %v6218_v17, %s4692_s21  ;;  %v6222_v27 = vpop.f32.mrb[17].mxu1 }
 0x619   : > { %v6224_v18 = vpop.f32.mrb[18].mxu1 }
 0x61a   : > { %3314 = vrot.lane.b32.xlu1 %v6224_v18, %s4692_s21  ;;  %v6228_v23 = vpop.f32.mrb[19].mxu1 }
 0x61f   : > { %v6230_v11 = vpop.f32.mrb[20].mxu1 }
 0x620   : > { %3316 = vrot.lane.b32.xlu0 %v6230_v11, %s4692_s21  ;;  %v6234_v2 = vpop.f32.mrb[21].mxu1 }
 0x621   : > { %v6236_v57 = vpop.f32.mrb[22].mxu1 }
 0x622   : > { %3318 = vrot.lane.b32.xlu1 %v6236_v57, %s4692_s21  ;;  %v6240_v25 = vpop.f32.mrb[23].mxu1 }
 0x627   : > { %v6242_v6 = vpop.f32.mrb[24].mxu1 }
 0x628   : > { %3320 = vrot.lane.b32.xlu0 %v6242_v6, %s4692_s21  ;;  %v6246_v61 = vpop.f32.mrb[25].mxu1 }
 0x629   : > { %v6248_v50 = vpop.f32.mrb[26].mxu1 }
 0x62a   : > { %3322 = vrot.lane.b32.xlu1 %v6248_v50, %s4692_s21  ;;  %v6252_v35 = vpop.f32.mrb[27].mxu1 }
 0x62f   : > { %v6254_v56 = vpop.f32.mrb[28].mxu1 }
 0x630   : > { %3324 = vrot.lane.b32.xlu0 %v6254_v56, %s4692_s21  ;;  %v6258_v4 = vpop.f32.mrb[29].mxu1 }
 0x631   : > { %v6260_v30 = vpop.f32.mrb[30].mxu1 }
 0x632   : > { %3326 = vrot.lane.b32.xlu1 %v6260_v30, %s4692_s21  ;;  %v6264_v37 = vpop.f32.mrb[31].mxu1 }
 0x637   : > { %v6266_v45 = vpop.f32.mrb[32].mxu1 }
 0x638   : > { %3328 = vrot.lane.b32.xlu0 %v6266_v45, %s4692_s21  ;;  %v6270_v53 = vpop.f32.mrb[33].mxu1 }
 0x639   : > { %v6272_v39 = vpop.f32.mrb[34].mxu1 }
 0x63a   : > { %3330 = vrot.lane.b32.xlu1 %v6272_v39, %s4692_s21  ;;  %v6276_v60 = vpop.f32.mrb[35].mxu1 }
 0x63f   : > { %v6278_v24 = vpop.f32.mrb[36].mxu1 }
 0x640   : > { %3332 = vrot.lane.b32.xlu0 %v6278_v24, %s4692_s21  ;;  %v6282_v19 = vpop.f32.mrb[37].mxu1 }
 0x641   : > { %v6284_v33 = vpop.f32.mrb[38].mxu1 }
 0x642   : > { %3334 = vrot.lane.b32.xlu1 %v6284_v33, %s4692_s21  ;;  %v6288_v51 = vpop.f32.mrb[39].mxu1 }
 0x647   : > { %v6290_v38 = vpop.f32.mrb[40].mxu1 }
 0x648   : > { %3336 = vrot.lane.b32.xlu0 %v6290_v38, %s4692_s21  ;;  %v6294_v14 = vpop.f32.mrb[41].mxu1 }
 0x649   : > { %v6296_v48 = vpop.f32.mrb[42].mxu1 }
 0x64a   : > { %3338 = vrot.lane.b32.xlu1 %v6296_v48, %s4692_s21  ;;  %v6300_v15 = vpop.f32.mrb[43].mxu1 }
 0x64f   : > { %v6302_v0 = vpop.f32.mrb[44].mxu1 }
 0x650   : > { %3340 = vrot.lane.b32.xlu0 %v6302_v0, %s4692_s21  ;;  %v6306_v13 = vpop.f32.mrb[45].mxu1 }
 0x651   : > { %v6308_v28 = vpop.f32.mrb[46].mxu1 }
 0x652   : > { %3342 = vrot.lane.b32.xlu1 %v6308_v28, %s4692_s21  ;;  %v6312_v8 = vpop.f32.mrb[47].mxu1 }
 0x657   : > { %v6314_v26 = vpop.f32.mrb[48].mxu1 }
 0x658   : > { %3344 = vrot.lane.b32.xlu0 %v6314_v26, %s4692_s21  ;;  %v6318_v1 = vpop.f32.mrb[49].mxu1 }
 0x659   : > { %v6320_v36 = vpop.f32.mrb[50].mxu1 }
 0x65a   : > { %3346 = vrot.lane.b32.xlu1 %v6320_v36, %s4692_s21  ;;  %v6324_v54 = vpop.f32.mrb[51].mxu1 }
 0x65f   : > { %v6326_v52 = vpop.f32.mrb[52].mxu1 }
 0x660   : > { %7091 = vst [vmem:[#allocation13_spill] sm:$0xff] %v6326_v52  ;;  %3348 = vrot.lane.b32.xlu0 %v6326_v52, %s4692_s21  ;;  %v6330_v3 = vpop.f32.mrb[53].mxu1 }
 0x661   : > { %v6332_v44 = vpop.f32.mrb[54].mxu1 }
 0x662   : > { %7092 = vst [vmem:[#allocation19_spill] sm:$0xff] %v6332_v44  ;;  %3350 = vrot.lane.b32.xlu1 %v6332_v44, %s4692_s21  ;;  %v6336_v47 = vpop.f32.mrb[55].mxu1 }
 0x667   : > { %v6338_v9 = vpop.f32.mrb[56].mxu1 }
 0x668   : > { %7093 = vst [vmem:[#allocation14_spill] sm:$0xff] %v6338_v9  ;;  %3352 = vrot.lane.b32.xlu0 %v6338_v9, %s4692_s21  ;;  %v6342_v34 = vpop.f32.mrb[57].mxu1 }
 0x669   : > { %v6344_v5 = vpop.f32.mrb[58].mxu1 }
 0x66a   : > { %7094 = vst [vmem:[#allocation21_spill] sm:$0xff] %v6344_v5  ;;  %3354 = vrot.lane.b32.xlu1 %v6344_v5, %s4692_s21  ;;  %v6348_v42 = vpop.f32.mrb[59].mxu1 }
 0x66b   : > { %7095 = vst [vmem:[#allocation15_spill] sm:$0xff] %v6348_v42 }
 0x66f   : > { %v6350_v32 = vpop.f32.mrb[60].mxu1 }
 0x670   : > { %7096 = vst [vmem:[#allocation22_spill] sm:$0xff] %v6350_v32  ;;  %3356 = vrot.lane.b32.xlu0 %v6350_v32, %s4692_s21  ;;  %v6354_v16 = vpop.f32.mrb[61].mxu1 }
 0x671   : > { %7097 = vst [vmem:[#allocation16_spill] sm:$0xff] %v6354_v16  ;;  %v6356_v43 = vpop.f32.mrb[62].mxu1 }
 0x672   : > { %7098 = vst [vmem:[#allocation23_spill] sm:$0xff] %v6356_v43  ;;  %v3301_v62 = vpop.permute.xlu0 %3300  ;;  %3358 = vrot.lane.b32.xlu1 %v6356_v43, %s4692_s21  ;;  %v6360_v49 = vpop.f32.mrb[63].mxu1 }
 0x673   : > { %7099 = vst [vmem:[#allocation18_spill] sm:$0xff] %v6360_v49  ;;  %v3396_v55 = vadd.f32 %v3301_v62, %v6182_v20 }
 0x674   : > { %v3303_v5 = vpop.permute.xlu1 %3302 }
 0x675   : > { %v6364_v9 = vadd.f32 %v3396_v55, %v6198_v7  ;;  %v3397_v44 = vadd.f32 %v3303_v5, %v6184_v41 }
 0x677   : > { %v6368_v32 = vadd.f32 %v3397_v44, %v6204_v63  ;;  %v3185_v16 = vpop.f32.mrb[64].mxu1 }
 0x678   : > { %3360 = vrot.lane.b32.xlu0 %v3185_v16, %s4692_s21  ;;  %v6371_v52 = vpop.f32.mrb[65].mxu1 }
 0x679   : > { %7100 = vst [vmem:[#allocation20_spill] sm:$0xff] %v6371_v52  ;;  %v3189_v42 = vpop.f32.mrb[66].mxu1 }
 0x67a   : > { %v3305_v43 = vpop.permute.xlu0 %3304  ;;  %3362 = vrot.lane.b32.xlu1 %v3189_v42, %s4692_s21  ;;  %v6374_v49 = vpop.f32.mrb[67].mxu1  ;;  %s4693_s21 = smov [#allocation9]  }
 0x67b   : > { %7101 = vst [vmem:[#allocation24_spill] sm:$0xff] %v6374_v49  ;;  %v3398_v20 = vadd.f32 %v3305_v43, %v6186_v58  ;;  %s4617_s23 = sshll.u32 %s4693_s21, 4  ;;  %s4618_s23 = int_to_ptr.vmem [resolvable:$false] %s4617_s23 }
 0x67c   : > { %v3307_v55 = vpop.permute.xlu1 %3306  ;;  %s4619_s11 = scalar_lea.vmem %s4618_s23, 8192  ;;  %p4620_p7 = scmp.lt.s32.totalorder %s6947_s5, %s4618_s23 }
 0x67d   : > { %v6378_v7 = vadd.f32 %v3398_v20, %v6210_v10  ;;  %v3399_v41 = vadd.f32 %v3307_v55, %v6190_v21 }
 0x67f   : > { %v6382_v63 = vadd.f32 %v3399_v41, %v6216_v46  ;;  %v3195_v44 = vpop.f32.mrb[84].mxu1  ;;  %v3463_v41 = vsel %vm246_vm0, %v6368_v32, 0.0 }
 0x680   : > { %v3196_v5 = vpop.f32.mrb[85].mxu1 }
 0x681   : > { %v6385_v16 = vadd.f32 %v3196_v5, %v6178_v29  ;;  %v3198_v62 = vpop.f32.mrb[86].mxu1  ;;  %v3467_v44 = vsel %vm246_vm0, %v6382_v63, 0.0 }
 0x682   : > { %v3309_v42 = vpop.permute.xlu0 %3308  ;;  %v3199_v52 = vpop.f32.mrb[87].mxu1 }
 0x683   : > { %v3400_v49 = vadd.f32 %v3309_v42, %v6194_v31  ;;  %v6389_v58 = vadd.f32 %v3199_v52, %v6180_v59 }
 0x684   : > { %v3311_v10 = vpop.permute.xlu1 %3310 }
 0x685   : > { %v6392_v43 = vadd.f32 %v3400_v49, %v6222_v27  ;;  %v3401_v21 = vadd.f32 %v3311_v10, %v6200_v40  ;;  %v3462_v49 = vsel %vm246_vm0, %v6364_v9, 0.0  ;;  %v3465_v40 = vsel %vm246_vm0, %v6378_v7, 0.0 }
 0x687   : > { %v6396_v46 = vadd.f32 %v3401_v21, %v6228_v23  ;;  %v3464_v23 = vadd.f32 %v3463_v41, %v3462_v49 }
 0x68a   : > { %v3313_v20 = vpop.permute.xlu0 %3312 }
 0x68b   : > { %v3402_v29 = vadd.f32 %v3313_v20, %v6206_v22  ;;  %v3466_v22 = vadd.f32 %v3465_v40, %v3464_v23  ;;  %v3471_v20 = vsel %vm246_vm0, %v6396_v46, 0.0 }
 0x68c   : > { %v3315_v55 = vpop.permute.xlu1 %3314 }
 0x68d   : > { %v6402_v31 = vadd.f32 %v3402_v29, %v6234_v2  ;;  %v3403_v59 = vadd.f32 %v3315_v55, %v6212_v12  ;;  %v3469_v12 = vsel %vm246_vm0, %v6392_v43, 0.0  ;;  %v3468_v10 = vadd.f32 %v3467_v44, %v3466_v22 }
 0x68f   : > { %v6410_v27 = vadd.f32 %v3403_v59, %v6240_v25  ;;  %v3470_v21 = vadd.f32 %v3469_v12, %v3468_v10 }
 0x691   : > { %v3472_v41 = vadd.f32 %v3471_v20, %v3470_v21 }
 0x692   : > { %v3317_v52 = vpop.permute.xlu0 %3316 }
 0x693   : > { %v3404_v2 = vadd.f32 %v3317_v52, %v6218_v17  ;;  %v3473_v17 = vsel %vm246_vm0, %v6402_v31, 0.0 }
 0x694   : > { %v3319_v5 = vpop.permute.xlu1 %3318  ;;  %v3474_v49 = vadd.f32 %v3473_v17, %v3472_v41 }
 0x695   : > { %v6418_v62 = vadd.f32 %v3404_v2, %v6246_v61  ;;  %v3405_v42 = vadd.f32 %v3319_v5, %v6224_v18 }
 0x697   : > { %v6422_v25 = vadd.f32 %v3405_v42, %v6252_v35  ;;  %v3475_v35 = vsel %vm246_vm0, %v6410_v27, 0.0  ;;  %v3477_v23 = vsel %vm246_vm0, %v6418_v62, 0.0 }
 0x698   : > { %v3476_v22 = vadd.f32 %v3475_v35, %v3474_v49 }
 0x69a   : > { %v3321_v29 = vpop.permute.xlu0 %3320  ;;  %v3478_v44 = vadd.f32 %v3477_v23, %v3476_v22 }
 0x69b   : > { %v3406_v55 = vadd.f32 %v3321_v29, %v6230_v11 }
 0x69c   : > { %v3323_v59 = vpop.permute.xlu1 %3322 }
 0x69d   : > { %v6430_v61 = vadd.f32 %v3406_v55, %v6258_v4  ;;  %v3407_v18 = vadd.f32 %v3323_v59, %v6236_v57  ;;  %v3479_v4 = vsel %vm246_vm0, %v6422_v25, 0.0 }
 0x69e   : > { %v3480_v42 = vadd.f32 %v3479_v4, %v3478_v44 }
 0x69f   : > { %v6436_v40 = vadd.f32 %v3407_v18, %v6264_v37  ;;  %v3481_v37 = vsel %vm246_vm0, %v6430_v61, 0.0 }
 0x6a0   : > { %v3482_v10 = vadd.f32 %v3481_v37, %v3480_v42 }
 0x6a2   : > { %v3325_v52 = vpop.permute.xlu0 %3324 }
 0x6a3   : > { %v3408_v11 = vadd.f32 %v3325_v52, %v6242_v6  ;;  %v3483_v6 = vsel %vm246_vm0, %v6436_v40, 0.0 }
 0x6a4   : > { %v3327_v2 = vpop.permute.xlu1 %3326  ;;  %v3484_v55 = vadd.f32 %v3483_v6, %v3482_v10 }
 0x6a5   : > { %v6444_v57 = vadd.f32 %v3408_v11, %v6270_v53  ;;  %v3409_v5 = vadd.f32 %v3327_v2, %v6248_v50 }
 0x6a7   : > { %v6450_v12 = vadd.f32 %v3409_v5, %v6276_v60  ;;  %v3485_v53 = vsel %vm246_vm0, %v6444_v57, 0.0 }
 0x6a8   : > { %v3486_v41 = vadd.f32 %v3485_v53, %v3484_v55 }
 0x6a9   : > { %v3487_v59 = vsel %vm246_vm0, %v6450_v12, 0.0 }
 0x6aa   : > { %v3329_v21 = vpop.permute.xlu0 %3328  ;;  %v3488_v35 = vadd.f32 %v3487_v59, %v3486_v41 }
 0x6ab   : > { %v3410_v20 = vadd.f32 %v3329_v21, %v6254_v56 }
 0x6ac   : > { %v3331_v29 = vpop.permute.xlu1 %3330 }
 0x6ad   : > { %v6458_v50 = vadd.f32 %v3410_v20, %v6282_v19  ;;  %v3411_v17 = vadd.f32 %v3331_v29, %v6260_v30 }
 0x6af   : > { %v6462_v60 = vadd.f32 %v3411_v17, %v6288_v51  ;;  %v3489_v56 = vsel %vm246_vm0, %v6458_v50, 0.0 }
 0x6b0   : > { %v3490_v22 = vadd.f32 %v3489_v56, %v3488_v35 }
 0x6b1   : > { %v3491_v51 = vsel %vm246_vm0, %v6462_v60, 0.0 }
 0x6b2   : > { %v3333_v18 = vpop.permute.xlu0 %3332  ;;  %v3492_v44 = vadd.f32 %v3491_v51, %v3490_v22 }
 0x6b3   : > { %v3412_v49 = vadd.f32 %v3333_v18, %v6266_v45 }
 0x6b4   : > { %v3335_v23 = vpop.permute.xlu1 %3334 }
 0x6b5   : > { %v6470_v19 = vadd.f32 %v3412_v49, %v6294_v14  ;;  %v3413_v30 = vadd.f32 %v3335_v23, %v6272_v39 }
 0x6b7   : > { %v6476_v52 = vadd.f32 %v3413_v30, %v6300_v15  ;;  %v3493_v11 = vsel %vm246_vm0, %v6470_v19, 0.0 }
 0x6b8   : > { %v3494_v4 = vadd.f32 %v3493_v11, %v3492_v44 }
 0x6b9   : > { %v3495_v14 = vsel %vm246_vm0, %v6476_v52, 0.0 }
 0x6ba   : > { %v3337_v2 = vpop.permute.xlu0 %3336  ;;  %v3496_v10 = vadd.f32 %v3495_v14, %v3494_v4  ;;  %v7103_v14 = vld [vmem:[#allocation13_spill] sm:$0xff] }
 0x6bb   : > { %v3414_v45 = vadd.f32 %v3337_v2, %v6278_v24  ;;  %v7102_v2 = vld [vmem:[#allocation15_spill] sm:$0xff] }
 0x6bc   : > { %v3339_v5 = vpop.permute.xlu1 %3338 }
 0x6bd   : > { %v6484_v39 = vadd.f32 %v3414_v45, %v6306_v13  ;;  %v3415_v37 = vadd.f32 %v3339_v5, %v6284_v33 }
 0x6bf   : > { %v3497_v15 = vsel %vm246_vm0, %v6484_v39, 0.0  ;;  %v6490_v42 = vadd.f32 %v3415_v37, %v6312_v8 }
 0x6c0   : > { %v3498_v21 = vadd.f32 %v3497_v15, %v3496_v10  ;;  %v7104_v10 = vld [vmem:[#allocation16_spill] sm:$0xff] }
 0x6c1   : > { %v3499_v24 = vsel %vm246_vm0, %v6490_v42, 0.0 }
 0x6c2   : > { %v3341_v6 = vpop.permute.xlu0 %3340  ;;  %v3500_v53 = vadd.f32 %v3499_v24, %v3498_v21  ;;  %v7106_v24 = vld [vmem:[#allocation18_spill] sm:$0xff] }
 0x6c3   : > { %v3416_v20 = vadd.f32 %v3341_v6, %v6290_v38 }
 0x6c4   : > { %v3343_v29 = vpop.permute.xlu1 %3342 }
 0x6c5   : > { %v6496_v13 = vadd.f32 %v3416_v20, %v6318_v1  ;;  %v3417_v33 = vadd.f32 %v3343_v29, %v6296_v48 }
 0x6c7   : > { %v3501_v17 = vsel %vm246_vm0, %v6496_v13, 0.0  ;;  %v3449_v8 = vadd.f32 %v3417_v33, %v6324_v54 }
 0x6c8   : > { %v3502_v55 = vadd.f32 %v3501_v17, %v3500_v53  ;;  %v7107_v17 = vld [vmem:[#allocation14_spill] sm:$0xff] }
 0x6c9   : > { %v3503_v41 = vsel %vm246_vm0, %v3449_v8, 0.0 }
 0x6ca   : > { %v3504_v59 = vadd.f32 %v3503_v41, %v3502_v55  ;;  %v3345_v18 = vpop.permute.xlu0 %3344 }
 0x6cb   : > { %v3418_v56 = vadd.f32 %v3345_v18, %v6302_v0 }
 0x6cc   : > { %v3347_v38 = vpop.permute.xlu1 %3346 }
 0x6cd   : > { %v3450_v49 = vadd.f32 %v3418_v56, %v6330_v3  ;;  %v3419_v1 = vadd.f32 %v3347_v38, %v6308_v28  ;;  %v7109_v56 = vld [vmem:[#allocation21_spill] sm:$0xff] }
 0x6cf   : > { %v3505_v48 = vsel %vm246_vm0, %v3450_v49, 0.0  ;;  %v3451_v35 = vadd.f32 %v3419_v1, %v6336_v47 }
 0x6d0   : > { %v3506_v23 = vadd.f32 %v3505_v48, %v3504_v59  ;;  %v7108_v59 = vld [vmem:[#allocation20_spill] sm:$0xff] }
 0x6d1   : > { %v3507_v30 = vsel %vm246_vm0, %v3451_v35, 0.0  ;;  %v7110_v48 = vld [vmem:[#allocation24_spill] sm:$0xff] }
 0x6d2   : > { %v3508_v54 = vadd.f32 %v3507_v30, %v3506_v23  ;;  %v3349_v22 = vpop.permute.xlu0 %3348 }
 0x6d3   : > { %v3420_v51 = vadd.f32 %v3349_v22, %v6314_v26  ;;  %v7105_v26 = vld [vmem:[#allocation19_spill] sm:$0xff] }
 0x6d4   : > { %v3351_v11 = vpop.permute.xlu1 %3350 }
 0x6d5   : > { %v3452_v44 = vadd.f32 %v3420_v51, %v6342_v34  ;;  %v3421_v0 = vadd.f32 %v3351_v11, %v6320_v36  ;;  %v7111_v11 = vld [vmem:[#allocation22_spill] sm:$0xff] }
 0x6d7   : > { %v3509_v3 = vsel %vm246_vm0, %v3452_v44, 0.0  ;;  %v3453_v28 = vadd.f32 %v3421_v0, %v7102_v2 }
 0x6d8   : > { %v3510_v45 = vadd.f32 %v3509_v3, %v3508_v54 }
 0x6d9   : > { %v3511_v4 = vsel %vm246_vm0, %v3453_v28, 0.0 }
 0x6da   : > { %v3512_v47 = vadd.f32 %v3511_v4, %v3510_v45  ;;  %v3353_v5 = vpop.permute.xlu0 %3352  ;;  %v7112_v45 = vld [vmem:[#allocation23_spill] sm:$0xff] }
 0x6db   : > { %v3422_v37 = vadd.f32 %v3353_v5, %v7103_v14 }
 0x6dc   : > { %v3355_v15 = vpop.permute.xlu1 %3354 }
 0x6dd   : > { %v3454_v21 = vadd.f32 %v3422_v37, %v7104_v10  ;;  %v3423_v6 = vadd.f32 %v3355_v15, %v7105_v26 }
 0x6df   : > { %v3513_v34 = vsel %vm246_vm0, %v3454_v21, 0.0  ;;  %v3455_v36 = vadd.f32 %v3423_v6, %v7106_v24 }
 0x6e0   : > { %v3514_v20 = vadd.f32 %v3513_v34, %v3512_v47 }
 0x6e1   : > { %v3515_v29 = vsel %vm246_vm0, %v3455_v36, 0.0 }
 0x6e2   : > { %v3516_v33 = vadd.f32 %v3515_v29, %v3514_v20  ;;  %v3357_v53 = vpop.permute.xlu0 %3356 }
 0x6e3   : > { %v3424_v55 = vadd.f32 %v3357_v53, %v7107_v17 }
 0x6e4   : > { %v3359_v41 = vpop.permute.xlu1 %3358 }
 0x6e5   : > { %v3456_v18 = vadd.f32 %v3424_v55, %v7108_v59  ;;  %v3425_v38 = vadd.f32 %v3359_v41, %v7109_v56 }
 0x6e7   : > { %v3517_v1 = vsel %vm246_vm0, %v3456_v18, 0.0  ;;  %v3457_v23 = vadd.f32 %v3425_v38, %v7110_v48 }
 0x6e8   : > { %v3518_v30 = vadd.f32 %v3517_v1, %v3516_v33 }
 0x6e9   : > { %v3519_v54 = vsel %vm246_vm0, %v3457_v23, 0.0 }
 0x6ea   : > { %v3520_v22 = vadd.f32 %v3519_v54, %v3518_v30  ;;  %v3361_v51 = vpop.permute.xlu0 %3360 }
 0x6eb   : > { %v3426_v0 = vadd.f32 %v3361_v51, %v7111_v11 }
 0x6ec   : > { %v3363_v3 = vpop.permute.xlu1 %3362 }
 0x6ed   : > { %v3458_v2 = vadd.f32 %v3426_v0, %v6385_v16  ;;  %v3427_v4 = vadd.f32 %v3363_v3, %v7112_v45 }
 0x6ef   : > { %v3521_v47 = vsel %vm246_vm0, %v3458_v2, 0.0  ;;  %v3459_v5 = vadd.f32 %v3427_v4, %v6389_v58 }
 0x6f0   : > { %v3522_v14 = vadd.f32 %v3521_v47, %v3520_v22 }
 0x6f1   : > { %v3523_v37 = vsel %vm246_vm0, %v3459_v5, 0.0 }
 0x6f2   : > { %v3524_v15 = vadd.f32 %v3523_v37, %v3522_v14 }
 0x6f4   : > { %v3525_v10 = vrot.slane %v3524_v15, 4 }
 0x6f6   : > { %v3526_v26 = vadd.f32 %v3525_v10, %v3524_v15 }
 0x6f8   : > { %v3527_v6 = vrot.slane %v3526_v26, 2 }
 0x6fa   : > { %v3528_v34 = vadd.f32 %v3527_v6, %v3526_v26 }
 0x6fc   : > { %v3529_v24 = vrot.slane %v3528_v34, 1 }
 0x6fe   : > { %v3530_v20 = vadd.f32 %v3529_v24, %v3528_v34 }
 0x700   : > { %v6533_v29 = vmul.f32 0.00390625, %v3530_v20 }
 0x702   : > { %v6537_v16 = vsub.f32 %v6496_v13, %v6533_v29  ;;  %v6540_v33 = vsub.f32 %v3449_v8, %v6533_v29  ;;  %v6543_v58 = vsub.f32 %v3450_v49, %v6533_v29  ;;  %v6546_v53 = vsub.f32 %v3451_v35, %v6533_v29 }
 0x703   : > { %v6549_v17 = vsub.f32 %v3452_v44, %v6533_v29  ;;  %v6552_v55 = vsub.f32 %v3453_v28, %v6533_v29  ;;  %v6555_v41 = vsub.f32 %v3454_v21, %v6533_v29  ;;  %v6558_v13 = vsub.f32 %v3455_v36, %v6533_v29 }
 0x704   : > { %v6561_v8 = vsub.f32 %v3456_v18, %v6533_v29  ;;  %v6564_v49 = vsub.f32 %v3457_v23, %v6533_v29  ;;  %v6567_v35 = vsub.f32 %v3458_v2, %v6533_v29  ;;  %v6570_v44 = vsub.f32 %v3459_v5, %v6533_v29 }
 0x705   : > { %v6574_v28 = vsub.f32 %v6364_v9, %v6533_v29  ;;  %v6578_v21 = vsub.f32 %v6368_v32, %v6533_v29  ;;  %v6582_v36 = vsub.f32 %v6378_v7, %v6533_v29  ;;  %v6586_v59 = vsub.f32 %v6382_v63, %v6533_v29 }
 0x706   : > { %v6594_v9 = vsub.f32 %v6392_v43, %v6533_v29  ;;  %v6600_v7 = vsub.f32 %v6396_v46, %v6533_v29  ;;  %v6608_v23 = vsub.f32 %v6402_v31, %v6533_v29  ;;  %v6615_v46 = vsub.f32 %v6410_v27, %v6533_v29 }
 0x707   : > { %v3564_v18 = vmul.f32 %v6574_v28, %v6574_v28  ;;  %v3565_v56 = vmul.f32 %v6578_v21, %v6578_v21  ;;  %v3566_v32 = vmul.f32 %v6582_v36, %v6582_v36  ;;  %v3567_v63 = vmul.f32 %v6586_v59, %v6586_v59 }
 0x708   : > { %v3568_v43 = vmul.f32 %v6594_v9, %v6594_v9  ;;  %v3569_v22 = vmul.f32 %v6600_v7, %v6600_v7  ;;  %v6622_v31 = vsub.f32 %v6418_v62, %v6533_v29  ;;  %v3570_v0 = vmul.f32 %v6608_v23, %v6608_v23 }
 0x709   : > { %v3596_v38 = vsel %vm246_vm0, %v3564_v18, 0.0  ;;  %v3597_v1 = vsel %vm246_vm0, %v3565_v56, 0.0  ;;  %v3599_v30 = vsel %vm246_vm0, %v3566_v32, 0.0  ;;  %v3601_v51 = vsel %vm246_vm0, %v3567_v63, 0.0 }
 0x70a   : > { %v3598_v48 = vadd.f32 %v3597_v1, %v3596_v38  ;;  %v3603_v3 = vsel %vm246_vm0, %v3568_v43, 0.0  ;;  %v6629_v27 = vsub.f32 %v6422_v25, %v6533_v29  ;;  %v3571_v45 = vmul.f32 %v6615_v46, %v6615_v46 }
 0x70b   : > { %v3605_v4 = vsel %vm246_vm0, %v3569_v22, 0.0  ;;  %v6636_v62 = vsub.f32 %v6430_v61, %v6533_v29  ;;  %v3572_v5 = vmul.f32 %v6622_v31, %v6622_v31  ;;  %v3607_v14 = vsel %vm246_vm0, %v3570_v0, 0.0 }
 0x70c   : > { %v3600_v54 = vadd.f32 %v3599_v30, %v3598_v48  ;;  %v6643_v25 = vsub.f32 %v6436_v40, %v6533_v29  ;;  %v3573_v15 = vmul.f32 %v6629_v27, %v6629_v27  ;;  %v3609_v10 = vsel %vm246_vm0, %v3571_v45, 0.0 }
 0x70d   : > { %v6650_v61 = vsub.f32 %v6444_v57, %v6533_v29  ;;  %v3574_v6 = vmul.f32 %v6636_v62, %v6636_v62  ;;  %v3611_v34 = vsel %vm246_vm0, %v3572_v5, 0.0  ;;  %v6657_v40 = vsub.f32 %v6450_v12, %v6533_v29 }
 0x70e   : > { %v3602_v11 = vadd.f32 %v3601_v51, %v3600_v54  ;;  %v3575_v20 = vmul.f32 %v6643_v25, %v6643_v25  ;;  %v3613_v18 = vsel %vm246_vm0, %v3573_v15, 0.0  ;;  %v6664_v57 = vsub.f32 %v6458_v50, %v6533_v29 }
 0x70f   : > { %v3576_v32 = vmul.f32 %v6650_v61, %v6650_v61  ;;  %v3615_v63 = vsel %vm246_vm0, %v3574_v6, 0.0  ;;  %v6671_v12 = vsub.f32 %v6462_v60, %v6533_v29  ;;  %v3577_v1 = vmul.f32 %v6657_v40, %v6657_v40 }
 0x710   : > { %v3604_v2 = vadd.f32 %v3603_v3, %v3602_v11  ;;  %v3617_v48 = vsel %vm246_vm0, %v3575_v20, 0.0  ;;  %v6678_v50 = vsub.f32 %v6470_v19, %v6533_v29  ;;  %v3578_v30 = vmul.f32 %v6664_v57, %v6664_v57 }
 0x711   : > { %v3619_v54 = vsel %vm246_vm0, %v3576_v32, 0.0  ;;  %v6685_v60 = vsub.f32 %v6476_v52, %v6533_v29  ;;  %v3579_v51 = vmul.f32 %v6671_v12, %v6671_v12  ;;  %v3621_v11 = vsel %vm246_vm0, %v3577_v1, 0.0 }
 0x712   : > { %v3606_v47 = vadd.f32 %v3605_v4, %v3604_v2  ;;  %v6692_v19 = vsub.f32 %v6484_v39, %v6533_v29  ;;  %v3580_v3 = vmul.f32 %v6678_v50, %v6678_v50  ;;  %v3623_v2 = vsel %vm246_vm0, %v3578_v30, 0.0 }
 0x713   : > { %v6699_v52 = vsub.f32 %v6490_v42, %v6533_v29  ;;  %v3581_v4 = vmul.f32 %v6685_v60, %v6685_v60  ;;  %v3584_v42 = vmul.f32 %v6537_v16, %v6537_v16 }
 0x714   : > { %v3608_v37 = vadd.f32 %v3607_v14, %v3606_v47  ;;  %v3625_v47 = vsel %vm246_vm0, %v3579_v51, 0.0  ;;  %v3582_v39 = vmul.f32 %v6692_v19, %v6692_v19  ;;  %v3627_v14 = vsel %vm246_vm0, %v3580_v3, 0.0 }
 0x715   : > { %v3583_v15 = vmul.f32 %v6699_v52, %v6699_v52 }
 0x716   : > { %v3610_v26 = vadd.f32 %v3609_v10, %v3608_v37  ;;  %v3629_v10 = vsel %vm246_vm0, %v3581_v4, 0.0  ;;  %v3631_v29 = vsel %vm246_vm0, %v3582_v39, 0.0 }
 0x718   : > { %v3612_v24 = vadd.f32 %v3611_v34, %v3610_v26  ;;  %v3585_v34 = vmul.f32 %v6540_v33, %v6540_v33 }
 0x71a   : > { %v3614_v56 = vadd.f32 %v3613_v18, %v3612_v24  ;;  %v3633_v24 = vsel %vm246_vm0, %v3583_v15, 0.0  ;;  %v3586_v18 = vmul.f32 %v6543_v58, %v6543_v58 }
 0x71c   : > { %v3616_v38 = vadd.f32 %v3615_v63, %v3614_v56  ;;  %v3635_v56 = vsel %vm246_vm0, %v3584_v42, 0.0  ;;  %v3587_v63 = vmul.f32 %v6546_v53, %v6546_v53 }
 0x71e   : > { %v3618_v43 = vadd.f32 %v3617_v48, %v3616_v38  ;;  %v3637_v38 = vsel %vm246_vm0, %v3585_v34, 0.0  ;;  %v3588_v48 = vmul.f32 %v6549_v17, %v6549_v17 }
 0x720   : > { %v3620_v22 = vadd.f32 %v3619_v54, %v3618_v43  ;;  %v3639_v43 = vsel %vm246_vm0, %v3586_v18, 0.0  ;;  %v3589_v54 = vmul.f32 %v6552_v55, %v6552_v55 }
 0x722   : > { %v3622_v0 = vadd.f32 %v3621_v11, %v3620_v22  ;;  %v3641_v22 = vsel %vm246_vm0, %v3587_v63, 0.0  ;;  %v3590_v11 = vmul.f32 %v6555_v41, %v6555_v41 }
 0x724   : > { %v3624_v45 = vadd.f32 %v3623_v2, %v3622_v0  ;;  %v3643_v0 = vsel %vm246_vm0, %v3588_v48, 0.0  ;;  %v3591_v2 = vmul.f32 %v6558_v13, %v6558_v13 }
 0x726   : > { %v3626_v5 = vadd.f32 %v3625_v47, %v3624_v45  ;;  %v3645_v45 = vsel %vm246_vm0, %v3589_v54, 0.0  ;;  %v3592_v47 = vmul.f32 %v6561_v8, %v6561_v8 }
 0x728   : > { %v3628_v37 = vadd.f32 %v3627_v14, %v3626_v5  ;;  %v3647_v5 = vsel %vm246_vm0, %v3590_v11, 0.0  ;;  %v3593_v14 = vmul.f32 %v6564_v49, %v6564_v49 }
 0x72a   : > { %v3630_v26 = vadd.f32 %v3629_v10, %v3628_v37  ;;  %v3649_v37 = vsel %vm246_vm0, %v3591_v2, 0.0  ;;  %v3594_v10 = vmul.f32 %v6567_v35, %v6567_v35 }
 0x72c   : > { %v3632_v6 = vadd.f32 %v3631_v29, %v3630_v26  ;;  %v3651_v26 = vsel %vm246_vm0, %v3592_v47, 0.0  ;;  %v3595_v29 = vmul.f32 %v6570_v44, %v6570_v44 }
 0x72e   : > { %v3634_v20 = vadd.f32 %v3633_v24, %v3632_v6  ;;  %v3653_v6 = vsel %vm246_vm0, %v3593_v14, 0.0  ;;  %v3655_v24 = vsel %vm246_vm0, %v3594_v10, 0.0  ;;  %v3657_v18 = vsel %vm246_vm0, %v3595_v29, 0.0  ;;  %v3772_v14 = vld [vmem:[%s4908_s25 + $0xf8] sm:$0xff] }
 0x730   : > { %v3636_v32 = vadd.f32 %v3635_v56, %v3634_v20 }
 0x732   : > { %v3638_v1 = vadd.f32 %v3637_v38, %v3636_v32 }
 0x734   : > { %v3640_v30 = vadd.f32 %v3639_v43, %v3638_v1 }
 0x736   : > { %v3642_v51 = vadd.f32 %v3641_v22, %v3640_v30  ;;  %v3460_v22 = vld [vmem:[%s7022_s3 + $0x2] sm:$0x1] }
 0x738   : > { %v3644_v3 = vadd.f32 %v3643_v0, %v3642_v51  ;;  %v7113_v0 = vld [vmem:[#allocation17_spill] sm:$0xff] }
 0x73a   : > { %v3646_v4 = vadd.f32 %v3645_v45, %v3644_v3  ;;  %v7114_v3 = vsub.s32 0, %v7113_v0  ;;  %v6756_v45 = vld [vmem:[%s7022_s3 + $0x3] ss:$0 sm:$0xff]  ;;  %v3748_v0 = vld [vmem:[%s4908_s25 + $0x38] sm:$0xff] }
 0x73c   : > { %v3648_v39 = vadd.f32 %v3647_v5, %v3646_v4 }
 0x73e   : > { %v3650_v15 = vadd.f32 %v3649_v37, %v3648_v39 }
 0x740   : > { %v3652_v42 = vadd.f32 %v3651_v26, %v3650_v15 }
 0x742   : > { %v3654_v34 = vadd.f32 %v3653_v6, %v3652_v42 }
 0x744   : > { %v3656_v20 = vadd.f32 %v3655_v24, %v3654_v34  ;;  %v3741_v24 = vld [vmem:[%s4908_s25] sm:$0xff] }
 0x746   : > { %v3658_v56 = vadd.f32 %v3657_v18, %v3656_v20  ;;  %v3742_v20 = vld [vmem:[%s4908_s25 + $0x8] sm:$0xff]  ;;  %v3743_v18 = vld [vmem:[%s4908_s25 + $0x10] sm:$0xff] }
 0x748   : > { %v3659_v32 = vrot.slane %v3658_v56, 4 }
 0x74a   : > { %v3660_v63 = vadd.f32 %v3659_v32, %v3658_v56 }
 0x74c   : > { %v3661_v38 = vrot.slane %v3660_v63, 2 }
 0x74e   : > { %v3662_v1 = vadd.f32 %v3661_v38, %v3660_v63 }
 0x750   : > { %v3663_v48 = vrot.slane %v3662_v1, 1 }
 0x752   : > { %v3664_v43 = vadd.f32 %v3663_v48, %v3662_v1  ;;  %v3744_v1 = vld [vmem:[%s4908_s25 + $0x18] sm:$0xff]  ;;  %v3745_v48 = vld [vmem:[%s4908_s25 + $0x20] sm:$0xff] }
 0x754   : > { %v3665_v30 = vmul.f32 0.00390625, %v3664_v43  ;;  %v3746_v43 = vld [vmem:[%s4908_s25 + $0x28] sm:$0xff] }
 0x756   : > { %v3666_v54 = vadd.f32 1e-05, %v3665_v30  ;;  %v3747_v30 = vld [vmem:[%s4908_s25 + $0x30] sm:$0xff] }
 0x758   : > { %4525 = vrsqrt.f32 %v3666_v54 }
 0x762   : > { %v4526_v51 = vpop.eup %4525 }
 0x763   : > { %v3668_v11 = vmul.f32 %v4526_v51, %v3460_v22 }
 0x765   : > { %v3672_v2 = vrot.slane %v3668_v11, %v7114_v3  ;;  %v3749_v3 = vld [vmem:[%s4908_s25 + $0x40] sm:$0xff] }
 0x767   : > { %v3704_v4 = vmul.f32 %v3672_v2, %v6570_v44  ;;  %v3673_v47 = vmul.f32 %v3672_v2, %v6574_v28  ;;  %v3674_v5 = vmul.f32 %v3672_v2, %v6578_v21  ;;  %v3675_v39 = vmul.f32 %v3672_v2, %v6582_v36 }
 0x768   : > { %v3676_v37 = vmul.f32 %v3672_v2, %v6586_v59  ;;  %v3677_v15 = vmul.f32 %v3672_v2, %v6594_v9  ;;  %v3678_v10 = vmul.f32 %v3672_v2, %v6600_v7  ;;  %v3679_v26 = vmul.f32 %v3672_v2, %v6608_v23 }
 0x769   : > { %v3740_v42 = vadd.f32 %v6756_v45, %v3704_v4  ;;  %v3680_v44 = vmul.f32 %v3672_v2, %v6615_v46  ;;  %v3681_v28 = vmul.f32 %v3672_v2, %v6622_v31  ;;  %v3682_v21 = vmul.f32 %v3672_v2, %v6629_v27 }
 0x76a   : > { %v3683_v36 = vmul.f32 %v3672_v2, %v6636_v62  ;;  %v3684_v29 = vmul.f32 %v3672_v2, %v6643_v25  ;;  %v3685_v59 = vmul.f32 %v3672_v2, %v6650_v61  ;;  %v3686_v9 = vmul.f32 %v3672_v2, %v6657_v40 }
 0x76b   : > { %v3804_v7 = vadd.f32 %v3772_v14, %v3740_v42  ;;  %v3687_v23 = vmul.f32 %v3672_v2, %v6664_v57  ;;  %v3688_v6 = vmul.f32 %v3672_v2, %v6671_v12  ;;  %v3689_v34 = vmul.f32 %v3672_v2, %v6678_v50  ;;  %v3751_v14 = vld [vmem:[%s4908_s25 + $0x50] sm:$0xff] }
 0x76c   : > { %v3690_v46 = vmul.f32 %v3672_v2, %v6685_v60  ;;  %v3691_v31 = vmul.f32 %v3672_v2, %v6692_v19  ;;  %v3692_v27 = vmul.f32 %v3672_v2, %v6699_v52  ;;  %v3693_v62 = vmul.f32 %v3672_v2, %v6537_v16 }
 0x76d   : > { %3836 = vst.msk [vmem:[%s6784_s20 + $0xf8] sm:$0xff] %vm246_vm0, %v3804_v7  ;;  %v3694_v25 = vmul.f32 %v3672_v2, %v6540_v33  ;;  %v3695_v61 = vmul.f32 %v3672_v2, %v6543_v58  ;;  %v3696_v40 = vmul.f32 %v3672_v2, %v6546_v53  ;;  %v3697_v57 = vmul.f32 %v3672_v2, %v6549_v17 }
 0x76e   : > { %v3698_v12 = vmul.f32 %v3672_v2, %v6552_v55  ;;  %v3699_v50 = vmul.f32 %v3672_v2, %v6555_v41  ;;  %v3700_v16 = vmul.f32 %v3672_v2, %v6558_v13  ;;  %v3701_v60 = vmul.f32 %v3672_v2, %v6561_v8 }
 0x76f   : > { %v3702_v19 = vmul.f32 %v3672_v2, %v6564_v49  ;;  %v3703_v33 = vmul.f32 %v3672_v2, %v6567_v35  ;;  %v3709_v58 = vadd.f32 %v6756_v45, %v3673_v47  ;;  %v3710_v53 = vadd.f32 %v6756_v45, %v3674_v5  ;;  %v3750_v2 = vld [vmem:[%s4908_s25 + $0x48] sm:$0xff] }
 0x770   : > { %v3711_v17 = vadd.f32 %v6756_v45, %v3675_v39  ;;  %v3712_v55 = vadd.f32 %v6756_v45, %v3676_v37  ;;  %v3713_v41 = vadd.f32 %v6756_v45, %v3677_v15  ;;  %v3714_v13 = vadd.f32 %v6756_v45, %v3678_v10  ;;  %v3752_v37 = vld [vmem:[%s4908_s25 + $0x58] sm:$0xff]  ;;  %v3753_v15 = vld [vmem:[%s4908_s25 + $0x60] sm:$0xff] }
 0x771   : > { %v3715_v8 = vadd.f32 %v6756_v45, %v3679_v26  ;;  %v3716_v49 = vadd.f32 %v6756_v45, %v3680_v44  ;;  %v3717_v35 = vadd.f32 %v6756_v45, %v3681_v28  ;;  %v3718_v52 = vadd.f32 %v6756_v45, %v3682_v21  ;;  %v3754_v28 = vld [vmem:[%s4908_s25 + $0x68] sm:$0xff]  ;;  %v3755_v21 = vld [vmem:[%s4908_s25 + $0x70] sm:$0xff] }
 0x772   : > { %v3719_v56 = vadd.f32 %v6756_v45, %v3683_v36  ;;  %v3720_v32 = vadd.f32 %v6756_v45, %v3684_v29  ;;  %v3721_v63 = vadd.f32 %v6756_v45, %v3685_v59  ;;  %v3722_v38 = vadd.f32 %v6756_v45, %v3686_v9  ;;  %v3756_v36 = vld [vmem:[%s4908_s25 + $0x78] sm:$0xff] }
 0x773   : > { %v3723_v54 = vadd.f32 %v6756_v45, %v3687_v23  ;;  %v6821_v22 = vadd.f32 %v6756_v45, %v3688_v6  ;;  %v6824_v51 = vadd.f32 %v6756_v45, %v3689_v34  ;;  %v6827_v11 = vadd.f32 %v6756_v45, %v3690_v46  ;;  %v3757_v23 = vld [vmem:[%s4908_s25 + $0x80] sm:$0xff]  ;;  %v3758_v6 = vld [vmem:[%s4908_s25 + $0x88] sm:$0xff]  ;;  %v3759_v34 = vld [vmem:[%s4908_s25 + $0x90] sm:$0xff] }
 0x774   : > { %v3727_v4 = vadd.f32 %v6756_v45, %v3691_v31  ;;  %v6834_v47 = vadd.f32 %v6756_v45, %v3692_v27  ;;  %v6837_v5 = vadd.f32 %v6756_v45, %v3693_v62  ;;  %v6840_v39 = vadd.f32 %v6756_v45, %v3694_v25  ;;  %v3760_v25 = vld [vmem:[%s4908_s25 + $0x98] sm:$0xff] }
 0x775   : > { %v3731_v10 = vadd.f32 %v6756_v45, %v3695_v61  ;;  %v6847_v26 = vadd.f32 %v6756_v45, %v3696_v40  ;;  %v6850_v42 = vadd.f32 %v6756_v45, %v3697_v57  ;;  %v6853_v44 = vadd.f32 %v6756_v45, %v3698_v12  ;;  %v3761_v61 = vld [vmem:[%s4908_s25 + $0xa0] sm:$0xff]  ;;  %v3762_v40 = vld [vmem:[%s4908_s25 + $0xa8] sm:$0xff] }
 0x776   : > { %v6859_v29 = vadd.f32 %v6756_v45, %v3699_v50  ;;  %v6862_v59 = vadd.f32 %v6756_v45, %v3700_v16  ;;  %v6865_v9 = vadd.f32 %v6756_v45, %v3701_v60  ;;  %v6868_v7 = vadd.f32 %v6756_v45, %v3702_v19  ;;  %v3763_v60 = vld [vmem:[%s4908_s25 + $0xb0] sm:$0xff]  ;;  %v3764_v19 = vld [vmem:[%s4908_s25 + $0xb8] sm:$0xff] }
 0x777   : > { %v6874_v46 = vadd.f32 %v6756_v45, %v3703_v33  ;;  %v3773_v31 = vadd.f32 %v3741_v24, %v3709_v58  ;;  %v3774_v27 = vadd.f32 %v3742_v20, %v3710_v53  ;;  %v3775_v62 = vadd.f32 %v3743_v18, %v3711_v17  ;;  %v3765_v45 = vld [vmem:[%s4908_s25 + $0xc0] sm:$0xff]  ;;  %v3770_v20 = vld [vmem:[%s4908_s25 + $0xe8] sm:$0xff]  ;;  %v3771_v18 = vld [vmem:[%s4908_s25 + $0xf0] sm:$0xff] }
 0x778   : > { %v3776_v57 = vadd.f32 %v3744_v1, %v3712_v55  ;;  %v3777_v12 = vadd.f32 %v3745_v48, %v3713_v41  ;;  %v3778_v50 = vadd.f32 %v3746_v43, %v3714_v13  ;;  %v3779_v16 = vadd.f32 %v3747_v30, %v3715_v8  ;;  %v3766_v55 = vld [vmem:[%s4908_s25 + $0xc8] sm:$0xff]  ;;  %v3767_v41 = vld [vmem:[%s4908_s25 + $0xd0] sm:$0xff]  ;;  %v3768_v13 = vld [vmem:[%s4908_s25 + $0xd8] sm:$0xff] }
 0x779   : > { %v3780_v33 = vadd.f32 %v3748_v0, %v3716_v49  ;;  %v3781_v58 = vadd.f32 %v3749_v3, %v3717_v35  ;;  %v3782_v53 = vadd.f32 %v3750_v2, %v3718_v52  ;;  %v3783_v17 = vadd.f32 %v3751_v14, %v3719_v56  ;;  %3805 = vst.msk [vmem:[%s6784_s20] sm:$0xff] %vm246_vm0, %v3773_v31  ;;  %v3769_v24 = vld [vmem:[%s4908_s25 + $0xe0] sm:$0xff]  ;;  %s4613_s25 = scalar_lea.vmem %s6947_s5, 4096 }
 0x77a   : > { %3806 = vst.msk [vmem:[%s6784_s20 + $0x8] sm:$0xff] %vm246_vm0, %v3774_v27  ;;  %3807 = vst.msk [vmem:[%s6784_s20 + $0x10] sm:$0xff] %vm246_vm0, %v3775_v62  ;;  %v3784_v8 = vadd.f32 %v3752_v37, %v3720_v32  ;;  %v3785_v49 = vadd.f32 %v3753_v15, %v3721_v63  ;;  %v3786_v35 = vadd.f32 %v3754_v28, %v3722_v38  ;;  %p4614_p11 = scmp.ne.s32.totalorder %s6947_s5, %s4613_s25  ;;  %p4621_p9 = scmp.lt.s32.totalorder %s4619_s11, %s4613_s25 }
 0x77b   : > { %v3787_v52 = vadd.f32 %v3755_v21, %v3723_v54  ;;  %3808 = vst.msk [vmem:[%s6784_s20 + $0x18] sm:$0xff] %vm246_vm0, %v3776_v57  ;;  %3809 = vst.msk [vmem:[%s6784_s20 + $0x20] sm:$0xff] %vm246_vm0, %v3777_v12  ;;  %v3788_v56 = vadd.f32 %v3756_v36, %v6821_v22  ;;  %v3789_v32 = vadd.f32 %v3757_v23, %v6824_v51 }
 0x77c   : > { %3810 = vst.msk [vmem:[%s6784_s20 + $0x28] sm:$0xff] %vm246_vm0, %v3778_v50  ;;  %3811 = vst.msk [vmem:[%s6784_s20 + $0x30] sm:$0xff] %vm246_vm0, %v3779_v16  ;;  %v3790_v63 = vadd.f32 %v3758_v6, %v6827_v11  ;;  %v3791_v38 = vadd.f32 %v3759_v34, %v3727_v4  ;;  %v3792_v1 = vadd.f32 %v3760_v25, %v6834_v47  ;;  %p4615_p2 = pnand %p4614_p11, %p7115_p0  ;;  %p4622_p12 = por %p4621_p9, %p4620_p7 }
 0x77d   : > { %3812 = vst.msk [vmem:[%s6784_s20 + $0x38] sm:$0xff] %vm246_vm0, %v3780_v33  ;;  %3813 = vst.msk [vmem:[%s6784_s20 + $0x40] sm:$0xff] %vm246_vm0, %v3781_v58  ;;  %v3793_v48 = vadd.f32 %v3761_v61, %v6837_v5  ;;  %v3794_v43 = vadd.f32 %v3762_v40, %v6840_v39  ;;  %v3795_v30 = vadd.f32 %v3763_v60, %v3731_v10 }
 0x77e   : > { %3814 = vst.msk [vmem:[%s6784_s20 + $0x48] sm:$0xff] %vm246_vm0, %v3782_v53  ;;  %3815 = vst.msk [vmem:[%s6784_s20 + $0x50] sm:$0xff] %vm246_vm0, %v3783_v17  ;;  %v3796_v54 = vadd.f32 %v3764_v19, %v6847_v26  ;;  %v3797_v22 = vadd.f32 %v3765_v45, %v6850_v42  ;;  %v3798_v51 = vadd.f32 %v3766_v55, %v6853_v44  ;;  %p4616_p3 = pneg %p4615_p2 }
 0x77f   : > { %3816 = vst.msk [vmem:[%s6784_s20 + $0x58] sm:$0xff] %vm246_vm0, %v3784_v8  ;;  %3817 = vst.msk [vmem:[%s6784_s20 + $0x60] sm:$0xff] %vm246_vm0, %v3785_v49  ;;  %v3799_v11 = vadd.f32 %v3767_v41, %v6859_v29  ;;  %v3800_v0 = vadd.f32 %v3768_v13, %v6862_v59  ;;  %v3801_v3 = vadd.f32 %v3769_v24, %v6865_v9 }
 0x780   : > { %3818 = vst.msk [vmem:[%s6784_s20 + $0x68] sm:$0xff] %vm246_vm0, %v3786_v35  ;;  %3819 = vst.msk [vmem:[%s6784_s20 + $0x70] sm:$0xff] %vm246_vm0, %v3787_v52  ;;  %v3802_v2 = vadd.f32 %v3770_v20, %v6868_v7  ;;  %v3803_v4 = vadd.f32 %v3771_v18, %v6874_v46  ;;  %p4623_p1 = pnand %p4622_p12, %p4616_p3 }
 0x781   : > { %3820 = vst.msk [vmem:[%s6784_s20 + $0x78] sm:$0xff] %vm246_vm0, %v3788_v56  ;;  %3821 = vst.msk [vmem:[%s6784_s20 + $0x80] sm:$0xff] %vm246_vm0, %v3789_v32 }
 0x782   : > { %3822 = vst.msk [vmem:[%s6784_s20 + $0x88] sm:$0xff] %vm246_vm0, %v3790_v63  ;;  %3823 = vst.msk [vmem:[%s6784_s20 + $0x90] sm:$0xff] %vm246_vm0, %v3791_v38 }
 0x783   : > { %3824 = vst.msk [vmem:[%s6784_s20 + $0x98] sm:$0xff] %vm246_vm0, %v3792_v1  ;;  %3825 = vst.msk [vmem:[%s6784_s20 + $0xa0] sm:$0xff] %vm246_vm0, %v3793_v48 }
 0x784   : > { %3826 = vst.msk [vmem:[%s6784_s20 + $0xa8] sm:$0xff] %vm246_vm0, %v3794_v43  ;;  %3827 = vst.msk [vmem:[%s6784_s20 + $0xb0] sm:$0xff] %vm246_vm0, %v3795_v30 }
 0x785   : > { %3828 = vst.msk [vmem:[%s6784_s20 + $0xb8] sm:$0xff] %vm246_vm0, %v3796_v54  ;;  %3829 = vst.msk [vmem:[%s6784_s20 + $0xc0] sm:$0xff] %vm246_vm0, %v3797_v22 }
 0x786   : > { %3830 = vst.msk [vmem:[%s6784_s20 + $0xc8] sm:$0xff] %vm246_vm0, %v3798_v51  ;;  %3831 = vst.msk [vmem:[%s6784_s20 + $0xd0] sm:$0xff] %vm246_vm0, %v3799_v11 }
 0x787   : > { %3832 = vst.msk [vmem:[%s6784_s20 + $0xd8] sm:$0xff] %vm246_vm0, %v3800_v0  ;;  %3833 = vst.msk [vmem:[%s6784_s20 + $0xe0] sm:$0xff] %vm246_vm0, %v3801_v3 }
 0x788   : > { %3834 = vst.msk [vmem:[%s6784_s20 + $0xe8] sm:$0xff] %vm246_vm0, %v3802_v2  ;;  %3835 = vst.msk [vmem:[%s6784_s20 + $0xf0] sm:$0xff] %vm246_vm0, %v3803_v4 }
 0x789   : > { %4626 = shalt.err (!%p4623_p1)
}
 0x78a   : > { %s4627_s12 = scalar_lea.hbm %s6943_s24, 4096  ;;  %s4631_s7 = scalar_lea.hbm %s7023_s4, 8192 }
 0x78b   : > { %p4628_p13 = scmp.ne.s32.totalorder %s6943_s24, %s4627_s12  ;;  %p4632_p4 = scmp.lt.u32.totalorder %s6943_s24, %s7023_s4 }
 0x78c   : > { %p4633_p5 = scmp.lt.u32.totalorder %s4631_s7, %s4627_s12  ;;  %p4635_p11 = scmp.lt.u32.totalorder %s4627_s12, %s6943_s24 }
 0x78d   : > { %p4629_p6 = pnand %p4628_p13, %p7115_p0 }
 0x78e   : > { %p4634_p8 = por %p4633_p5, %p4632_p4 }
 0x78f   : > { %p4630_p10 = pneg %p4629_p6 }
 0x790   : > { %p4636_p2 = por %p4635_p11, %p4634_p8 }
 0x792   : > { %p4637_p3 = pnand %p4636_p2, %p4630_p10 }
 0x794   : > { %4640 = shalt.err (!%p4637_p3)
}
 0x795   : > { %s4694_s20 = smov 128   ;;  %s4695_s29 = smov 8  }
 0x796   : > { %4387 = dma.vmem_to_hbm [thread:$0]  (%p7115_p0), %s6947_s5, 4096, %s6943_s24, %s3838_s19, %s4694_s20, %s4694_s20, %s4695_s29  }
 0x797 PF: > { %s3866_s9 = sand.u32 1, %s4671_s15   ;;  %p7116_p7 = scmp.ne.s32.totalorder %s7044_s22, 0 }
 0x798   : > { %p7117_p9 = scmp.ge.s32.totalorder %s4683_s18, 2  ;;  %s3867_s10 = scalar_lea.sflag [#allocation5], %s3866_s9 }
 0x79a   : > { %p4401_p12 = pnand %p7117_p9, %p7116_p7 }
 0x79c   : > { %4666 = dma.done.wait (!%p4401_p12), %s3867_s10, 4096  }
 0x79d   : > { %4668 = vsyncadd (!%p4401_p12), %s3867_s10, 4294963200  ;;  %p18_p1 = scmp.ge.s32.totalorder %s4837_s26, 4   ;;  %s7118_s15 = smov %s4675_s16 }
 0x79e   : > { %s7119_s16 = smov %s4679_s17  ;;  %s7120_s17 = smov %s4853_s14 }
 0x79f   : > { %s7121_s18 = smov %s4837_s26  ;;  %20 = sbr.rel (!%p18_p1) target bundleno = 6 (0x6), region = 95 }
 0x7a6   :  { %3872 = vsyncpa [#allocation4], 1 }
 0x7a7   :  { %3874 = vsyncpa [#allocation4 + $0x1], 1 }
 0x7a8   :  { %3875 = vsyncpa [#allocation7], 1 }
 0x7a9   :  { %3876 = vsyncpa [#allocation5], 1 }
 0x7aa   :  { %3878 = vsyncpa [#allocation5 + $0x1], 1 }

</bundles_post_ra>
